<compile_context>
chip_gen: v7x
topology: tpu7x:2x2x1
jax: 0.10.0
libtpu: 0.0.40
codegen_flags: <defaults>
</compile_context>

<pallas_src>
import jax
import jax.numpy as jnp
from jax.experimental import pallas as pl
from jax.experimental.pallas import tpu as pltpu

# ---------------- config (small, deterministic) ----------------
VOCAB = 50
EMBED = 32
HIDDEN = 32          # H ; LSTM is bidirectional -> features are 2H = 64
SEQ = 8              # T
BATCH = 2            # B
D_A = 16
R = 8                # attention hops ; classifier input is R*R = 64

NS = 4               # fused streams: [lstm1-fwd, lstm2-fwd, lstm1-bwd, lstm2-bwd]
HS = NS * HIDDEN     # 128 : stacked hidden width (lane-dense)
GW = 4 * HS          # 512 : gate width, layout [gate(i,f,g,o), stream, H]


# ---------------- fused forward kernel ----------------
def _fused_kernel(ids_ref, px_ref, whh_ref, bg_ref,
                  a1w1_ref, a1b1_ref, a1w2_ref,
                  a2w1_ref, a2b1_ref, a2w2_ref,
                  biw_ref, bib_ref,
                  m1_ref, mb1_ref, m2_ref, mb2_ref, m3_ref, mb3_ref,
                  out_ref, fwd_scr, bwd_scr):
    T, B, H2 = fwd_scr.shape            # (SEQ, BATCH, 2*HIDDEN)
    H = H2 // 2
    TB = T * B
    V = px_ref.shape[1]
    hs = whh_ref.shape[0]               # NS * H  (= 128)
    gw = whh_ref.shape[1]               # 4 * hs  (= 512)

    # ---- embedding lookup fused with the LSTM input projection (one-time) --
    # gx[t*B+b, gate*hs + s*H + :] = W_ih^s-gate @ emb(token of stream s at t) + bias
    # Backward streams' tokens are already time-reversed in `ids`.
    iota_v = jax.lax.broadcasted_iota(jnp.int32, (TB, V), 1)
    gx = jnp.zeros((TB, gw), jnp.float32)
    for s in range(4):
        oh = (ids_ref[s * TB:(s + 1) * TB, :] == iota_v).astype(jnp.float32)  # [TB, V]
        gx = gx + jnp.dot(oh, px_ref[s], preferred_element_type=jnp.float32)
    gx = gx + bg_ref[...]                                                     # [TB, gw]

    whh = whh_ref[...]                  # [hs, gw], block-diagonal over streams

    # ---- 4-stream fused recurrence, fully unrolled ----
    h = jnp.zeros((B, hs), jnp.float32)
    c = jnp.zeros((B, hs), jnp.float32)
    for j in range(T):
        gates = gx[j * B:(j + 1) * B, :] + jnp.dot(
            h, whh, preferred_element_type=jnp.float32)        # [B, gw]
        i_g = jax.nn.sigmoid(gates[:, 0:hs])                   # clean 128-lane slices
        f_g = jax.nn.sigmoid(gates[:, hs:2 * hs])
        g_g = jnp.tanh(gates[:, 2 * hs:3 * hs])
        o_g = jax.nn.sigmoid(gates[:, 3 * hs:4 * hs])
        c = f_g * c + i_g * g_g
        h = o_g * jnp.tanh(c)
        fwd_scr[j] = h[:, 0:H2]                 # [f1 | f2] at real time j
        bwd_scr[T - 1 - j] = h[:, H2:2 * H2]    # [b1 | b2] at real time T-1-j

    x_f = fwd_scr[...]                  # [T, B, 2H]  lanes: [f1 | f2]
    x_b = bwd_scr[...]                  # [T, B, 2H]  lanes: [b1 | b2]
    x1 = jnp.concatenate([x_f[:, :, 0:H], x_b[:, :, 0:H]], axis=-1)          # lstm1 out
    x2 = jnp.concatenate([x_f[:, :, H:2 * H], x_b[:, :, H:2 * H]], axis=-1)  # lstm2 out

    # ---- structured self-attention (softmax over hops r, as in the torch code) ----
    def self_attn(x, w1, b1, w2):
        xf = x.reshape(TB, H2)
        wv = jnp.tanh(jnp.dot(xf, w1, preferred_element_type=jnp.float32) + b1)
        wv = jnp.dot(wv, w2, preferred_element_type=jnp.float32)             # [TB, r]
        r = wv.shape[-1]
        wv = jnp.transpose(wv.reshape(T, B, r), (1, 0, 2))                   # [B, T, r]
        wv = jax.nn.softmax(wv, axis=2)                                      # over r
        wv = jnp.transpose(wv, (0, 2, 1))                                    # [B, r, T]
        xb = jnp.transpose(x, (1, 0, 2))                                     # [B, T, 2H]
        return jnp.einsum("brt,btd->brd", wv, xb,
                          preferred_element_type=jnp.float32)                # [B, r, 2H]

    A = self_attn(x1, a1w1_ref[...], a1b1_ref[...], a1w2_ref[...])
    Bm = self_attn(x2, a2w1_ref[...], a2b1_ref[...], a2w2_ref[...])

    # ---- bilinear attention ----
    r = A.shape[1]
    My = jnp.dot(Bm.reshape(B * r, H2), biw_ref[...],
                 preferred_element_type=jnp.float32) + bib_ref[...]
    My = My.reshape(B, r, H2)
    S = jnp.einsum("bid,bjd->bij", A, My, preferred_element_type=jnp.float32)  # [B,r,r]

    # ---- classifier MLP ----
    flat = S.reshape(B, r * r)
    z1 = jnp.maximum(jnp.dot(flat, m1_ref[...],
                             preferred_element_type=jnp.float32) + mb1_ref[...], 0.0)
    z2 = jnp.maximum(jnp.dot(z1, m2_ref[...],
                             preferred_element_type=jnp.float32) + mb2_ref[...], 0.0)
    out_ref[...] = jnp.dot(z2, m3_ref[...],
                           preferred_element_type=jnp.float32) + mb3_ref[...]


# ---------------- host-side parameter packing (done once) ----------------
def pack_params(params):
    """Repack PyTorch-style parameters into the fused-kernel layout."""
    H, V = HIDDEN, VOCAB
    emb = params["embedding"]
    l1, l2 = params["lstm1"], params["lstm2"]
    streams = [
        (l1["wih_f"], l1["whh_f"], l1["b_f"]),   # stream 0: lstm1 forward
        (l2["wih_f"], l2["whh_f"], l2["b_f"]),   # stream 1: lstm2 forward
        (l1["wih_b"], l1["whh_b"], l1["b_b"]),   # stream 2: lstm1 backward
        (l2["wih_b"], l2["whh_b"], l2["b_b"]),   # stream 3: lstm2 backward
    ]
    whh_big = jnp.zeros((HS, GW), jnp.float32)   # block-diagonal hidden weights
    bg = jnp.zeros((1, GW), jnp.float32)         # combined gate bias
    px = []                                      # per-stream (embedding @ W_ih) tables
    for s, (wih, whh, b) in enumerate(streams):
        proj = emb @ wih.T                       # [V, 4H], gate-major columns
        p_s = jnp.zeros((V, GW), jnp.float32)
        for g in range(4):
            c0 = g * HS + s * H                  # gate-major global layout
            p_s = p_s.at[:, c0:c0 + H].set(proj[:, g * H:(g + 1) * H])
            whh_big = whh_big.at[s * H:(s + 1) * H, c0:c0 + H].set(
                whh[g * H:(g + 1) * H, :].T)
            bg = bg.at[0, c0:c0 + H].set(b[0, g * H:(g + 1) * H])
        px.append(p_s)

    a1, a2, it, m = params["attn1"], params["attn2"], params["inter"], params["mlp"]
    return dict(
        px=jnp.stack(px),                        # [4, V, GW]
        whh=whh_big, bg=bg,
        a1w1=a1["w1"].T, a1b1=a1["b1"], a1w2=a1["w2"].T,
        a2w1=a2["w1"].T, a2b1=a2["b1"], a2w2=a2["w2"].T,
        biw=it["w"].T, bib=it["b"],
        m1=m["w1"].T, mb1=m["b1"], m2=m["w2"].T, mb2=m["b2"],
        m3=m["w3"].T, mb3=m["b3"],
    )


# ---------------- full model forward: ONE pallas_call ----------------
@jax.jit
def model_forward(packed, arg1, arg2):
    T, B = arg1.shape
    # Stream order must match pack_params: [arg1, arg2, reversed(arg1), reversed(arg2)].
    ids = jnp.stack([arg1, arg2, arg1[::-1], arg2[::-1]], axis=0)
    ids = ids.reshape(4 * T * B, 1).astype(jnp.int32)

    vmem = pl.BlockSpec(memory_space=pltpu.MemorySpace.VMEM)
    return pl.pallas_call(
        _fused_kernel,
        out_shape=jax.ShapeDtypeStruct((B, 2), jnp.float32),
        in_specs=[vmem] * 18,
        out_specs=vmem,
        scratch_shapes=[pltpu.VMEM((T, B, 2 * HIDDEN), jnp.float32),   # fwd outputs
                        pltpu.VMEM((T, B, 2 * HIDDEN), jnp.float32)],  # bwd outputs
    )(ids, packed["px"], packed["whh"], packed["bg"],
      packed["a1w1"], packed["a1b1"], packed["a1w2"],
      packed["a2w1"], packed["a2b1"], packed["a2w2"],
      packed["biw"], packed["bib"],
      packed["m1"], packed["mb1"], packed["m2"], packed["mb2"],
      packed["m3"], packed["mb3"])


# ---------------- deterministic parameter init ----------------
def init_params(key):
    keys = iter(jax.random.split(key, 40))

    def w(shape, scale=0.1):
        return scale * jax.random.normal(next(keys), shape, jnp.float32)

    def lstm_p():
        H, E = HIDDEN, EMBED
        # b_* already folds PyTorch's (b_ih + b_hh)
        return dict(wih_f=w((4 * H, E)), whh_f=w((4 * H, H)), b_f=w((1, 4 * H)),
                    wih_b=w((4 * H, E)), whh_b=w((4 * H, H)), b_b=w((1, 4 * H)))

    def attn_p():
        return dict(w1=w((D_A, 2 * HIDDEN)), b1=w((1, D_A)), w2=w((R, D_A)))

    return dict(
        embedding=w((VOCAB, EMBED), 1.0),
        lstm1=lstm_p(), lstm2=lstm_p(),
        attn1=attn_p(), attn2=attn_p(),
        inter=dict(w=w((2 * HIDDEN, 2 * HIDDEN)), b=w((1, 2 * HIDDEN))),
        mlp=dict(w1=w((192, R * R)), b1=w((1, 192)),
                 w2=w((84, 192)), b2=w((1, 84)),
                 w3=w((2, 84)), b3=w((1, 2))),
    )


# ---------------- pure-JAX reference (for correctness check) ----------------
def ref_forward(params, arg1, arg2):
    def lstm_dir(x, wih, whh, b):
        H = whh.shape[1]

        def step(carry, x_t):
            h, c = carry
            g = x_t @ wih.T + h @ whh.T + b[0]
            i = jax.nn.sigmoid(g[:, :H])
            f = jax.nn.sigmoid(g[:, H:2 * H])
            gg = jnp.tanh(g[:, 2 * H:3 * H])
            o = jax.nn.sigmoid(g[:, 3 * H:])
            c = f * c + i * gg
            h = o * jnp.tanh(c)
            return (h, c), h

        h0 = jnp.zeros((x.shape[1], H), jnp.float32)
        _, hs = jax.lax.scan(step, (h0, h0), x)
        return hs

    def bilstm_ref(x, p):
        hf = lstm_dir(x, p["wih_f"], p["whh_f"], p["b_f"])
        hb = lstm_dir(x[::-1], p["wih_b"], p["whh_b"], p["b_b"])[::-1]
        return jnp.concatenate([hf, hb], axis=-1)

    def self_attn_ref(x, p):
        wv = jnp.tanh(x @ p["w1"].T + p["b1"][0])
        wv = wv @ p["w2"].T
        wv = jax.nn.softmax(jnp.transpose(wv, (1, 0, 2)), axis=2)
        wv = jnp.transpose(wv, (0, 2, 1))
        return jnp.einsum("brt,btd->brd", wv, jnp.transpose(x, (1, 0, 2)))

    emb1 = jnp.take(params["embedding"], arg1, axis=0)
    emb2 = jnp.take(params["embedding"], arg2, axis=0)
    o1 = bilstm_ref(emb1, params["lstm1"])
    o2 = bilstm_ref(emb2, params["lstm2"])
    A = self_attn_ref(o1, params["attn1"])
    Bm = self_attn_ref(o2, params["attn2"])
    My = Bm @ params["inter"]["w"].T + params["inter"]["b"][0]
    S = jnp.einsum("bid,bjd->bij", A, My)
    h = S.reshape(-1, R * R)
    m = params["mlp"]
    h = jax.nn.relu(h @ m["w1"].T + m["b1"][0])
    h = jax.nn.relu(h @ m["w2"].T + m["b2"][0])
    return h @ m["w3"].T + m["b3"][0]


if __name__ == "__main__":
    key = jax.random.PRNGKey(0)
    k_param, k_a1, k_a2 = jax.random.split(key, 3)
    params = init_params(k_param)
    packed = pack_params(params)

    arg1 = jax.random.randint(k_a1, (SEQ, BATCH), 0, VOCAB, dtype=jnp.int32)
    arg2 = jax.random.randint(k_a2, (SEQ, BATCH), 0, VOCAB, dtype=jnp.int32)

    out = jax.block_until_ready(model_forward(packed, arg1, arg2))
    assert out.shape == (BATCH, 2), out.shape

    ref = jax.block_until_ready(ref_forward(params, arg1, arg2))
    max_err = float(jnp.max(jnp.abs(out - ref)))
    assert jnp.allclose(out, ref, rtol=1e-3, atol=1e-4), (out, ref, max_err)

    print("KERNEL_OK")
</pallas_src>

<mosaic_0001>
module attributes {stable_mosaic.version = 11 : i64} {
  func.func @_fused_kernel(%arg0: memref<64x1xi32, #tpu.memory_space<vmem>>, %arg1: memref<4x50x512xf32, #tpu.memory_space<vmem>>, %arg2: memref<128x512xf32, #tpu.memory_space<vmem>>, %arg3: memref<1x512xf32, #tpu.memory_space<vmem>>, %arg4: memref<64x16xf32, #tpu.memory_space<vmem>>, %arg5: memref<1x16xf32, #tpu.memory_space<vmem>>, %arg6: memref<16x8xf32, #tpu.memory_space<vmem>>, %arg7: memref<64x16xf32, #tpu.memory_space<vmem>>, %arg8: memref<1x16xf32, #tpu.memory_space<vmem>>, %arg9: memref<16x8xf32, #tpu.memory_space<vmem>>, %arg10: memref<64x64xf32, #tpu.memory_space<vmem>>, %arg11: memref<1x64xf32, #tpu.memory_space<vmem>>, %arg12: memref<64x192xf32, #tpu.memory_space<vmem>>, %arg13: memref<1x192xf32, #tpu.memory_space<vmem>>, %arg14: memref<192x84xf32, #tpu.memory_space<vmem>>, %arg15: memref<1x84xf32, #tpu.memory_space<vmem>>, %arg16: memref<84x2xf32, #tpu.memory_space<vmem>>, %arg17: memref<1x2xf32, #tpu.memory_space<vmem>>, %arg18: memref<2x2xf32, #tpu.memory_space<vmem>>, %arg19: memref<8x2x64xf32, #tpu.memory_space<vmem>>, %arg20: memref<8x2x64xf32, #tpu.memory_space<vmem>>) attributes {dimension_semantics = [], scalar_prefetch = 0 : i64, scratch_operands = 2 : i64, tpu.core_type = #tpu.core_type<tc>} {
    %0 = tpu.iota {dimensions = array<i32: 1>} : vector<16x50xi32>
    %cst = arith.constant 0.000000e+00 : f32
    %1 = vector.broadcast %cst : f32 to vector<16x512xf32>
    %c0 = arith.constant 0 : index
    %c0_0 = arith.constant 0 : index
    %2 = vector.load %arg0[%c0, %c0_0] : memref<64x1xi32, #tpu.memory_space<vmem>>, vector<16x1xi32>
    %3 = vector.broadcast %2 : vector<16x1xi32> to vector<16x50xi32>
    %4 = arith.cmpi eq, %3, %0 : vector<16x50xi32>
    %5 = arith.extui %4 : vector<16x50xi1> to vector<16x50xi32>
    %6 = arith.sitofp %5 : vector<16x50xi32> to vector<16x50xf32>
    %c0_1 = arith.constant 0 : index
    %c0_2 = arith.constant 0 : index
    %c0_3 = arith.constant 0 : index
    %7 = vector.load %arg1[%c0_1, %c0_2, %c0_3] : memref<4x50x512xf32, #tpu.memory_space<vmem>>, vector<1x50x512xf32>
    %8 = vector.shape_cast %7 : vector<1x50x512xf32> to vector<50x512xf32>
    %cst_4 = arith.constant dense<0.000000e+00> : vector<16x512xf32>
    %9 = tpu.matmul %6, %8, %cst_4 {dimension_numbers = #tpu.dot_dimension_numbers<[1], [0], [0], [1], [0, 0, 1, 1], [], []>} : vector<16x50xf32>, vector<50x512xf32>, vector<16x512xf32> -> vector<16x512xf32>
    %10 = arith.addf %1, %9 : vector<16x512xf32>
    %c16 = arith.constant 16 : index
    %c0_5 = arith.constant 0 : index
    %11 = vector.load %arg0[%c16, %c0_5] : memref<64x1xi32, #tpu.memory_space<vmem>>, vector<16x1xi32>
    %12 = vector.broadcast %11 : vector<16x1xi32> to vector<16x50xi32>
    %13 = arith.cmpi eq, %12, %0 : vector<16x50xi32>
    %14 = arith.extui %13 : vector<16x50xi1> to vector<16x50xi32>
    %15 = arith.sitofp %14 : vector<16x50xi32> to vector<16x50xf32>
    %c1 = arith.constant 1 : index
    %c0_6 = arith.constant 0 : index
    %c0_7 = arith.constant 0 : index
    %16 = vector.load %arg1[%c1, %c0_6, %c0_7] : memref<4x50x512xf32, #tpu.memory_space<vmem>>, vector<1x50x512xf32>
    %17 = vector.shape_cast %16 : vector<1x50x512xf32> to vector<50x512xf32>
    %cst_8 = arith.constant dense<0.000000e+00> : vector<16x512xf32>
    %18 = tpu.matmul %15, %17, %cst_8 {dimension_numbers = #tpu.dot_dimension_numbers<[1], [0], [0], [1], [0, 0, 1, 1], [], []>} : vector<16x50xf32>, vector<50x512xf32>, vector<16x512xf32> -> vector<16x512xf32>
    %19 = arith.addf %10, %18 : vector<16x512xf32>
    %c32 = arith.constant 32 : index
    %c0_9 = arith.constant 0 : index
    %20 = vector.load %arg0[%c32, %c0_9] : memref<64x1xi32, #tpu.memory_space<vmem>>, vector<16x1xi32>
    %21 = vector.broadcast %20 : vector<16x1xi32> to vector<16x50xi32>
    %22 = arith.cmpi eq, %21, %0 : vector<16x50xi32>
    %23 = arith.extui %22 : vector<16x50xi1> to vector<16x50xi32>
    %24 = arith.sitofp %23 : vector<16x50xi32> to vector<16x50xf32>
    %c2 = arith.constant 2 : index
    %c0_10 = arith.constant 0 : index
    %c0_11 = arith.constant 0 : index
    %25 = vector.load %arg1[%c2, %c0_10, %c0_11] : memref<4x50x512xf32, #tpu.memory_space<vmem>>, vector<1x50x512xf32>
    %26 = vector.shape_cast %25 : vector<1x50x512xf32> to vector<50x512xf32>
    %cst_12 = arith.constant dense<0.000000e+00> : vector<16x512xf32>
    %27 = tpu.matmul %24, %26, %cst_12 {dimension_numbers = #tpu.dot_dimension_numbers<[1], [0], [0], [1], [0, 0, 1, 1], [], []>} : vector<16x50xf32>, vector<50x512xf32>, vector<16x512xf32> -> vector<16x512xf32>
    %28 = arith.addf %19, %27 : vector<16x512xf32>
    %c48 = arith.constant 48 : index
    %c0_13 = arith.constant 0 : index
    %29 = vector.load %arg0[%c48, %c0_13] : memref<64x1xi32, #tpu.memory_space<vmem>>, vector<16x1xi32>
    %30 = vector.broadcast %29 : vector<16x1xi32> to vector<16x50xi32>
    %31 = arith.cmpi eq, %30, %0 : vector<16x50xi32>
    %32 = arith.extui %31 : vector<16x50xi1> to vector<16x50xi32>
    %33 = arith.sitofp %32 : vector<16x50xi32> to vector<16x50xf32>
    %c3 = arith.constant 3 : index
    %c0_14 = arith.constant 0 : index
    %c0_15 = arith.constant 0 : index
    %34 = vector.load %arg1[%c3, %c0_14, %c0_15] : memref<4x50x512xf32, #tpu.memory_space<vmem>>, vector<1x50x512xf32>
    %35 = vector.shape_cast %34 : vector<1x50x512xf32> to vector<50x512xf32>
    %cst_16 = arith.constant dense<0.000000e+00> : vector<16x512xf32>
    %36 = tpu.matmul %33, %35, %cst_16 {dimension_numbers = #tpu.dot_dimension_numbers<[1], [0], [0], [1], [0, 0, 1, 1], [], []>} : vector<16x50xf32>, vector<50x512xf32>, vector<16x512xf32> -> vector<16x512xf32>
    %37 = arith.addf %28, %36 : vector<16x512xf32>
    %c0_17 = arith.constant 0 : index
    %c0_18 = arith.constant 0 : index
    %38 = vector.load %arg3[%c0_17, %c0_18] : memref<1x512xf32, #tpu.memory_space<vmem>>, vector<1x512xf32>
    %39 = vector.broadcast %38 : vector<1x512xf32> to vector<16x512xf32>
    %40 = arith.addf %37, %39 : vector<16x512xf32>
    %c0_19 = arith.constant 0 : index
    %c0_20 = arith.constant 0 : index
    %41 = vector.load %arg2[%c0_19, %c0_20] : memref<128x512xf32, #tpu.memory_space<vmem>>, vector<128x512xf32>
    %cst_21 = arith.constant 0.000000e+00 : f32
    %42 = vector.broadcast %cst_21 : f32 to vector<2x128xf32>
    %cst_22 = arith.constant 0.000000e+00 : f32
    %43 = vector.broadcast %cst_22 : f32 to vector<2x128xf32>
    %44 = vector.extract_strided_slice %40 {offsets = [0, 0], sizes = [2, 512], strides = [1, 1]} : vector<16x512xf32> to vector<2x512xf32>
    %cst_23 = arith.constant dense<0.000000e+00> : vector<2x512xf32>
    %45 = tpu.matmul %42, %41, %cst_23 {dimension_numbers = #tpu.dot_dimension_numbers<[1], [0], [0], [1], [0, 0, 1, 1], [], []>} : vector<2x128xf32>, vector<128x512xf32>, vector<2x512xf32> -> vector<2x512xf32>
    %46 = arith.addf %44, %45 : vector<2x512xf32>
    %47 = vector.extract_strided_slice %46 {offsets = [0, 0], sizes = [2, 128], strides = [1, 1]} : vector<2x512xf32> to vector<2x128xf32>
    %48 = arith.negf %47 : vector<2x128xf32>
    %49 = math.exp %48 : vector<2x128xf32>
    %cst_24 = arith.constant 1.000000e+00 : f32
    %50 = vector.broadcast %cst_24 : f32 to vector<2x128xf32>
    %51 = arith.addf %50, %49 : vector<2x128xf32>
    %52 = arith.divf %50, %51 : vector<2x128xf32>
    %53 = vector.extract_strided_slice %46 {offsets = [0, 128], sizes = [2, 128], strides = [1, 1]} : vector<2x512xf32> to vector<2x128xf32>
    %54 = arith.negf %53 : vector<2x128xf32>
    %55 = math.exp %54 : vector<2x128xf32>
    %cst_25 = arith.constant 1.000000e+00 : f32
    %56 = vector.broadcast %cst_25 : f32 to vector<2x128xf32>
    %57 = arith.addf %56, %55 : vector<2x128xf32>
    %58 = arith.divf %56, %57 : vector<2x128xf32>
    %59 = vector.extract_strided_slice %46 {offsets = [0, 256], sizes = [2, 128], strides = [1, 1]} : vector<2x512xf32> to vector<2x128xf32>
    %60 = math.tanh %59 : vector<2x128xf32>
    %61 = vector.extract_strided_slice %46 {offsets = [0, 384], sizes = [2, 128], strides = [1, 1]} : vector<2x512xf32> to vector<2x128xf32>
    %62 = arith.negf %61 : vector<2x128xf32>
    %63 = math.exp %62 : vector<2x128xf32>
    %cst_26 = arith.constant 1.000000e+00 : f32
    %64 = vector.broadcast %cst_26 : f32 to vector<2x128xf32>
    %65 = arith.addf %64, %63 : vector<2x128xf32>
    %66 = arith.divf %64, %65 : vector<2x128xf32>
    %67 = arith.mulf %58, %43 : vector<2x128xf32>
    %68 = arith.mulf %52, %60 : vector<2x128xf32>
    %69 = arith.addf %67, %68 : vector<2x128xf32>
    %70 = math.tanh %69 : vector<2x128xf32>
    %71 = arith.mulf %66, %70 : vector<2x128xf32>
    %72 = vector.extract_strided_slice %71 {offsets = [0, 0], sizes = [2, 64], strides = [1, 1]} : vector<2x128xf32> to vector<2x64xf32>
    %c0_27 = arith.constant 0 : index
    %c0_28 = arith.constant 0 : index
    %c0_29 = arith.constant 0 : index
    %73 = vector.load %arg19[%c0_27, %c0_28, %c0_29] : memref<8x2x64xf32, #tpu.memory_space<vmem>>, vector<1x2x64xf32>
    %74 = vector.shape_cast %73 : vector<1x2x64xf32> to vector<2x64xf32>
    %75 = vector.shape_cast %72 : vector<2x64xf32> to vector<1x2x64xf32>
    tpu.vector_store %arg19[%c0_27, %c0_28, %c0_29], %75 {strides = array<i32>} : memref<8x2x64xf32, #tpu.memory_space<vmem>>, vector<1x2x64xf32>,
    %76 = vector.extract_strided_slice %71 {offsets = [0, 64], sizes = [2, 64], strides = [1, 1]} : vector<2x128xf32> to vector<2x64xf32>
    %c7 = arith.constant 7 : index
    %c0_30 = arith.constant 0 : index
    %c0_31 = arith.constant 0 : index
    %77 = vector.load %arg20[%c7, %c0_30, %c0_31] : memref<8x2x64xf32, #tpu.memory_space<vmem>>, vector<1x2x64xf32>
    %78 = vector.shape_cast %77 : vector<1x2x64xf32> to vector<2x64xf32>
    %79 = vector.shape_cast %76 : vector<2x64xf32> to vector<1x2x64xf32>
    tpu.vector_store %arg20[%c7, %c0_30, %c0_31], %79 {strides = array<i32>} : memref<8x2x64xf32, #tpu.memory_space<vmem>>, vector<1x2x64xf32>,
    %80 = vector.extract_strided_slice %40 {offsets = [2, 0], sizes = [2, 512], strides = [1, 1]} : vector<16x512xf32> to vector<2x512xf32>
    %cst_32 = arith.constant dense<0.000000e+00> : vector<2x512xf32>
    %81 = tpu.matmul %71, %41, %cst_32 {dimension_numbers = #tpu.dot_dimension_numbers<[1], [0], [0], [1], [0, 0, 1, 1], [], []>} : vector<2x128xf32>, vector<128x512xf32>, vector<2x512xf32> -> vector<2x512xf32>
    %82 = arith.addf %80, %81 : vector<2x512xf32>
    %83 = vector.extract_strided_slice %82 {offsets = [0, 0], sizes = [2, 128], strides = [1, 1]} : vector<2x512xf32> to vector<2x128xf32>
    %84 = arith.negf %83 : vector<2x128xf32>
    %85 = math.exp %84 : vector<2x128xf32>
    %cst_33 = arith.constant 1.000000e+00 : f32
    %86 = vector.broadcast %cst_33 : f32 to vector<2x128xf32>
    %87 = arith.addf %86, %85 : vector<2x128xf32>
    %88 = arith.divf %86, %87 : vector<2x128xf32>
    %89 = vector.extract_strided_slice %82 {offsets = [0, 128], sizes = [2, 128], strides = [1, 1]} : vector<2x512xf32> to vector<2x128xf32>
    %90 = arith.negf %89 : vector<2x128xf32>
    %91 = math.exp %90 : vector<2x128xf32>
    %cst_34 = arith.constant 1.000000e+00 : f32
    %92 = vector.broadcast %cst_34 : f32 to vector<2x128xf32>
    %93 = arith.addf %92, %91 : vector<2x128xf32>
    %94 = arith.divf %92, %93 : vector<2x128xf32>
    %95 = vector.extract_strided_slice %82 {offsets = [0, 256], sizes = [2, 128], strides = [1, 1]} : vector<2x512xf32> to vector<2x128xf32>
    %96 = math.tanh %95 : vector<2x128xf32>
    %97 = vector.extract_strided_slice %82 {offsets = [0, 384], sizes = [2, 128], strides = [1, 1]} : vector<2x512xf32> to vector<2x128xf32>
    %98 = arith.negf %97 : vector<2x128xf32>
    %99 = math.exp %98 : vector<2x128xf32>
    %cst_35 = arith.constant 1.000000e+00 : f32
    %100 = vector.broadcast %cst_35 : f32 to vector<2x128xf32>
    %101 = arith.addf %100, %99 : vector<2x128xf32>
    %102 = arith.divf %100, %101 : vector<2x128xf32>
    %103 = arith.mulf %94, %69 : vector<2x128xf32>
    %104 = arith.mulf %88, %96 : vector<2x128xf32>
    %105 = arith.addf %103, %104 : vector<2x128xf32>
    %106 = math.tanh %105 : vector<2x128xf32>
    %107 = arith.mulf %102, %106 : vector<2x128xf32>
    %108 = vector.extract_strided_slice %107 {offsets = [0, 0], sizes = [2, 64], strides = [1, 1]} : vector<2x128xf32> to vector<2x64xf32>
    %c1_36 = arith.constant 1 : index
    %c0_37 = arith.constant 0 : index
    %c0_38 = arith.constant 0 : index
    %109 = vector.load %arg19[%c1_36, %c0_37, %c0_38] : memref<8x2x64xf32, #tpu.memory_space<vmem>>, vector<1x2x64xf32>
    %110 = vector.shape_cast %109 : vector<1x2x64xf32> to vector<2x64xf32>
    %111 = vector.shape_cast %108 : vector<2x64xf32> to vector<1x2x64xf32>
    tpu.vector_store %arg19[%c1_36, %c0_37, %c0_38], %111 {strides = array<i32>} : memref<8x2x64xf32, #tpu.memory_space<vmem>>, vector<1x2x64xf32>,
    %112 = vector.extract_strided_slice %107 {offsets = [0, 64], sizes = [2, 64], strides = [1, 1]} : vector<2x128xf32> to vector<2x64xf32>
    %c6 = arith.constant 6 : index
    %c0_39 = arith.constant 0 : index
    %c0_40 = arith.constant 0 : index
    %113 = vector.load %arg20[%c6, %c0_39, %c0_40] : memref<8x2x64xf32, #tpu.memory_space<vmem>>, vector<1x2x64xf32>
    %114 = vector.shape_cast %113 : vector<1x2x64xf32> to vector<2x64xf32>
    %115 = vector.shape_cast %112 : vector<2x64xf32> to vector<1x2x64xf32>
    tpu.vector_store %arg20[%c6, %c0_39, %c0_40], %115 {strides = array<i32>} : memref<8x2x64xf32, #tpu.memory_space<vmem>>, vector<1x2x64xf32>,
    %116 = vector.extract_strided_slice %40 {offsets = [4, 0], sizes = [2, 512], strides = [1, 1]} : vector<16x512xf32> to vector<2x512xf32>
    %cst_41 = arith.constant dense<0.000000e+00> : vector<2x512xf32>
    %117 = tpu.matmul %107, %41, %cst_41 {dimension_numbers = #tpu.dot_dimension_numbers<[1], [0], [0], [1], [0, 0, 1, 1], [], []>} : vector<2x128xf32>, vector<128x512xf32>, vector<2x512xf32> -> vector<2x512xf32>
    %118 = arith.addf %116, %117 : vector<2x512xf32>
    %119 = vector.extract_strided_slice %118 {offsets = [0, 0], sizes = [2, 128], strides = [1, 1]} : vector<2x512xf32> to vector<2x128xf32>
    %120 = arith.negf %119 : vector<2x128xf32>
    %121 = math.exp %120 : vector<2x128xf32>
    %cst_42 = arith.constant 1.000000e+00 : f32
    %122 = vector.broadcast %cst_42 : f32 to vector<2x128xf32>
    %123 = arith.addf %122, %121 : vector<2x128xf32>
    %124 = arith.divf %122, %123 : vector<2x128xf32>
    %125 = vector.extract_strided_slice %118 {offsets = [0, 128], sizes = [2, 128], strides = [1, 1]} : vector<2x512xf32> to vector<2x128xf32>
    %126 = arith.negf %125 : vector<2x128xf32>
    %127 = math.exp %126 : vector<2x128xf32>
    %cst_43 = arith.constant 1.000000e+00 : f32
    %128 = vector.broadcast %cst_43 : f32 to vector<2x128xf32>
    %129 = arith.addf %128, %127 : vector<2x128xf32>
    %130 = arith.divf %128, %129 : vector<2x128xf32>
    %131 = vector.extract_strided_slice %118 {offsets = [0, 256], sizes = [2, 128], strides = [1, 1]} : vector<2x512xf32> to vector<2x128xf32>
    %132 = math.tanh %131 : vector<2x128xf32>
    %133 = vector.extract_strided_slice %118 {offsets = [0, 384], sizes = [2, 128], strides = [1, 1]} : vector<2x512xf32> to vector<2x128xf32>
    %134 = arith.negf %133 : vector<2x128xf32>
    %135 = math.exp %134 : vector<2x128xf32>
    %cst_44 = arith.constant 1.000000e+00 : f32
    %136 = vector.broadcast %cst_44 : f32 to vector<2x128xf32>
    %137 = arith.addf %136, %135 : vector<2x128xf32>
    %138 = arith.divf %136, %137 : vector<2x128xf32>
    %139 = arith.mulf %130, %105 : vector<2x128xf32>
    %140 = arith.mulf %124, %132 : vector<2x128xf32>
    %141 = arith.addf %139, %140 : vector<2x128xf32>
    %142 = math.tanh %141 : vector<2x128xf32>
    %143 = arith.mulf %138, %142 : vector<2x128xf32>
    %144 = vector.extract_strided_slice %143 {offsets = [0, 0], sizes = [2, 64], strides = [1, 1]} : vector<2x128xf32> to vector<2x64xf32>
    %c2_45 = arith.constant 2 : index
    %c0_46 = arith.constant 0 : index
    %c0_47 = arith.constant 0 : index
    %145 = vector.load %arg19[%c2_45, %c0_46, %c0_47] : memref<8x2x64xf32, #tpu.memory_space<vmem>>, vector<1x2x64xf32>
    %146 = vector.shape_cast %145 : vector<1x2x64xf32> to vector<2x64xf32>
    %147 = vector.shape_cast %144 : vector<2x64xf32> to vector<1x2x64xf32>
    tpu.vector_store %arg19[%c2_45, %c0_46, %c0_47], %147 {strides = array<i32>} : memref<8x2x64xf32, #tpu.memory_space<vmem>>, vector<1x2x64xf32>,
    %148 = vector.extract_strided_slice %143 {offsets = [0, 64], sizes = [2, 64], strides = [1, 1]} : vector<2x128xf32> to vector<2x64xf32>
    %c5 = arith.constant 5 : index
    %c0_48 = arith.constant 0 : index
    %c0_49 = arith.constant 0 : index
    %149 = vector.load %arg20[%c5, %c0_48, %c0_49] : memref<8x2x64xf32, #tpu.memory_space<vmem>>, vector<1x2x64xf32>
    %150 = vector.shape_cast %149 : vector<1x2x64xf32> to vector<2x64xf32>
    %151 = vector.shape_cast %148 : vector<2x64xf32> to vector<1x2x64xf32>
    tpu.vector_store %arg20[%c5, %c0_48, %c0_49], %151 {strides = array<i32>} : memref<8x2x64xf32, #tpu.memory_space<vmem>>, vector<1x2x64xf32>,
    %152 = vector.extract_strided_slice %40 {offsets = [6, 0], sizes = [2, 512], strides = [1, 1]} : vector<16x512xf32> to vector<2x512xf32>
    %cst_50 = arith.constant dense<0.000000e+00> : vector<2x512xf32>
    %153 = tpu.matmul %143, %41, %cst_50 {dimension_numbers = #tpu.dot_dimension_numbers<[1], [0], [0], [1], [0, 0, 1, 1], [], []>} : vector<2x128xf32>, vector<128x512xf32>, vector<2x512xf32> -> vector<2x512xf32>
    %154 = arith.addf %152, %153 : vector<2x512xf32>
    %155 = vector.extract_strided_slice %154 {offsets = [0, 0], sizes = [2, 128], strides = [1, 1]} : vector<2x512xf32> to vector<2x128xf32>
    %156 = arith.negf %155 : vector<2x128xf32>
    %157 = math.exp %156 : vector<2x128xf32>
    %cst_51 = arith.constant 1.000000e+00 : f32
    %158 = vector.broadcast %cst_51 : f32 to vector<2x128xf32>
    %159 = arith.addf %158, %157 : vector<2x128xf32>
    %160 = arith.divf %158, %159 : vector<2x128xf32>
    %161 = vector.extract_strided_slice %154 {offsets = [0, 128], sizes = [2, 128], strides = [1, 1]} : vector<2x512xf32> to vector<2x128xf32>
    %162 = arith.negf %161 : vector<2x128xf32>
    %163 = math.exp %162 : vector<2x128xf32>
    %cst_52 = arith.constant 1.000000e+00 : f32
    %164 = vector.broadcast %cst_52 : f32 to vector<2x128xf32>
    %165 = arith.addf %164, %163 : vector<2x128xf32>
    %166 = arith.divf %164, %165 : vector<2x128xf32>
    %167 = vector.extract_strided_slice %154 {offsets = [0, 256], sizes = [2, 128], strides = [1, 1]} : vector<2x512xf32> to vector<2x128xf32>
    %168 = math.tanh %167 : vector<2x128xf32>
    %169 = vector.extract_strided_slice %154 {offsets = [0, 384], sizes = [2, 128], strides = [1, 1]} : vector<2x512xf32> to vector<2x128xf32>
    %170 = arith.negf %169 : vector<2x128xf32>
    %171 = math.exp %170 : vector<2x128xf32>
    %cst_53 = arith.constant 1.000000e+00 : f32
    %172 = vector.broadcast %cst_53 : f32 to vector<2x128xf32>
    %173 = arith.addf %172, %171 : vector<2x128xf32>
    %174 = arith.divf %172, %173 : vector<2x128xf32>
    %175 = arith.mulf %166, %141 : vector<2x128xf32>
    %176 = arith.mulf %160, %168 : vector<2x128xf32>
    %177 = arith.addf %175, %176 : vector<2x128xf32>
    %178 = math.tanh %177 : vector<2x128xf32>
    %179 = arith.mulf %174, %178 : vector<2x128xf32>
    %180 = vector.extract_strided_slice %179 {offsets = [0, 0], sizes = [2, 64], strides = [1, 1]} : vector<2x128xf32> to vector<2x64xf32>
    %c3_54 = arith.constant 3 : index
    %c0_55 = arith.constant 0 : index
    %c0_56 = arith.constant 0 : index
    %181 = vector.load %arg19[%c3_54, %c0_55, %c0_56] : memref<8x2x64xf32, #tpu.memory_space<vmem>>, vector<1x2x64xf32>
    %182 = vector.shape_cast %181 : vector<1x2x64xf32> to vector<2x64xf32>
    %183 = vector.shape_cast %180 : vector<2x64xf32> to vector<1x2x64xf32>
    tpu.vector_store %arg19[%c3_54, %c0_55, %c0_56], %183 {strides = array<i32>} : memref<8x2x64xf32, #tpu.memory_space<vmem>>, vector<1x2x64xf32>,
    %184 = vector.extract_strided_slice %179 {offsets = [0, 64], sizes = [2, 64], strides = [1, 1]} : vector<2x128xf32> to vector<2x64xf32>
    %c4 = arith.constant 4 : index
    %c0_57 = arith.constant 0 : index
    %c0_58 = arith.constant 0 : index
    %185 = vector.load %arg20[%c4, %c0_57, %c0_58] : memref<8x2x64xf32, #tpu.memory_space<vmem>>, vector<1x2x64xf32>
    %186 = vector.shape_cast %185 : vector<1x2x64xf32> to vector<2x64xf32>
    %187 = vector.shape_cast %184 : vector<2x64xf32> to vector<1x2x64xf32>
    tpu.vector_store %arg20[%c4, %c0_57, %c0_58], %187 {strides = array<i32>} : memref<8x2x64xf32, #tpu.memory_space<vmem>>, vector<1x2x64xf32>,
    %188 = vector.extract_strided_slice %40 {offsets = [8, 0], sizes = [2, 512], strides = [1, 1]} : vector<16x512xf32> to vector<2x512xf32>
    %cst_59 = arith.constant dense<0.000000e+00> : vector<2x512xf32>
    %189 = tpu.matmul %179, %41, %cst_59 {dimension_numbers = #tpu.dot_dimension_numbers<[1], [0], [0], [1], [0, 0, 1, 1], [], []>} : vector<2x128xf32>, vector<128x512xf32>, vector<2x512xf32> -> vector<2x512xf32>
    %190 = arith.addf %188, %189 : vector<2x512xf32>
    %191 = vector.extract_strided_slice %190 {offsets = [0, 0], sizes = [2, 128], strides = [1, 1]} : vector<2x512xf32> to vector<2x128xf32>
    %192 = arith.negf %191 : vector<2x128xf32>
    %193 = math.exp %192 : vector<2x128xf32>
    %cst_60 = arith.constant 1.000000e+00 : f32
    %194 = vector.broadcast %cst_60 : f32 to vector<2x128xf32>
    %195 = arith.addf %194, %193 : vector<2x128xf32>
    %196 = arith.divf %194, %195 : vector<2x128xf32>
    %197 = vector.extract_strided_slice %190 {offsets = [0, 128], sizes = [2, 128], strides = [1, 1]} : vector<2x512xf32> to vector<2x128xf32>
    %198 = arith.negf %197 : vector<2x128xf32>
    %199 = math.exp %198 : vector<2x128xf32>
    %cst_61 = arith.constant 1.000000e+00 : f32
    %200 = vector.broadcast %cst_61 : f32 to vector<2x128xf32>
    %201 = arith.addf %200, %199 : vector<2x128xf32>
    %202 = arith.divf %200, %201 : vector<2x128xf32>
    %203 = vector.extract_strided_slice %190 {offsets = [0, 256], sizes = [2, 128], strides = [1, 1]} : vector<2x512xf32> to vector<2x128xf32>
    %204 = math.tanh %203 : vector<2x128xf32>
    %205 = vector.extract_strided_slice %190 {offsets = [0, 384], sizes = [2, 128], strides = [1, 1]} : vector<2x512xf32> to vector<2x128xf32>
    %206 = arith.negf %205 : vector<2x128xf32>
    %207 = math.exp %206 : vector<2x128xf32>
    %cst_62 = arith.constant 1.000000e+00 : f32
    %208 = vector.broadcast %cst_62 : f32 to vector<2x128xf32>
    %209 = arith.addf %208, %207 : vector<2x128xf32>
    %210 = arith.divf %208, %209 : vector<2x128xf32>
    %211 = arith.mulf %202, %177 : vector<2x128xf32>
    %212 = arith.mulf %196, %204 : vector<2x128xf32>
    %213 = arith.addf %211, %212 : vector<2x128xf32>
    %214 = math.tanh %213 : vector<2x128xf32>
    %215 = arith.mulf %210, %214 : vector<2x128xf32>
    %216 = vector.extract_strided_slice %215 {offsets = [0, 0], sizes = [2, 64], strides = [1, 1]} : vector<2x128xf32> to vector<2x64xf32>
    %c4_63 = arith.constant 4 : index
    %c0_64 = arith.constant 0 : index
    %c0_65 = arith.constant 0 : index
    %217 = vector.load %arg19[%c4_63, %c0_64, %c0_65] : memref<8x2x64xf32, #tpu.memory_space<vmem>>, vector<1x2x64xf32>
    %218 = vector.shape_cast %217 : vector<1x2x64xf32> to vector<2x64xf32>
    %219 = vector.shape_cast %216 : vector<2x64xf32> to vector<1x2x64xf32>
    tpu.vector_store %arg19[%c4_63, %c0_64, %c0_65], %219 {strides = array<i32>} : memref<8x2x64xf32, #tpu.memory_space<vmem>>, vector<1x2x64xf32>,
    %220 = vector.extract_strided_slice %215 {offsets = [0, 64], sizes = [2, 64], strides = [1, 1]} : vector<2x128xf32> to vector<2x64xf32>
    %c3_66 = arith.constant 3 : index
    %c0_67 = arith.constant 0 : index
    %c0_68 = arith.constant 0 : index
    %221 = vector.load %arg20[%c3_66, %c0_67, %c0_68] : memref<8x2x64xf32, #tpu.memory_space<vmem>>, vector<1x2x64xf32>
    %222 = vector.shape_cast %221 : vector<1x2x64xf32> to vector<2x64xf32>
    %223 = vector.shape_cast %220 : vector<2x64xf32> to vector<1x2x64xf32>
    tpu.vector_store %arg20[%c3_66, %c0_67, %c0_68], %223 {strides = array<i32>} : memref<8x2x64xf32, #tpu.memory_space<vmem>>, vector<1x2x64xf32>,
    %224 = vector.extract_strided_slice %40 {offsets = [10, 0], sizes = [2, 512], strides = [1, 1]} : vector<16x512xf32> to vector<2x512xf32>
    %cst_69 = arith.constant dense<0.000000e+00> : vector<2x512xf32>
    %225 = tpu.matmul %215, %41, %cst_69 {dimension_numbers = #tpu.dot_dimension_numbers<[1], [0], [0], [1], [0, 0, 1, 1], [], []>} : vector<2x128xf32>, vector<128x512xf32>, vector<2x512xf32> -> vector<2x512xf32>
    %226 = arith.addf %224, %225 : vector<2x512xf32>
    %227 = vector.extract_strided_slice %226 {offsets = [0, 0], sizes = [2, 128], strides = [1, 1]} : vector<2x512xf32> to vector<2x128xf32>
    %228 = arith.negf %227 : vector<2x128xf32>
    %229 = math.exp %228 : vector<2x128xf32>
    %cst_70 = arith.constant 1.000000e+00 : f32
    %230 = vector.broadcast %cst_70 : f32 to vector<2x128xf32>
    %231 = arith.addf %230, %229 : vector<2x128xf32>
    %232 = arith.divf %230, %231 : vector<2x128xf32>
    %233 = vector.extract_strided_slice %226 {offsets = [0, 128], sizes = [2, 128], strides = [1, 1]} : vector<2x512xf32> to vector<2x128xf32>
    %234 = arith.negf %233 : vector<2x128xf32>
    %235 = math.exp %234 : vector<2x128xf32>
    %cst_71 = arith.constant 1.000000e+00 : f32
    %236 = vector.broadcast %cst_71 : f32 to vector<2x128xf32>
    %237 = arith.addf %236, %235 : vector<2x128xf32>
    %238 = arith.divf %236, %237 : vector<2x128xf32>
    %239 = vector.extract_strided_slice %226 {offsets = [0, 256], sizes = [2, 128], strides = [1, 1]} : vector<2x512xf32> to vector<2x128xf32>
    %240 = math.tanh %239 : vector<2x128xf32>
    %241 = vector.extract_strided_slice %226 {offsets = [0, 384], sizes = [2, 128], strides = [1, 1]} : vector<2x512xf32> to vector<2x128xf32>
    %242 = arith.negf %241 : vector<2x128xf32>
    %243 = math.exp %242 : vector<2x128xf32>
    %cst_72 = arith.constant 1.000000e+00 : f32
    %244 = vector.broadcast %cst_72 : f32 to vector<2x128xf32>
    %245 = arith.addf %244, %243 : vector<2x128xf32>
    %246 = arith.divf %244, %245 : vector<2x128xf32>
    %247 = arith.mulf %238, %213 : vector<2x128xf32>
    %248 = arith.mulf %232, %240 : vector<2x128xf32>
    %249 = arith.addf %247, %248 : vector<2x128xf32>
    %250 = math.tanh %249 : vector<2x128xf32>
    %251 = arith.mulf %246, %250 : vector<2x128xf32>
    %252 = vector.extract_strided_slice %251 {offsets = [0, 0], sizes = [2, 64], strides = [1, 1]} : vector<2x128xf32> to vector<2x64xf32>
    %c5_73 = arith.constant 5 : index
    %c0_74 = arith.constant 0 : index
    %c0_75 = arith.constant 0 : index
    %253 = vector.load %arg19[%c5_73, %c0_74, %c0_75] : memref<8x2x64xf32, #tpu.memory_space<vmem>>, vector<1x2x64xf32>
    %254 = vector.shape_cast %253 : vector<1x2x64xf32> to vector<2x64xf32>
    %255 = vector.shape_cast %252 : vector<2x64xf32> to vector<1x2x64xf32>
    tpu.vector_store %arg19[%c5_73, %c0_74, %c0_75], %255 {strides = array<i32>} : memref<8x2x64xf32, #tpu.memory_space<vmem>>, vector<1x2x64xf32>,
    %256 = vector.extract_strided_slice %251 {offsets = [0, 64], sizes = [2, 64], strides = [1, 1]} : vector<2x128xf32> to vector<2x64xf32>
    %c2_76 = arith.constant 2 : index
    %c0_77 = arith.constant 0 : index
    %c0_78 = arith.constant 0 : index
    %257 = vector.load %arg20[%c2_76, %c0_77, %c0_78] : memref<8x2x64xf32, #tpu.memory_space<vmem>>, vector<1x2x64xf32>
    %258 = vector.shape_cast %257 : vector<1x2x64xf32> to vector<2x64xf32>
    %259 = vector.shape_cast %256 : vector<2x64xf32> to vector<1x2x64xf32>
    tpu.vector_store %arg20[%c2_76, %c0_77, %c0_78], %259 {strides = array<i32>} : memref<8x2x64xf32, #tpu.memory_space<vmem>>, vector<1x2x64xf32>,
    %260 = vector.extract_strided_slice %40 {offsets = [12, 0], sizes = [2, 512], strides = [1, 1]} : vector<16x512xf32> to vector<2x512xf32>
    %cst_79 = arith.constant dense<0.000000e+00> : vector<2x512xf32>
    %261 = tpu.matmul %251, %41, %cst_79 {dimension_numbers = #tpu.dot_dimension_numbers<[1], [0], [0], [1], [0, 0, 1, 1], [], []>} : vector<2x128xf32>, vector<128x512xf32>, vector<2x512xf32> -> vector<2x512xf32>
    %262 = arith.addf %260, %261 : vector<2x512xf32>
    %263 = vector.extract_strided_slice %262 {offsets = [0, 0], sizes = [2, 128], strides = [1, 1]} : vector<2x512xf32> to vector<2x128xf32>
    %264 = arith.negf %263 : vector<2x128xf32>
    %265 = math.exp %264 : vector<2x128xf32>
    %cst_80 = arith.constant 1.000000e+00 : f32
    %266 = vector.broadcast %cst_80 : f32 to vector<2x128xf32>
    %267 = arith.addf %266, %265 : vector<2x128xf32>
    %268 = arith.divf %266, %267 : vector<2x128xf32>
    %269 = vector.extract_strided_slice %262 {offsets = [0, 128], sizes = [2, 128], strides = [1, 1]} : vector<2x512xf32> to vector<2x128xf32>
    %270 = arith.negf %269 : vector<2x128xf32>
    %271 = math.exp %270 : vector<2x128xf32>
    %cst_81 = arith.constant 1.000000e+00 : f32
    %272 = vector.broadcast %cst_81 : f32 to vector<2x128xf32>
    %273 = arith.addf %272, %271 : vector<2x128xf32>
    %274 = arith.divf %272, %273 : vector<2x128xf32>
    %275 = vector.extract_strided_slice %262 {offsets = [0, 256], sizes = [2, 128], strides = [1, 1]} : vector<2x512xf32> to vector<2x128xf32>
    %276 = math.tanh %275 : vector<2x128xf32>
    %277 = vector.extract_strided_slice %262 {offsets = [0, 384], sizes = [2, 128], strides = [1, 1]} : vector<2x512xf32> to vector<2x128xf32>
    %278 = arith.negf %277 : vector<2x128xf32>
    %279 = math.exp %278 : vector<2x128xf32>
    %cst_82 = arith.constant 1.000000e+00 : f32
    %280 = vector.broadcast %cst_82 : f32 to vector<2x128xf32>
    %281 = arith.addf %280, %279 : vector<2x128xf32>
    %282 = arith.divf %280, %281 : vector<2x128xf32>
    %283 = arith.mulf %274, %249 : vector<2x128xf32>
    %284 = arith.mulf %268, %276 : vector<2x128xf32>
    %285 = arith.addf %283, %284 : vector<2x128xf32>
    %286 = math.tanh %285 : vector<2x128xf32>
    %287 = arith.mulf %282, %286 : vector<2x128xf32>
    %288 = vector.extract_strided_slice %287 {offsets = [0, 0], sizes = [2, 64], strides = [1, 1]} : vector<2x128xf32> to vector<2x64xf32>
    %c6_83 = arith.constant 6 : index
    %c0_84 = arith.constant 0 : index
    %c0_85 = arith.constant 0 : index
    %289 = vector.load %arg19[%c6_83, %c0_84, %c0_85] : memref<8x2x64xf32, #tpu.memory_space<vmem>>, vector<1x2x64xf32>
    %290 = vector.shape_cast %289 : vector<1x2x64xf32> to vector<2x64xf32>
    %291 = vector.shape_cast %288 : vector<2x64xf32> to vector<1x2x64xf32>
    tpu.vector_store %arg19[%c6_83, %c0_84, %c0_85], %291 {strides = array<i32>} : memref<8x2x64xf32, #tpu.memory_space<vmem>>, vector<1x2x64xf32>,
    %292 = vector.extract_strided_slice %287 {offsets = [0, 64], sizes = [2, 64], strides = [1, 1]} : vector<2x128xf32> to vector<2x64xf32>
    %c1_86 = arith.constant 1 : index
    %c0_87 = arith.constant 0 : index
    %c0_88 = arith.constant 0 : index
    %293 = vector.load %arg20[%c1_86, %c0_87, %c0_88] : memref<8x2x64xf32, #tpu.memory_space<vmem>>, vector<1x2x64xf32>
    %294 = vector.shape_cast %293 : vector<1x2x64xf32> to vector<2x64xf32>
    %295 = vector.shape_cast %292 : vector<2x64xf32> to vector<1x2x64xf32>
    tpu.vector_store %arg20[%c1_86, %c0_87, %c0_88], %295 {strides = array<i32>} : memref<8x2x64xf32, #tpu.memory_space<vmem>>, vector<1x2x64xf32>,
    %296 = vector.extract_strided_slice %40 {offsets = [14, 0], sizes = [2, 512], strides = [1, 1]} : vector<16x512xf32> to vector<2x512xf32>
    %cst_89 = arith.constant dense<0.000000e+00> : vector<2x512xf32>
    %297 = tpu.matmul %287, %41, %cst_89 {dimension_numbers = #tpu.dot_dimension_numbers<[1], [0], [0], [1], [0, 0, 1, 1], [], []>} : vector<2x128xf32>, vector<128x512xf32>, vector<2x512xf32> -> vector<2x512xf32>
    %298 = arith.addf %296, %297 : vector<2x512xf32>
    %299 = vector.extract_strided_slice %298 {offsets = [0, 0], sizes = [2, 128], strides = [1, 1]} : vector<2x512xf32> to vector<2x128xf32>
    %300 = arith.negf %299 : vector<2x128xf32>
    %301 = math.exp %300 : vector<2x128xf32>
    %cst_90 = arith.constant 1.000000e+00 : f32
    %302 = vector.broadcast %cst_90 : f32 to vector<2x128xf32>
    %303 = arith.addf %302, %301 : vector<2x128xf32>
    %304 = arith.divf %302, %303 : vector<2x128xf32>
    %305 = vector.extract_strided_slice %298 {offsets = [0, 128], sizes = [2, 128], strides = [1, 1]} : vector<2x512xf32> to vector<2x128xf32>
    %306 = arith.negf %305 : vector<2x128xf32>
    %307 = math.exp %306 : vector<2x128xf32>
    %cst_91 = arith.constant 1.000000e+00 : f32
    %308 = vector.broadcast %cst_91 : f32 to vector<2x128xf32>
    %309 = arith.addf %308, %307 : vector<2x128xf32>
    %310 = arith.divf %308, %309 : vector<2x128xf32>
    %311 = vector.extract_strided_slice %298 {offsets = [0, 256], sizes = [2, 128], strides = [1, 1]} : vector<2x512xf32> to vector<2x128xf32>
    %312 = math.tanh %311 : vector<2x128xf32>
    %313 = vector.extract_strided_slice %298 {offsets = [0, 384], sizes = [2, 128], strides = [1, 1]} : vector<2x512xf32> to vector<2x128xf32>
    %314 = arith.negf %313 : vector<2x128xf32>
    %315 = math.exp %314 : vector<2x128xf32>
    %cst_92 = arith.constant 1.000000e+00 : f32
    %316 = vector.broadcast %cst_92 : f32 to vector<2x128xf32>
    %317 = arith.addf %316, %315 : vector<2x128xf32>
    %318 = arith.divf %316, %317 : vector<2x128xf32>
    %319 = arith.mulf %310, %285 : vector<2x128xf32>
    %320 = arith.mulf %304, %312 : vector<2x128xf32>
    %321 = arith.addf %319, %320 : vector<2x128xf32>
    %322 = math.tanh %321 : vector<2x128xf32>
    %323 = arith.mulf %318, %322 : vector<2x128xf32>
    %324 = vector.extract_strided_slice %323 {offsets = [0, 0], sizes = [2, 64], strides = [1, 1]} : vector<2x128xf32> to vector<2x64xf32>
    %c7_93 = arith.constant 7 : index
    %c0_94 = arith.constant 0 : index
    %c0_95 = arith.constant 0 : index
    %325 = vector.load %arg19[%c7_93, %c0_94, %c0_95] : memref<8x2x64xf32, #tpu.memory_space<vmem>>, vector<1x2x64xf32>
    %326 = vector.shape_cast %325 : vector<1x2x64xf32> to vector<2x64xf32>
    %327 = vector.shape_cast %324 : vector<2x64xf32> to vector<1x2x64xf32>
    tpu.vector_store %arg19[%c7_93, %c0_94, %c0_95], %327 {strides = array<i32>} : memref<8x2x64xf32, #tpu.memory_space<vmem>>, vector<1x2x64xf32>,
    %328 = vector.extract_strided_slice %323 {offsets = [0, 64], sizes = [2, 64], strides = [1, 1]} : vector<2x128xf32> to vector<2x64xf32>
    %c0_96 = arith.constant 0 : index
    %c0_97 = arith.constant 0 : index
    %c0_98 = arith.constant 0 : index
    %329 = vector.load %arg20[%c0_96, %c0_97, %c0_98] : memref<8x2x64xf32, #tpu.memory_space<vmem>>, vector<1x2x64xf32>
    %330 = vector.shape_cast %329 : vector<1x2x64xf32> to vector<2x64xf32>
    %331 = vector.shape_cast %328 : vector<2x64xf32> to vector<1x2x64xf32>
    tpu.vector_store %arg20[%c0_96, %c0_97, %c0_98], %331 {strides = array<i32>} : memref<8x2x64xf32, #tpu.memory_space<vmem>>, vector<1x2x64xf32>,
    %c0_99 = arith.constant 0 : index
    %c0_100 = arith.constant 0 : index
    %c0_101 = arith.constant 0 : index
    %332 = vector.load %arg19[%c0_99, %c0_100, %c0_101] : memref<8x2x64xf32, #tpu.memory_space<vmem>>, vector<8x2x64xf32>
    %c0_102 = arith.constant 0 : index
    %c0_103 = arith.constant 0 : index
    %c0_104 = arith.constant 0 : index
    %333 = vector.load %arg20[%c0_102, %c0_103, %c0_104] : memref<8x2x64xf32, #tpu.memory_space<vmem>>, vector<8x2x64xf32>
    %334 = vector.extract_strided_slice %332 {offsets = [0, 0, 0], sizes = [8, 2, 32], strides = [1, 1, 1]} : vector<8x2x64xf32> to vector<8x2x32xf32>
    %335 = vector.extract_strided_slice %333 {offsets = [0, 0, 0], sizes = [8, 2, 32], strides = [1, 1, 1]} : vector<8x2x64xf32> to vector<8x2x32xf32>
    %336 = tpu.concatenate %334, %335 in 2 : vector<8x2x32xf32>, vector<8x2x32xf32> -> vector<8x2x64xf32>
    %337 = vector.extract_strided_slice %332 {offsets = [0, 0, 32], sizes = [8, 2, 32], strides = [1, 1, 1]} : vector<8x2x64xf32> to vector<8x2x32xf32>
    %338 = vector.extract_strided_slice %333 {offsets = [0, 0, 32], sizes = [8, 2, 32], strides = [1, 1, 1]} : vector<8x2x64xf32> to vector<8x2x32xf32>
    %339 = tpu.concatenate %337, %338 in 2 : vector<8x2x32xf32>, vector<8x2x32xf32> -> vector<8x2x64xf32>
    %c0_105 = arith.constant 0 : index
    %c0_106 = arith.constant 0 : index
    %340 = vector.load %arg4[%c0_105, %c0_106] : memref<64x16xf32, #tpu.memory_space<vmem>>, vector<64x16xf32>
    %c0_107 = arith.constant 0 : index
    %c0_108 = arith.constant 0 : index
    %341 = vector.load %arg5[%c0_107, %c0_108] : memref<1x16xf32, #tpu.memory_space<vmem>>, vector<1x16xf32>
    %c0_109 = arith.constant 0 : index
    %c0_110 = arith.constant 0 : index
    %342 = vector.load %arg6[%c0_109, %c0_110] : memref<16x8xf32, #tpu.memory_space<vmem>>, vector<16x8xf32>
    %343 = vector.shape_cast %336 : vector<8x2x64xf32> to vector<16x64xf32>
    %cst_111 = arith.constant dense<0.000000e+00> : vector<16x16xf32>
    %344 = tpu.matmul %343, %340, %cst_111 {dimension_numbers = #tpu.dot_dimension_numbers<[1], [0], [0], [1], [0, 0, 1, 1], [], []>} : vector<16x64xf32>, vector<64x16xf32>, vector<16x16xf32> -> vector<16x16xf32>
    %345 = vector.broadcast %341 : vector<1x16xf32> to vector<16x16xf32>
    %346 = arith.addf %344, %345 : vector<16x16xf32>
    %347 = math.tanh %346 : vector<16x16xf32>
    %cst_112 = arith.constant dense<0.000000e+00> : vector<16x8xf32>
    %348 = tpu.matmul %347, %342, %cst_112 {dimension_numbers = #tpu.dot_dimension_numbers<[1], [0], [0], [1], [0, 0, 1, 1], [], []>} : vector<16x16xf32>, vector<16x8xf32>, vector<16x8xf32> -> vector<16x8xf32>
    %349 = vector.shape_cast %348 : vector<16x8xf32> to vector<8x2x8xf32>
    %350 = tpu.transpose %349, [1, 0, 2] : vector<8x2x8xf32> -> vector<2x8x8xf32>
    %cst_113 = arith.constant dense<0xFF800000> : vector<2x8xf32>
    %351 = vector.multi_reduction <maximumf>, %350, %cst_113 [2] : vector<2x8x8xf32> to vector<2x8xf32>
    %cst_114 = arith.constant 0xFF800000 : f32
    %352 = vector.broadcast %cst_114 : f32 to vector<2x8xf32>
    %353 = arith.maximumf %352, %351 : vector<2x8xf32>
    %354 = vector.shape_cast %353 : vector<2x8xf32> to vector<2x8x1xf32>
    %355 = vector.broadcast %354 : vector<2x8x1xf32> to vector<2x8x8xf32>
    %356 = arith.subf %350, %355 : vector<2x8x8xf32>
    %357 = math.exp %356 : vector<2x8x8xf32>
    %cst_115 = arith.constant dense<0.000000e+00> : vector<2x8xf32>
    %358 = vector.multi_reduction <add>, %357, %cst_115 [2] : vector<2x8x8xf32> to vector<2x8xf32>
    %359 = vector.shape_cast %358 : vector<2x8xf32> to vector<2x8x1xf32>
    %360 = vector.broadcast %359 : vector<2x8x1xf32> to vector<2x8x8xf32>
    %361 = arith.divf %357, %360 : vector<2x8x8xf32>
    %362 = tpu.transpose %361, [0, 2, 1] : vector<2x8x8xf32> -> vector<2x8x8xf32>
    %363 = tpu.transpose %336, [1, 0, 2] : vector<8x2x64xf32> -> vector<2x8x64xf32>
    "tpu.trace_start"() <{level = 10 : i32, message = "brt,btd->brd"}> : () -> ()
    %cst_116 = arith.constant dense<0.000000e+00> : vector<2x8x64xf32>
    %364 = tpu.matmul %362, %363, %cst_116 {dimension_numbers = #tpu.dot_dimension_numbers<[2], [1], [1], [2], [0, 0, 0, 1, 1, 2], [0], [0]>} : vector<2x8x8xf32>, vector<2x8x64xf32>, vector<2x8x64xf32> -> vector<2x8x64xf32>
    "tpu.trace_stop"() : () -> ()
    %c0_117 = arith.constant 0 : index
    %c0_118 = arith.constant 0 : index
    %365 = vector.load %arg7[%c0_117, %c0_118] : memref<64x16xf32, #tpu.memory_space<vmem>>, vector<64x16xf32>
    %c0_119 = arith.constant 0 : index
    %c0_120 = arith.constant 0 : index
    %366 = vector.load %arg8[%c0_119, %c0_120] : memref<1x16xf32, #tpu.memory_space<vmem>>, vector<1x16xf32>
    %c0_121 = arith.constant 0 : index
    %c0_122 = arith.constant 0 : index
    %367 = vector.load %arg9[%c0_121, %c0_122] : memref<16x8xf32, #tpu.memory_space<vmem>>, vector<16x8xf32>
    %368 = vector.shape_cast %339 : vector<8x2x64xf32> to vector<16x64xf32>
    %cst_123 = arith.constant dense<0.000000e+00> : vector<16x16xf32>
    %369 = tpu.matmul %368, %365, %cst_123 {dimension_numbers = #tpu.dot_dimension_numbers<[1], [0], [0], [1], [0, 0, 1, 1], [], []>} : vector<16x64xf32>, vector<64x16xf32>, vector<16x16xf32> -> vector<16x16xf32>
    %370 = vector.broadcast %366 : vector<1x16xf32> to vector<16x16xf32>
    %371 = arith.addf %369, %370 : vector<16x16xf32>
    %372 = math.tanh %371 : vector<16x16xf32>
    %cst_124 = arith.constant dense<0.000000e+00> : vector<16x8xf32>
    %373 = tpu.matmul %372, %367, %cst_124 {dimension_numbers = #tpu.dot_dimension_numbers<[1], [0], [0], [1], [0, 0, 1, 1], [], []>} : vector<16x16xf32>, vector<16x8xf32>, vector<16x8xf32> -> vector<16x8xf32>
    %374 = vector.shape_cast %373 : vector<16x8xf32> to vector<8x2x8xf32>
    %375 = tpu.transpose %374, [1, 0, 2] : vector<8x2x8xf32> -> vector<2x8x8xf32>
    %cst_125 = arith.constant dense<0xFF800000> : vector<2x8xf32>
    %376 = vector.multi_reduction <maximumf>, %375, %cst_125 [2] : vector<2x8x8xf32> to vector<2x8xf32>
    %cst_126 = arith.constant 0xFF800000 : f32
    %377 = vector.broadcast %cst_126 : f32 to vector<2x8xf32>
    %378 = arith.maximumf %377, %376 : vector<2x8xf32>
    %379 = vector.shape_cast %378 : vector<2x8xf32> to vector<2x8x1xf32>
    %380 = vector.broadcast %379 : vector<2x8x1xf32> to vector<2x8x8xf32>
    %381 = arith.subf %375, %380 : vector<2x8x8xf32>
    %382 = math.exp %381 : vector<2x8x8xf32>
    %cst_127 = arith.constant dense<0.000000e+00> : vector<2x8xf32>
    %383 = vector.multi_reduction <add>, %382, %cst_127 [2] : vector<2x8x8xf32> to vector<2x8xf32>
    %384 = vector.shape_cast %383 : vector<2x8xf32> to vector<2x8x1xf32>
    %385 = vector.broadcast %384 : vector<2x8x1xf32> to vector<2x8x8xf32>
    %386 = arith.divf %382, %385 : vector<2x8x8xf32>
    %387 = tpu.transpose %386, [0, 2, 1] : vector<2x8x8xf32> -> vector<2x8x8xf32>
    %388 = tpu.transpose %339, [1, 0, 2] : vector<8x2x64xf32> -> vector<2x8x64xf32>
    "tpu.trace_start"() <{level = 10 : i32, message = "brt,btd->brd"}> : () -> ()
    %cst_128 = arith.constant dense<0.000000e+00> : vector<2x8x64xf32>
    %389 = tpu.matmul %387, %388, %cst_128 {dimension_numbers = #tpu.dot_dimension_numbers<[2], [1], [1], [2], [0, 0, 0, 1, 1, 2], [0], [0]>} : vector<2x8x8xf32>, vector<2x8x64xf32>, vector<2x8x64xf32> -> vector<2x8x64xf32>
    "tpu.trace_stop"() : () -> ()
    %390 = vector.shape_cast %389 : vector<2x8x64xf32> to vector<16x64xf32>
    %c0_129 = arith.constant 0 : index
    %c0_130 = arith.constant 0 : index
    %391 = vector.load %arg10[%c0_129, %c0_130] : memref<64x64xf32, #tpu.memory_space<vmem>>, vector<64x64xf32>
    %cst_131 = arith.constant dense<0.000000e+00> : vector<16x64xf32>
    %392 = tpu.matmul %390, %391, %cst_131 {dimension_numbers = #tpu.dot_dimension_numbers<[1], [0], [0], [1], [0, 0, 1, 1], [], []>} : vector<16x64xf32>, vector<64x64xf32>, vector<16x64xf32> -> vector<16x64xf32>
    %c0_132 = arith.constant 0 : index
    %c0_133 = arith.constant 0 : index
    %393 = vector.load %arg11[%c0_132, %c0_133] : memref<1x64xf32, #tpu.memory_space<vmem>>, vector<1x64xf32>
    %394 = vector.broadcast %393 : vector<1x64xf32> to vector<16x64xf32>
    %395 = arith.addf %392, %394 : vector<16x64xf32>
    %396 = vector.shape_cast %395 : vector<16x64xf32> to vector<2x8x64xf32>
    "tpu.trace_start"() <{level = 10 : i32, message = "bid,bjd->bij"}> : () -> ()
    %cst_134 = arith.constant dense<0.000000e+00> : vector<2x8x8xf32>
    %397 = tpu.matmul %364, %396, %cst_134 {dimension_numbers = #tpu.dot_dimension_numbers<[2], [2], [1], [1], [0, 0, 0, 1, 1, 1], [0], [0]>} : vector<2x8x64xf32>, vector<2x8x64xf32>, vector<2x8x8xf32> -> vector<2x8x8xf32>
    "tpu.trace_stop"() : () -> ()
    %398 = vector.shape_cast %397 : vector<2x8x8xf32> to vector<2x64xf32>
    %c0_135 = arith.constant 0 : index
    %c0_136 = arith.constant 0 : index
    %399 = vector.load %arg12[%c0_135, %c0_136] : memref<64x192xf32, #tpu.memory_space<vmem>>, vector<64x192xf32>
    %cst_137 = arith.constant dense<0.000000e+00> : vector<2x192xf32>
    %400 = tpu.matmul %398, %399, %cst_137 {dimension_numbers = #tpu.dot_dimension_numbers<[1], [0], [0], [1], [0, 0, 1, 1], [], []>} : vector<2x64xf32>, vector<64x192xf32>, vector<2x192xf32> -> vector<2x192xf32>
    %c0_138 = arith.constant 0 : index
    %c0_139 = arith.constant 0 : index
    %401 = vector.load %arg13[%c0_138, %c0_139] : memref<1x192xf32, #tpu.memory_space<vmem>>, vector<1x192xf32>
    %402 = vector.broadcast %401 : vector<1x192xf32> to vector<2x192xf32>
    %403 = arith.addf %400, %402 : vector<2x192xf32>
    %cst_140 = arith.constant 0.000000e+00 : f32
    %404 = vector.broadcast %cst_140 : f32 to vector<2x192xf32>
    %405 = arith.maximumf %403, %404 : vector<2x192xf32>
    %c0_141 = arith.constant 0 : index
    %c0_142 = arith.constant 0 : index
    %406 = vector.load %arg14[%c0_141, %c0_142] : memref<192x84xf32, #tpu.memory_space<vmem>>, vector<192x84xf32>
    %cst_143 = arith.constant dense<0.000000e+00> : vector<2x84xf32>
    %407 = tpu.matmul %405, %406, %cst_143 {dimension_numbers = #tpu.dot_dimension_numbers<[1], [0], [0], [1], [0, 0, 1, 1], [], []>} : vector<2x192xf32>, vector<192x84xf32>, vector<2x84xf32> -> vector<2x84xf32>
    %c0_144 = arith.constant 0 : index
    %c0_145 = arith.constant 0 : index
    %408 = vector.load %arg15[%c0_144, %c0_145] : memref<1x84xf32, #tpu.memory_space<vmem>>, vector<1x84xf32>
    %409 = vector.broadcast %408 : vector<1x84xf32> to vector<2x84xf32>
    %410 = arith.addf %407, %409 : vector<2x84xf32>
    %cst_146 = arith.constant 0.000000e+00 : f32
    %411 = vector.broadcast %cst_146 : f32 to vector<2x84xf32>
    %412 = arith.maximumf %410, %411 : vector<2x84xf32>
    %c0_147 = arith.constant 0 : index
    %c0_148 = arith.constant 0 : index
    %413 = vector.load %arg16[%c0_147, %c0_148] : memref<84x2xf32, #tpu.memory_space<vmem>>, vector<84x2xf32>
    %cst_149 = arith.constant dense<0.000000e+00> : vector<2x2xf32>
    %414 = tpu.matmul %412, %413, %cst_149 {dimension_numbers = #tpu.dot_dimension_numbers<[1], [0], [0], [1], [0, 0, 1, 1], [], []>} : vector<2x84xf32>, vector<84x2xf32>, vector<2x2xf32> -> vector<2x2xf32>
    %c0_150 = arith.constant 0 : index
    %c0_151 = arith.constant 0 : index
    %415 = vector.load %arg17[%c0_150, %c0_151] : memref<1x2xf32, #tpu.memory_space<vmem>>, vector<1x2xf32>
    %416 = vector.broadcast %415 : vector<1x2xf32> to vector<2x2xf32>
    %417 = arith.addf %414, %416 : vector<2x2xf32>
    %c0_152 = arith.constant 0 : index
    %c0_153 = arith.constant 0 : index
    %418 = vector.load %arg18[%c0_152, %c0_153] : memref<2x2xf32, #tpu.memory_space<vmem>>, vector<2x2xf32>
    tpu.vector_store %arg18[%c0_152, %c0_153], %417 {strides = array<i32>} : memref<2x2xf32, #tpu.memory_space<vmem>>, vector<2x2xf32>,
    return
  }
}

</mosaic_0001>

<bundles_post_ra>
// kernel: model_forward.1
= control target key start
LH: loop header
LB: loop body
LE: loop exit
PB: predicated region body
PF: predicated region fallthrough
CT: control target
= control target key end

     0   :  { %s8357_s0 = inlined_call_operand.vmem [shape: s32[64,1], index: 0, kind: input, shape index: {}]   ;;  %s8358_s1 = inlined_call_operand.vmem [shape: f32[4,50,512], index: 1, kind: input, shape index: {}]   ;;  %s8359_s2 = inlined_call_operand.vmem [shape: f32[128,512], index: 2, kind: input, shape index: {}]   ;;  %s8360_s3 = inlined_call_operand.vmem [shape: f32[1,512], index: 3, kind: input, shape index: {}]   ;;  %s8361_s4 = inlined_call_operand.vmem [shape: f32[64,16], index: 4, kind: input, shape index: {}]   ;;  %s8362_s5 = inlined_call_operand.vmem [shape: f32[1,16], index: 5, kind: input, shape index: {}]   ;;  %s8363_s6 = inlined_call_operand.vmem [shape: f32[16,8], index: 6, kind: input, shape index: {}]   ;;  %s8364_s7 = inlined_call_operand.vmem [shape: f32[64,16], index: 7, kind: input, shape index: {}]   ;;  %s8365_s8 = inlined_call_operand.vmem [shape: f32[1,16], index: 8, kind: input, shape index: {}]   ;;  %s8366_s9 = inlined_call_operand.vmem [shape: f32[16,8], index: 9, kind: input, shape index: {}]   ;;  %s8367_s10 = inlined_call_operand.vmem [shape: f32[64,64], index: 10, kind: input, shape index: {}]   ;;  %s8368_s11 = inlined_call_operand.vmem [shape: f32[1,64], index: 11, kind: input, shape index: {}]   ;;  %s8369_s12 = inlined_call_operand.vmem [shape: f32[64,192], index: 12, kind: input, shape index: {}]   ;;  %s8370_s13 = inlined_call_operand.vmem [shape: f32[1,192], index: 13, kind: input, shape index: {}]   ;;  %s8371_s14 = inlined_call_operand.vmem [shape: f32[192,84], index: 14, kind: input, shape index: {}]   ;;  %s8372_s15 = inlined_call_operand.vmem [shape: f32[1,84], index: 15, kind: input, shape index: {}]   ;;  %s8373_s16 = inlined_call_operand.vmem [shape: f32[84,2], index: 16, kind: input, shape index: {}]   ;;  %s8374_s17 = inlined_call_operand.vmem [shape: f32[1,2], index: 17, kind: input, shape index: {}]   ;;  %s8375_s18 = inlined_call_operand.hbm [shape: f32[2,2], index: 18, kind: output, shape index: {}]  }
   0x1   :  { %8379 = sst [smem:[#allocation7_spill]] %s8357_s0 }
   0x2   :  { %8380 = sst [smem:[#allocation8_spill]] %s8358_s1 }
   0x3   :  { %8381 = sst [smem:[#allocation9_spill]] %s8359_s2 }
   0x4   :  { %s8382_s29 = sld [smem:[#allocation7_spill]]  ;;  %v6458_v2 = vmov 0   ;;  %s8383_s23 = sld [smem:[#allocation8_spill]]  ;;  %v6459_v9 = vmov 0.0   ;;  %vm154_vm0 = vcmask 1041408  }
   0x5   :  { %6233 = vset.pattern.permute.xlu1 %v6458_v2  ;;  %6232 = vset.pattern.permute.xlu0 %v6458_v2 }
   0x6   :  { %231 = vmatprep.mubr.f32.mxu1 %v6459_v9  ;;  %403 = vmatprep.mubr.f32.mxu0 %v6459_v9 }
   0xa   :  { %v104_v0 = vld [vmem:[%s8382_s29 + $0x10] sm:$0xff]  ;;  %v62_v1 = vld [vmem:[%s8382_s29] sm:$0xff]  ;;  %v105_v3 = vld [vmem:[%s8382_s29 + $0x18] sm:$0xff] }
   0xb   :  { %107 = vperm.xlu0 %6232, %v104_v0   ;;  %65 = vperm.xlu1 %6233, %v62_v1   ;;  %v63_v4 = vld [vmem:[%s8382_s29 + $0x8] sm:$0xff]  ;;  %v5094_v12 = vld [vmem:[%s8383_s23 + $0xe0] sm:$0xff]  ;;  %v716_v42 = vld [vmem:[%s8382_s29 + $0x30] sm:$0xff] }
   0xc   :  { %v5095_v5 = vld [vmem:[%s8383_s23 + $0xe8] sm:$0xff]  ;;  %v5098_v13 = vld [vmem:[%s8383_s23 + $0x100] sm:$0xff]  ;;  %v717_v43 = vld [vmem:[%s8382_s29 + $0x38] sm:$0xff] }
   0xd   :  { %v5099_v6 = vld [vmem:[%s8383_s23 + $0x108] sm:$0xff]  ;;  %v76_v14 = vld [vmem:[%s8383_s23] sm:$0xff]  ;;  %v5459_v17 = vpack.c.bf16 %v5098_v13, %v5094_v12  ;;  %v5097_v48 = vld [vmem:[%s8383_s23 + $0xf8] sm:$0xff] }
   0xe   :  { %v77_v7 = vld [vmem:[%s8383_s23 + $0x8] sm:$0xff]  ;;  %v5457_v10 = vpack.c.bf16 %v5099_v6, %v5095_v5  ;;  %v493_v15 = vld [vmem:[%s8382_s29 + $0x20] sm:$0xff]  ;;  %v5101_v49 = vld [vmem:[%s8383_s23 + $0x118] sm:$0xff] }
   0xf   :  { %v81_v8 = vld [vmem:[%s8383_s23 + $0x28] sm:$0xff]  ;;  %v80_v18 = vld [vmem:[%s8383_s23 + $0x20] sm:$0xff]  ;;  %110 = vperm.xlu0 %6232, %v105_v3   ;;  %68 = vperm.xlu1 %6233, %v63_v4   ;;  %v5469_v54 = vpack.c.bf16 %v5101_v49, %v5097_v48 }
  0x10   :  { %v5481_v11 = vpack.c.bf16 %v81_v8, %v77_v7  ;;  %v494_v16 = vld [vmem:[%s8382_s29 + $0x28] sm:$0xff]  ;;  %v5483_v21 = vpack.c.bf16 %v80_v18, %v76_v14  ;;  %v5102_v25 = vld [vmem:[%s8383_s23 + $0x120] sm:$0xff]  ;;  %5458 = vmatprep.subr.bf16.mxu1 %v5457_v10 }
  0x11   :  { %v5103_v19 = vld [vmem:[%s8383_s23 + $0x128] sm:$0xff]  ;;  %v5106_v27 = vld [vmem:[%s8383_s23 + $0x140] sm:$0xff]  ;;  %5460 = vmatpush1.bf16.msra.mxu1 %v5459_v17 }
  0x12   :  { %v5107_v20 = vld [vmem:[%s8383_s23 + $0x148] sm:$0xff]  ;;  %5482 = vmatprep.subr.bf16.mxu0 %v5481_v11  ;;  %v84_v28 = vld [vmem:[%s8383_s23 + $0x40] sm:$0xff]  ;;  %v5463_v30 = vpack.c.bf16 %v5106_v27, %v5102_v25 }
  0x13   :  { %v5461_v22 = vpack.c.bf16 %v5107_v20, %v5103_v19  ;;  %v85_v23 = vld [vmem:[%s8383_s23 + $0x48] sm:$0xff]  ;;  %v88_v29 = vld [vmem:[%s8383_s23 + $0x60] sm:$0xff]  ;;  %5484 = vmatpush1.bf16.msra.mxu0 %v5483_v21  ;;  %496 = vperm.xlu0 %6232, %v493_v15  }
  0x14   :  { %v89_v24 = vld [vmem:[%s8383_s23 + $0x68] sm:$0xff]  ;;  %v5487_v31 = vpack.c.bf16 %v88_v29, %v84_v28  ;;  %v5110_v37 = vld [vmem:[%s8383_s23 + $0x160] sm:$0xff]  ;;  %499 = vperm.xlu1 %6233, %v494_v16  }
  0x15   :  { %v5485_v26 = vpack.c.bf16 %v89_v24, %v85_v23  ;;  %v5111_v32 = vld [vmem:[%s8383_s23 + $0x168] sm:$0xff]  ;;  %5462 = vmatprep.subr.bf16.mxu1 %v5461_v22  ;;  %v5114_v38 = vld [vmem:[%s8383_s23 + $0x180] sm:$0xff] }
  0x16   :  { %v5115_v33 = vld [vmem:[%s8383_s23 + $0x188] sm:$0xff]  ;;  %v92_v40 = vld [vmem:[%s8383_s23 + $0x80] sm:$0xff]  ;;  %5464 = vmatpush1.bf16.msra.mxu1 %v5463_v30  ;;  %v5467_v44 = vpack.c.bf16 %v5114_v38, %v5110_v37 }
  0x17   :  { %v93_v34 = vld [vmem:[%s8383_s23 + $0x88] sm:$0xff]  ;;  %5486 = vmatprep.subr.bf16.mxu0 %v5485_v26  ;;  %v5465_v35 = vpack.c.bf16 %v5115_v33, %v5111_v32  ;;  %v96_v41 = vld [vmem:[%s8383_s23 + $0xa0] sm:$0xff]  ;;  %719 = vperm.xlu0 %6232, %v716_v42  }
  0x18   :  { %v97_v36 = vld [vmem:[%s8383_s23 + $0xa8] sm:$0xff]  ;;  %5488 = vmatpush1.bf16.msra.mxu0 %v5487_v31  ;;  %v5491_v45 = vpack.c.bf16 %v96_v41, %v92_v40  ;;  %722 = vperm.xlu1 %6233, %v717_v43   ;;  %v5118_v52 = vld [vmem:[%s8383_s23 + $0x1a0] sm:$0x3] }
  0x19   :  { %v5489_v39 = vpack.c.bf16 %v97_v36, %v93_v34  ;;  %5466 = vmatprep.subr.bf16.mxu1 %v5465_v35  ;;  %v5119_v46 = vld [vmem:[%s8383_s23 + $0x1a8] sm:$0x3]  ;;  %v100_v53 = vld [vmem:[%s8383_s23 + $0xc0] sm:$0x3] }
  0x1a   :  { %v101_v47 = vld [vmem:[%s8383_s23 + $0xc8] sm:$0x3]  ;;  %5468 = vmatpush1.bf16.msra.mxu1 %v5467_v44 }
  0x1b   :  { %5490 = vmatprep.subr.bf16.mxu0 %v5489_v39  ;;  %v5141_v50 = vld [vmem:[%s8383_s23 + $0x1c8] sm:$0xff]  ;;  %5122 = vmatprep.subr.msk.mxu1 %vm154_vm0, %v5119_v46 }
  0x1c   :  { %v5145_v51 = vld [vmem:[%s8383_s23 + $0x1e8] sm:$0xff]  ;;  %5492 = vmatpush1.bf16.msra.mxu0 %v5491_v45 }
  0x1d   :  { %5130 = vmatprep.subr.msk.mxu0 %vm154_vm0, %v101_v47  ;;  %v5505_v55 = vpack.c.bf16 %v5145_v51, %v5141_v50 }
  0x1e   :  { %5123 = vmatpush1.msk.msra.mxu1 %vm154_vm0, %v5118_v52 }
  0x1f   :  { %5470 = vmatprep.subr.bf16.mxu1 %v5469_v54 }
  0x20   :  { %5131 = vmatpush1.msk.msra.mxu0 %vm154_vm0, %v100_v53 }
  0x21   :  { %5506 = vmatprep.subr.bf16.mxu0 %v5505_v55 }
  0x22   :  { %23 = vsyncpa [#allocation5], 0  ;;  %v60_v56 = vlaneseq  ;;  %v5096_v57 = vld [vmem:[%s8383_s23 + $0xf0] sm:$0xff]  ;;  %v5140_v60 = vld [vmem:[%s8383_s23 + $0x1c0] sm:$0xff]  ;;  %vm147_vm1 = vcmask 408576   ;;  %s8384_s22 = sld [smem:[#allocation9_spill]] }
  0x23   :  { %v5100_v59 = vld [vmem:[%s8383_s23 + $0x110] sm:$0xff]  ;;  %v5144_v61 = vld [vmem:[%s8383_s23 + $0x1e0] sm:$0xff]  ;;  %v5105_v62 = vld [vmem:[%s8383_s23 + $0x138] sm:$0xff]  ;;  %vm1203_vm10 = vcmask 517120   ;;  %vm1397_vm11 = vcmask 519170   ;;  %vm1593_vm12 = vcmask 521220  }
  0x24   :  { %v6703_v58 = vand.u32 127, %v60_v56  ;;  %v5109_v63 = vld [vmem:[%s8383_s23 + $0x158] sm:$0xff]  ;;  %v5149_v0 = vld [vmem:[%s8383_s23 + $0x208] sm:$0xff]  ;;  %v5471_v4 = vpack.c.bf16 %v5100_v59, %v5096_v57  ;;  %v5507_v5 = vpack.c.bf16 %v5144_v61, %v5140_v60  ;;  %v5104_v6 = vld [vmem:[%s8383_s23 + $0x130] sm:$0xff]  ;;  %vm1789_vm13 = vcmask 523270   ;;  %s6461_s1 = smov 32  }
  0x25   :  { %v5153_v1 = vld [vmem:[%s8383_s23 + $0x228] sm:$0xff]  ;;  %v5108_v7 = vld [vmem:[%s8383_s23 + $0x150] sm:$0xff]  ;;  %v5148_v8 = vld [vmem:[%s8383_s23 + $0x200] sm:$0xff]  ;;  %v5473_v10 = vpack.c.bf16 %v5109_v63, %v5105_v62  ;;  %vm2610_vm14 = vcmask 261120   ;;  %vm2718_vm15 = vcmask 523264   ;;  %s6470_s0 = smov 16  }
  0x26   :  { %v5152_v11 = vld [vmem:[%s8383_s23 + $0x220] sm:$0xff]  ;;  %v5113_v12 = vld [vmem:[%s8383_s23 + $0x178] sm:$0xff]  ;;  %v5509_v16 = vpack.c.bf16 %v5153_v1, %v5149_v0  ;;  %v5157_v17 = vld [vmem:[%s8383_s23 + $0x248] sm:$0xff]  ;;  %v5475_v21 = vpack.c.bf16 %v5108_v7, %v5104_v6  ;;  %s6473_s24 = smov 24  }
  0x27   :  { %v5117_v13 = vld [vmem:[%s8383_s23 + $0x198] sm:$0xff]  ;;  %v5161_v18 = vld [vmem:[%s8383_s23 + $0x268] sm:$0xff]  ;;  %v5511_v22 = vpack.c.bf16 %v5152_v11, %v5148_v8  ;;  %v5112_v24 = vld [vmem:[%s8383_s23 + $0x170] sm:$0xff] }
  0x28   :  { %v5477_v23 = vpack.c.bf16 %v5117_v13, %v5113_v12  ;;  %v5513_v25 = vpack.c.bf16 %v5161_v18, %v5157_v17  ;;  %v5116_v26 = vld [vmem:[%s8383_s23 + $0x190] sm:$0xff]  ;;  %v5156_v27 = vld [vmem:[%s8383_s23 + $0x240] sm:$0xff]  ;;  %v5121_v33 = vld [vmem:[%s8383_s23 + $0x1b8] sm:$0x3] }
  0x29   :  { %v5160_v28 = vld [vmem:[%s8383_s23 + $0x260] sm:$0xff]  ;;  %v5479_v31 = vpack.c.bf16 %v5116_v26, %v5112_v24  ;;  %v5165_v34 = vld [vmem:[%s8383_s23 + $0x288] sm:$0x3]  ;;  %v79_v35 = vld [vmem:[%s8383_s23 + $0x18] sm:$0xff] }
  0x2a   :  { %v5515_v32 = vpack.c.bf16 %v5160_v28, %v5156_v27  ;;  %v83_v36 = vld [vmem:[%s8383_s23 + $0x38] sm:$0xff]  ;;  %v5179_v38 = vld [vmem:[%s8383_s23 + $0x2a8] sm:$0xff]  ;;  %v78_v40 = vld [vmem:[%s8383_s23 + $0x10] sm:$0xff] }
  0x2b   :  { %v5183_v39 = vld [vmem:[%s8383_s23 + $0x2c8] sm:$0xff]  ;;  %v82_v41 = vld [vmem:[%s8383_s23 + $0x30] sm:$0xff]  ;;  %v5178_v42 = vld [vmem:[%s8383_s23 + $0x2a0] sm:$0xff]  ;;  %v5493_v46 = vpack.c.bf16 %v83_v36, %v79_v35 }
  0x2c   :  { %v5182_v43 = vld [vmem:[%s8383_s23 + $0x2c0] sm:$0xff]  ;;  %v5120_v44 = vld [vmem:[%s8383_s23 + $0x1b0] sm:$0x3]  ;;  %v5529_v47 = vpack.c.bf16 %v5183_v39, %v5179_v38  ;;  %v87_v48 = vld [vmem:[%s8383_s23 + $0x58] sm:$0xff]  ;;  %v5495_v51 = vpack.c.bf16 %v82_v41, %v78_v40 }
  0x2d   :  { %v5164_v45 = vld [vmem:[%s8383_s23 + $0x280] sm:$0x3]  ;;  %v91_v49 = vld [vmem:[%s8383_s23 + $0x78] sm:$0xff]  ;;  %v5187_v50 = vld [vmem:[%s8383_s23 + $0x2e8] sm:$0xff]  ;;  %v5531_v52 = vpack.c.bf16 %v5182_v43, %v5178_v42 }
  0x2e   :  { %v5191_v53 = vld [vmem:[%s8383_s23 + $0x308] sm:$0xff]  ;;  %v86_v54 = vld [vmem:[%s8383_s23 + $0x50] sm:$0xff]  ;;  %v5186_v57 = vld [vmem:[%s8383_s23 + $0x2e0] sm:$0xff]  ;;  %v5497_v63 = vpack.c.bf16 %v91_v49, %v87_v48 }
  0x2f   :  { %v90_v55 = vld [vmem:[%s8383_s23 + $0x70] sm:$0xff]  ;;  %v5190_v59 = vld [vmem:[%s8383_s23 + $0x300] sm:$0xff]  ;;  %v95_v60 = vld [vmem:[%s8383_s23 + $0x98] sm:$0xff] }
  0x30   :  { %v99_v0 = vld [vmem:[%s8383_s23 + $0xb8] sm:$0xff]  ;;  %v5195_v1 = vld [vmem:[%s8383_s23 + $0x328] sm:$0xff]  ;;  %v94_v6 = vld [vmem:[%s8383_s23 + $0x90] sm:$0xff] }
  0x31   :  { %v5501_v7 = vpack.c.bf16 %v99_v0, %v95_v60  ;;  %v5194_v11 = vld [vmem:[%s8383_s23 + $0x320] sm:$0xff]  ;;  %v103_v17 = vld [vmem:[%s8383_s23 + $0xd8] sm:$0x3]  ;;  %v5203_v18 = vld [vmem:[%s8383_s23 + $0x368] sm:$0x3] }
  0x32   :  { %v5198_v12 = vld [vmem:[%s8383_s23 + $0x340] sm:$0xff]  ;;  %v5142_v24 = vld [vmem:[%s8383_s23 + $0x1d0] sm:$0xff]  ;;  %v978_v35 = vld [vmem:[%s8384_s22 + $0x48] sm:$0xff] }
  0x33   :  { %v969_v26 = vld [vmem:[%s8384_s22] sm:$0xff]  ;;  %v102_v28 = vld [vmem:[%s8383_s23 + $0xd0] sm:$0x3]  ;;  %v982_v39 = vld [vmem:[%s8384_s22 + $0x68] sm:$0xff] }
  0x34   :  { %v973_v27 = vld [vmem:[%s8384_s22 + $0x20] sm:$0xff]  ;;  %v5150_v40 = vld [vmem:[%s8383_s23 + $0x210] sm:$0xff]  ;;  %v986_v48 = vld [vmem:[%s8384_s22 + $0x88] sm:$0xff] }
  0x35   :  { %v6950_v38 = vpack.c.bf16 %v973_v27, %v969_v26  ;;  %v5154_v41 = vld [vmem:[%s8383_s23 + $0x230] sm:$0xff]  ;;  %v977_v42 = vld [vmem:[%s8384_s22 + $0x40] sm:$0xff]  ;;  %v990_v49 = vld [vmem:[%s8384_s22 + $0xa8] sm:$0xff] }
  0x36   :  { %v981_v43 = vld [vmem:[%s8384_s22 + $0x60] sm:$0xff]  ;;  %v5192_v26 = vld [vmem:[%s8383_s23 + $0x310] sm:$0xff] }
  0x8a   :  { %v108_v2 = vpop.permute.xlu0 %107  ;;  %v66_v3 = vpop.permute.xlu1 %65 }
  0x8b   :  { %vm112_vm2 = vcmp.eq.s32.totalorder %v108_v2, %v6703_v58  ;;  %vm70_vm3 = vcmp.eq.s32.totalorder %v66_v3, %v6703_v58  ;;  %v5199_v2 = vld [vmem:[%s8383_s23 + $0x348] sm:$0xff]  ;;  %v5533_v3 = vpack.c.bf16 %v5191_v53, %v5187_v50  ;;  %v5523_v50 = vpack.c.bf16 %v5154_v41, %v5150_v40  ;;  %v5200_v40 = vld [vmem:[%s8383_s23 + $0x350] sm:$0xff] }
  0x8c   :  { %v6747_v14 = vsel %vm112_vm2, 1.0, %v6459_v9  ;;  %v6750_v15 = vsel %vm70_vm3, 1.0, %v6459_v9  ;;  %v5537_v8 = vpack.c.bf16 %v5199_v2, %v5195_v1  ;;  %v993_v2 = vld [vmem:[%s8384_s22 + $0xc0] sm:$0xff]  ;;  %vm6469_vm2 = vmmov 0  }
  0x8d   :  { %5124 = vmatmul.mubr.msk.f32.vlgmr.msra.gmra.mrb[0].mxu1 %vm147_vm1, %v6747_v14  ;;  %5132 = vmatmul.mubr.msk.f32.vlgmr.msra.gmra.mrb[0].mxu0 %vm147_vm1, %v6750_v15  ;;  %vm4760_vm3 = vcmask 195584  }
  0x8e   :  { %5472 = vmatpush1.bf16.msra.mxu1 %v5471_v4  ;;  %5508 = vmatpush1.bf16.msra.mxu0 %v5507_v5  ;;  %v111_v19 = vpop.permute.xlu0 %110  ;;  %v69_v20 = vpop.permute.xlu1 %68  ;;  %v5499_v4 = vpack.c.bf16 %v90_v55, %v86_v54  ;;  %v5535_v5 = vpack.c.bf16 %v5190_v59, %v5186_v57  ;;  %v7002_v54 = vpack.c.bf16 %v990_v49, %v986_v48  ;;  %v5162_v55 = vld [vmem:[%s8383_s23 + $0x270] sm:$0xff]  ;;  %v985_v57 = vld [vmem:[%s8384_s22 + $0x80] sm:$0xff]  ;;  %v5205_v48 = vld [vmem:[%s8383_s23 + $0x378] sm:$0x3] }
  0x8f   :  { %vm113_vm4 = vcmp.eq.s32.totalorder %v111_v19, %v6703_v58  ;;  %vm71_vm5 = vcmp.eq.s32.totalorder %v69_v20, %v6703_v58  ;;  %237 = vmatprep.mubr.f32.mxu1 %v6459_v9  ;;  %5474 = vmatprep.subr.bf16.mxu1 %v5473_v10  ;;  %v98_v10 = vld [vmem:[%s8383_s23 + $0xb0] sm:$0xff]  ;;  %v5143_v19 = vld [vmem:[%s8383_s23 + $0x1d8] sm:$0xff]  ;;  %v989_v59 = vld [vmem:[%s8384_s22 + $0xa0] sm:$0xff] }
  0x90   :  { %v6778_v29 = vsel %vm113_vm4, 1.0, %v6459_v9  ;;  %v6781_v30 = vsel %vm71_vm5, 1.0, %v6459_v9  ;;  %5510 = vmatprep.subr.bf16.mxu0 %v5509_v16  ;;  %409 = vmatprep.mubr.f32.mxu0 %v6459_v9  ;;  %v5539_v16 = vpack.c.bf16 %v5198_v12, %v5194_v11  ;;  %v5147_v20 = vld [vmem:[%s8383_s23 + $0x1f8] sm:$0xff]  ;;  %v7030_v0 = vpack.c.bf16 %v989_v59, %v985_v57  ;;  %v1029_v57 = vld [vmem:[%s8384_s22 + $0x1e0] sm:$0xff]  ;;  %v971_v59 = vld [vmem:[%s8384_s22 + $0x10] sm:$0xff] }
  0x91   :  { %5125 = vmatmul.mubr.msk.f32.gmra.mrb[2].mxu1 %vm147_vm1, %v6778_v29  ;;  %5133 = vmatmul.mubr.msk.f32.gmra.mrb[2].mxu0 %vm147_vm1, %v6781_v30  ;;  %v5189_v12 = vld [vmem:[%s8383_s23 + $0x2f8] sm:$0xff]  ;;  %vm4763_vm4 = vcmask 326656   ;;  %vm4765_vm5 = vcmask 392192  }
  0x92   :  { %5476 = vmatpush1.bf16.msra.mxu1 %v5475_v21  ;;  %5512 = vmatpush1.bf16.msra.mxu0 %v5511_v22  ;;  %v497_v37 = vpop.permute.xlu0 %496  ;;  %v970_v22 = vld [vmem:[%s8384_s22 + $0x8] sm:$0xff] }
  0x93   :  { %5478 = vmatprep.subr.bf16.mxu1 %v5477_v23  ;;  %5514 = vmatprep.subr.bf16.mxu0 %v5513_v25  ;;  %vm501_vm6 = vcmp.eq.s32.totalorder %v497_v37, %v6703_v58  ;;  %v500_v62 = vpop.permute.xlu1 %499  ;;  %v974_v23 = vld [vmem:[%s8384_s22 + $0x28] sm:$0xff]  ;;  %v5146_v25 = vld [vmem:[%s8383_s23 + $0x1f0] sm:$0xff] }
  0x94   :  { %308 = vmatprep.mubr.f32.mxu1 %v6459_v9  ;;  %618 = vmatprep.mubr.f32.mxu0 %v6459_v9  ;;  %v6859_v61 = vsel %vm501_vm6, 1.0, %v6459_v9  ;;  %vm502_vm7 = vcmp.eq.s32.totalorder %v500_v62, %v6703_v58  ;;  %v5519_v37 = vpack.c.bf16 %v5146_v25, %v5142_v24  ;;  %v994_v62 = vld [vmem:[%s8384_s22 + $0xc8] sm:$0xff]  ;;  %v5188_v25 = vld [vmem:[%s8383_s23 + $0x2f0] sm:$0xff]  ;;  %vm4767_vm6 = vcmask 457728  }
  0x95   :  { %v6892_v13 = vsel %vm502_vm7, 1.0, %v6459_v9  ;;  %vm5000_vm7 = vcmask 1043456  }
  0x96   :  { %5480 = vmatpush1.bf16.msra.mxu1 %v5479_v31  ;;  %5516 = vmatpush1.bf16.msra.mxu0 %v5515_v32  ;;  %v720_v21 = vpop.permute.xlu0 %719  ;;  %v5517_v31 = vpack.c.bf16 %v5147_v20, %v5143_v19  ;;  %v6939_v32 = vpack.c.bf16 %v974_v23, %v970_v22  ;;  %v1005_v19 = vld [vmem:[%s8384_s22 + $0x120] sm:$0xff]  ;;  %v1010_v22 = vld [vmem:[%s8384_s22 + $0x148] sm:$0xff] }
  0x97   :  { %5126 = vmatprep.subr.msk.mxu1 %vm154_vm0, %v5121_v33  ;;  %5168 = vmatprep.subr.msk.mxu0 %vm154_vm0, %v5165_v34  ;;  %vm724_vm8 = vcmp.eq.s32.totalorder %v720_v21, %v6703_v58  ;;  %v5151_v33 = vld [vmem:[%s8383_s23 + $0x218] sm:$0xff]  ;;  %v723_v36 = vpop.permute.xlu1 %722  ;;  %v1014_v23 = vld [vmem:[%s8384_s22 + $0x168] sm:$0xff] }
  0x98   :  { %v5155_v34 = vld [vmem:[%s8383_s23 + $0x238] sm:$0xff]  ;;  %vm725_vm9 = vcmp.eq.s32.totalorder %v723_v36, %v6703_v58  ;;  %v1018_v36 = vld [vmem:[%s8384_s22 + $0x188] sm:$0xff] }
  0x99   :  { %v7016_v60 = vsel %vm725_vm9, 1.0, %v6459_v9  ;;  %vm5074_vm9 = vcmask 9216  }
  0x9a   :  { %5127 = vmatpush1.msk.msra.mxu1 %vm154_vm0, %v5120_v44  ;;  %5169 = vmatpush1.msk.msra.mxu0 %vm154_vm0, %v5164_v45  ;;  %v5159_v44 = vld [vmem:[%s8383_s23 + $0x258] sm:$0xff]  ;;  %v6975_v45 = vsel %vm724_vm8, 1.0, %v6459_v9  ;;  %vm4996_vm8 = vcmask 687104  }
  0x9b   :  { %5128 = vmatmul.mubr.msk.f32.vlgmr.msra.gmra.mrb[4].mxu1 %vm147_vm1, %v6747_v14  ;;  %5494 = vmatprep.subr.bf16.mxu1 %v5493_v46  ;;  %v5503_v14 = vpack.c.bf16 %v98_v10, %v94_v6  ;;  %v5521_v46 = vpack.c.bf16 %v5155_v34, %v5151_v33  ;;  %v5180_v6 = vld [vmem:[%s8383_s23 + $0x2b0] sm:$0xff]  ;;  %v1006_v10 = vld [vmem:[%s8384_s22 + $0x128] sm:$0xff]  ;;  %v1009_v33 = vld [vmem:[%s8384_s22 + $0x140] sm:$0xff] }
  0x9c   :  { %5170 = vmatmul.mubr.msk.f32.vlgmr.msra.gmra.mrb[0].mxu0 %vm147_vm1, %v6859_v61  ;;  %5530 = vmatprep.subr.bf16.mxu0 %v5529_v47  ;;  %v5163_v47 = vld [vmem:[%s8383_s23 + $0x278] sm:$0xff]  ;;  %v1013_v34 = vld [vmem:[%s8384_s22 + $0x160] sm:$0xff] }
  0x9d   :  { %5496 = vmatpush1.bf16.msra.mxu1 %v5495_v51  ;;  %5532 = vmatpush1.bf16.msra.mxu0 %v5531_v52  ;;  %v6995_v51 = vpack.c.bf16 %v981_v43, %v977_v42  ;;  %v5158_v52 = vld [vmem:[%s8383_s23 + $0x250] sm:$0xff]  ;;  %v5525_v53 = vpack.c.bf16 %v5163_v47, %v5159_v44  ;;  %v7133_v41 = vpack.c.bf16 %v1013_v34, %v1009_v33  ;;  %v1017_v43 = vld [vmem:[%s8384_s22 + $0x180] sm:$0xff]  ;;  %v1030_v47 = vld [vmem:[%s8384_s22 + $0x1e8] sm:$0xff] }
  0x9e   :  { %314 = vmatprep.mubr.f32.mxu1 %v6459_v9  ;;  %624 = vmatprep.mubr.f32.mxu0 %v6459_v9  ;;  %v5527_v58 = vpack.c.bf16 %v5162_v55, %v5158_v52  ;;  %v1021_v44 = vld [vmem:[%s8384_s22 + $0x1a0] sm:$0xff]  ;;  %v976_v52 = vld [vmem:[%s8384_s22 + $0x38] sm:$0xff] }
  0x9f   :  { %5129 = vmatmul.mubr.msk.f32.gmra.mrb[6].mxu1 %vm147_vm1, %v6778_v29  ;;  %5498 = vmatprep.subr.bf16.mxu1 %v5497_v63  ;;  %v5202_v29 = vld [vmem:[%s8383_s23 + $0x360] sm:$0x3]  ;;  %v998_v63 = vld [vmem:[%s8384_s22 + $0xe8] sm:$0xff]  ;;  %v7157_v49 = vpack.c.bf16 %v1021_v44, %v1017_v43  ;;  %v1012_v33 = vld [vmem:[%s8384_s22 + $0x158] sm:$0xff] }
  0xa0   :  { %5171 = vmatmul.mubr.msk.f32.gmra.mrb[2].mxu0 %vm147_vm1, %v6892_v13  ;;  %5534 = vmatprep.subr.bf16.mxu0 %v5533_v3  ;;  %v7036_v1 = vpack.c.bf16 %v998_v63, %v994_v62  ;;  %v997_v3 = vld [vmem:[%s8384_s22 + $0xe0] sm:$0xff]  ;;  %v975_v62 = vld [vmem:[%s8384_s22 + $0x30] sm:$0xff]  ;;  %v980_v63 = vld [vmem:[%s8384_s22 + $0x58] sm:$0xff] }
  0xa1   :  { %5500 = vmatpush1.bf16.msra.mxu1 %v5499_v4  ;;  %5536 = vmatpush1.bf16.msra.mxu0 %v5535_v5  ;;  %v5181_v4 = vld [vmem:[%s8383_s23 + $0x2b8] sm:$0xff]  ;;  %v7065_v11 = vpack.c.bf16 %v997_v3, %v993_v2 }
  0xa2   :  { %5502 = vmatprep.subr.bf16.mxu1 %v5501_v7  ;;  %5538 = vmatprep.subr.bf16.mxu0 %v5537_v8  ;;  %v5185_v5 = vld [vmem:[%s8383_s23 + $0x2d8] sm:$0xff]  ;;  %v5184_v7 = vld [vmem:[%s8383_s23 + $0x2d0] sm:$0xff]  ;;  %v1002_v8 = vld [vmem:[%s8384_s22 + $0x108] sm:$0xff] }
  0xa3   :  { %480 = vmatprep.mubr.f32.mxu1 %v6459_v9  ;;  %841 = vmatprep.mubr.f32.mxu0 %v6459_v9  ;;  %v5543_v20 = vpack.c.bf16 %v5184_v7, %v5180_v6  ;;  %v7084_v21 = vpack.c.bf16 %v1006_v10, %v1002_v8  ;;  %v979_v6 = vld [vmem:[%s8384_s22 + $0x50] sm:$0xff]  ;;  %v988_v8 = vld [vmem:[%s8384_s22 + $0x98] sm:$0xff] }
  0xa4   :  { %v983_v7 = vld [vmem:[%s8384_s22 + $0x70] sm:$0xff]  ;;  %v992_v10 = vld [vmem:[%s8384_s22 + $0xb8] sm:$0xff] }
  0xa5   :  { %5504 = vmatpush1.bf16.msra.mxu1 %v5503_v14  ;;  %5540 = vmatpush1.bf16.msra.mxu0 %v5539_v16  ;;  %v5193_v14 = vld [vmem:[%s8383_s23 + $0x318] sm:$0xff]  ;;  %v5166_v16 = vld [vmem:[%s8383_s23 + $0x290] sm:$0x3] }
  0xa6   :  { %5134 = vmatprep.subr.msk.mxu1 %vm154_vm0, %v103_v17  ;;  %5206 = vmatprep.subr.msk.mxu0 %vm154_vm0, %v5203_v18  ;;  %v5541_v17 = vpack.c.bf16 %v5185_v5, %v5181_v4  ;;  %v1001_v18 = vld [vmem:[%s8384_s22 + $0x100] sm:$0xff]  ;;  %v5545_v24 = vpack.c.bf16 %v5193_v14, %v5189_v12  ;;  %v7195_v4 = vpack.c.bf16 %v975_v62, %v971_v59  ;;  %v1016_v34 = vld [vmem:[%s8384_s22 + $0x178] sm:$0xff] }
  0xa7   :  { %v7100_v27 = vpack.c.bf16 %v1005_v19, %v1001_v18  ;;  %v7218_v12 = vpack.c.bf16 %v983_v7, %v979_v6  ;;  %v7222_v14 = vpack.c.bf16 %v992_v10, %v988_v8  ;;  %v1000_v18 = vld [vmem:[%s8384_s22 + $0xf8] sm:$0xff]  ;;  %v7367_v6 = vshrl.u32 %v60_v56, 7 }
  0xa9   :  { %5135 = vmatpush1.msk.msra.mxu1 %vm154_vm0, %v102_v28  ;;  %5207 = vmatpush1.msk.msra.mxu0 %vm154_vm0, %v5202_v29  ;;  %v5197_v28 = vld [vmem:[%s8383_s23 + $0x338] sm:$0xff]  ;;  %v943_v10 = vsub.s32 0, %v7367_v6 }
  0xaa   :  { %5136 = vmatmul.mubr.msk.f32.vlgmr.msra.gmra.mrb[4].mxu1 %vm147_vm1, %v6750_v15  ;;  %5518 = vmatprep.subr.bf16.mxu1 %v5517_v31  ;;  %v6992_v15 = vpack.c.bf16 %v982_v39, %v978_v35  ;;  %v5201_v29 = vld [vmem:[%s8383_s23 + $0x358] sm:$0xff]  ;;  %v7110_v31 = vpack.c.bf16 %v1014_v23, %v1010_v22  ;;  %v5547_v35 = vpack.c.bf16 %v5192_v26, %v5188_v25  ;;  %v5196_v39 = vld [vmem:[%s8383_s23 + $0x330] sm:$0xff] }
  0xab   :  { %5208 = vmatmul.mubr.msk.f32.vlgmr.msra.gmra.mrb[0].mxu0 %vm147_vm1, %v6975_v45  ;;  %5554 = vmatprep.subr.bf16.mxu0 %v6939_v32  ;;  %v995_v22 = vld [vmem:[%s8384_s22 + $0xd0] sm:$0xff]  ;;  %v1004_v23 = vld [vmem:[%s8384_s22 + $0x118] sm:$0xff] }
  0xac   :  { %5520 = vmatpush1.bf16.msra.mxu1 %v5519_v37  ;;  %5556 = vmatpush1.bf16.msra.mxu0 %v6950_v38  ;;  %v5549_v37 = vpack.c.bf16 %v5201_v29, %v5197_v28  ;;  %v1003_v28 = vld [vmem:[%s8384_s22 + $0x110] sm:$0xff] }
  0xad   :  { %486 = vmatprep.mubr.f32.mxu1 %v6459_v9  ;;  %847 = vmatprep.mubr.f32.mxu0 %v6459_v9  ;;  %v1007_v29 = vld [vmem:[%s8384_s22 + $0x130] sm:$0xff] }
  0xae   :  { %5137 = vmatmul.mubr.msk.f32.gmra.mrb[6].mxu1 %vm147_vm1, %v6781_v30  ;;  %5522 = vmatprep.subr.bf16.mxu1 %v5521_v46  ;;  %v5167_v30 = vld [vmem:[%s8383_s23 + $0x298] sm:$0x3]  ;;  %v5551_v46 = vpack.c.bf16 %v5200_v40, %v5196_v39 }
  0xaf   :  { %5209 = vmatmul.mubr.msk.f32.gmra.mrb[2].mxu0 %vm147_vm1, %v7016_v60  ;;  %5558 = vmatprep.subr.bf16.mxu0 %v6992_v15  ;;  %v1020_v39 = vld [vmem:[%s8384_s22 + $0x198] sm:$0xff] }
  0xb0   :  { %5524 = vmatpush1.bf16.msra.mxu1 %v5523_v50  ;;  %5560 = vmatpush1.bf16.msra.mxu0 %v6995_v51  ;;  %v972_v50 = vld [vmem:[%s8384_s22 + $0x18] sm:$0xff] }
  0xb1   :  { %5526 = vmatprep.subr.bf16.mxu1 %v5525_v53  ;;  %5562 = vmatprep.subr.bf16.mxu0 %v7002_v54  ;;  %v1025_v53 = vld [vmem:[%s8384_s22 + $0x1c0] sm:$0xff]  ;;  %v7190_v2 = vpack.c.bf16 %v976_v52, %v972_v50  ;;  %v1024_v40 = vld [vmem:[%s8384_s22 + $0x1b8] sm:$0xff] }
  0xb2   :  { %695 = vmatprep.mubr.f32.mxu1 %v6459_v9  ;;  %1097 = vmatprep.mubr.f32.mxu0 %v6459_v9  ;;  %v7193_v3 = vpack.c.bf16 %v1029_v57, %v1025_v53  ;;  %v7306_v44 = vpack.c.bf16 %v1024_v40, %v1020_v39  ;;  %v1027_v53 = vld [vmem:[%s8384_s22 + $0x1d0] sm:$0xff] }
  0xb3   :  { %v1031_v57 = vld [vmem:[%s8384_s22 + $0x1f0] sm:$0xff] }
  0xb4   :  { %5528 = vmatpush1.bf16.msra.mxu1 %v5527_v58  ;;  %5564 = vmatpush1.bf16.msra.mxu0 %v7030_v0  ;;  %v984_v58 = vld [vmem:[%s8384_s22 + $0x78] sm:$0xff]  ;;  %v7337_v59 = vpack.c.bf16 %v1031_v57, %v1027_v53 }
  0xb5   :  { %5172 = vmatprep.subr.msk.mxu1 %vm154_vm0, %v5167_v30  ;;  %5566 = vmatprep.subr.bf16.mxu0 %v7036_v1  ;;  %v5204_v30 = vld [vmem:[%s8383_s23 + $0x370] sm:$0x3]  ;;  %v7198_v5 = vpack.c.bf16 %v984_v58, %v980_v63 }
  0xb8   :  { %5173 = vmatpush1.msk.msra.mxu1 %vm154_vm0, %v5166_v16  ;;  %5568 = vmatpush1.bf16.msra.mxu0 %v7065_v11  ;;  %v987_v16 = vld [vmem:[%s8384_s22 + $0x90] sm:$0xff] }
  0xb9   :  { %5174 = vmatmul.mubr.msk.f32.vlgmr.msra.gmra.mrb[4].mxu1 %vm147_vm1, %v6859_v61  ;;  %5542 = vmatprep.subr.bf16.mxu1 %v5541_v17  ;;  %v1022_v61 = vld [vmem:[%s8384_s22 + $0x1a8] sm:$0xff]  ;;  %v996_v17 = vld [vmem:[%s8384_s22 + $0xd8] sm:$0xff] }
  0xba   :  { %5544 = vmatpush1.bf16.msra.mxu1 %v5543_v20  ;;  %5570 = vmatprep.subr.bf16.mxu0 %v7084_v21  ;;  %v7138_v42 = vpack.c.bf16 %v1022_v61, %v1018_v36  ;;  %v7245_v20 = vpack.c.bf16 %v1000_v18, %v996_v17  ;;  %v7286_v36 = vpack.c.bf16 %v1016_v34, %v1012_v33  ;;  %v1011_v61 = vld [vmem:[%s8384_s22 + $0x150] sm:$0xff]  ;;  %v947_v18 = vsub.s32 1, %v7367_v6 }
  0xbb   :  { %701 = vmatprep.mubr.f32.mxu1 %v6459_v9  ;;  %5546 = vmatprep.subr.bf16.mxu1 %v5545_v24  ;;  %v1008_v24 = vld [vmem:[%s8384_s22 + $0x138] sm:$0xff]  ;;  %v951_v34 = vsub.s32 2, %v7367_v6 }
  0xbc   :  { %5572 = vmatpush1.bf16.msra.mxu0 %v7100_v27  ;;  %v7266_v26 = vpack.c.bf16 %v1008_v24, %v1004_v23 }
  0xbd   :  { %5175 = vmatmul.mubr.msk.f32.gmra.mrb[6].mxu1 %vm147_vm1, %v6892_v13  ;;  %5574 = vmatprep.subr.bf16.mxu0 %v7110_v31  ;;  %v1026_v13 = vld [vmem:[%s8384_s22 + $0x1c8] sm:$0xff] }
  0xbe   :  { %5548 = vmatpush1.bf16.msra.mxu1 %v5547_v35  ;;  %918 = vmatprep.mubr.f32.mxu1 %v6459_v9  ;;  %v7169_v55 = vpack.c.bf16 %v1030_v47, %v1026_v13  ;;  %v7283_v35 = vpack.c.bf16 %v1007_v29, %v1003_v28  ;;  %v1023_v13 = vld [vmem:[%s8384_s22 + $0x1b0] sm:$0xff]  ;;  %v1028_v47 = vld [vmem:[%s8384_s22 + $0x1d8] sm:$0xff] }
  0xbf   :  { %5550 = vmatprep.subr.bf16.mxu1 %v5549_v37  ;;  %v1015_v37 = vld [vmem:[%s8384_s22 + $0x170] sm:$0xff] }
  0xc0   :  { %5576 = vmatpush1.bf16.msra.mxu0 %v7133_v41  ;;  %v7303_v43 = vpack.c.bf16 %v1015_v37, %v1011_v61  ;;  %v955_v37 = vsub.s32 3, %v7367_v6 }
  0xc1   :  { %5578 = vmatprep.subr.bf16.mxu0 %v7138_v42 }
  0xc2   :  { %5552 = vmatpush1.bf16.msra.mxu1 %v5551_v46  ;;  %v1019_v46 = vld [vmem:[%s8384_s22 + $0x190] sm:$0xff] }
  0xc3   :  { %5210 = vmatprep.subr.msk.mxu1 %vm154_vm0, %v5205_v48  ;;  %v1032_v48 = vld [vmem:[%s8384_s22 + $0x1f8] sm:$0xff]  ;;  %v7323_v50 = vpack.c.bf16 %v1023_v13, %v1019_v46 }
  0xc4   :  { %5580 = vmatpush1.bf16.msra.mxu0 %v7157_v49  ;;  %v7326_v52 = vpack.c.bf16 %v1032_v48, %v1028_v47 }
  0xc5   :  { %5582 = vmatprep.subr.bf16.mxu0 %v7169_v55 }
  0xc6   :  { %5211 = vmatpush1.msk.msra.mxu1 %vm154_vm0, %v5204_v30  ;;  %vm2800_vm0 = vcmask 130048  }
  0xc7   :  { %5212 = vmatmul.mubr.msk.f32.vlgmr.msra.gmra.mrb[4].mxu1 %vm147_vm1, %v6975_v45  ;;  %5586 = vmatprep.subr.bf16.mxu1 %v7190_v2  ;;  %v991_v45 = vld [vmem:[%s8384_s22 + $0xb0] sm:$0xff] }
  0xc8   :  { %5584 = vmatpush1.bf16.msra.mxu0 %v7193_v3  ;;  %5588 = vmatpush1.bf16.msra.mxu1 %v7195_v4  ;;  %v7241_v19 = vpack.c.bf16 %v991_v45, %v987_v16  ;;  %v939_v45 = vld [vmem:[%s8360_s3] sm:$0xf]  ;;  %s6460_s3 = smov 64  }
  0xc9   :  { %924 = vmatprep.mubr.f32.mxu1 %v6459_v9  ;;  %5590 = vmatprep.subr.bf16.mxu1 %v7198_v5  ;;  %v948_v56 = vrot.slane %v939_v45, %v947_v18  ;;  %v952_v40 = vrot.slane %v939_v45, %v951_v34  ;;  %v956_v46 = vrot.slane %v939_v45, %v955_v37 }
  0xca   :  { %5618 = vmatprep.subr.bf16.mxu0 %v6939_v32 }
  0xcb   :  { %5213 = vmatmul.mubr.msk.f32.gmra.mrb[6].mxu1 %vm147_vm1, %v7016_v60  ;;  %1098 = vmatmul.mubr.f32.vlgmr.msra.gmra.mrb[4].mxu0 %v6459_v9  ;;  %v999_v60 = vld [vmem:[%s8384_s22 + $0xf0] sm:$0xff]  ;;  %vm3006_vm1 = vcmask 64512  }
  0xcc   :  { %5592 = vmatpush1.bf16.msra.mxu1 %v7218_v12  ;;  %1168 = vmatprep.mubr.f32.mxu1 %v6459_v9  ;;  %v7263_v25 = vpack.c.bf16 %v999_v60, %v995_v22  ;;  %v944_v60 = vrot.slane %v939_v45, %v943_v10 }
  0xcd   :  { %5594 = vmatprep.subr.bf16.mxu1 %v7222_v14  ;;  %5620 = vmatpush1.bf16.msra.mxu0 %v6950_v38 }
  0xce   :  { %5622 = vmatprep.subr.bf16.mxu0 %v6992_v15  ;;  %1275 = vmatprep.mubr.f32.mxu0 %v6459_v9 }
  0xd0   :  { %5596 = vmatpush1.bf16.msra.mxu1 %v7241_v19 }
  0xd1   :  { %5598 = vmatprep.subr.bf16.mxu1 %v7245_v20  ;;  %5624 = vmatpush1.bf16.msra.mxu0 %v6995_v51 }
  0xd2   :  { %5626 = vmatprep.subr.bf16.mxu0 %v7002_v54 }
  0xd4   :  { %5600 = vmatpush1.bf16.msra.mxu1 %v7263_v25 }
  0xd5   :  { %5602 = vmatprep.subr.bf16.mxu1 %v7266_v26  ;;  %5628 = vmatpush1.bf16.msra.mxu0 %v7030_v0 }
  0xd6   :  { %5630 = vmatprep.subr.bf16.mxu0 %v7036_v1 }
  0xd8   :  { %5604 = vmatpush1.bf16.msra.mxu1 %v7283_v35 }
  0xd9   :  { %5606 = vmatprep.subr.bf16.mxu1 %v7286_v36  ;;  %5632 = vmatpush1.bf16.msra.mxu0 %v7065_v11 }
  0xda   :  { %5634 = vmatprep.subr.bf16.mxu0 %v7084_v21 }
  0xdc   :  { %5608 = vmatpush1.bf16.msra.mxu1 %v7303_v43 }
  0xdd   :  { %5610 = vmatprep.subr.bf16.mxu1 %v7306_v44  ;;  %5636 = vmatpush1.bf16.msra.mxu0 %v7100_v27 }
  0xde   :  { %5638 = vmatprep.subr.bf16.mxu0 %v7110_v31 }
  0xe0   :  { %5612 = vmatpush1.bf16.msra.mxu1 %v7323_v50 }
  0xe1   :  { %5614 = vmatprep.subr.bf16.mxu1 %v7326_v52  ;;  %5640 = vmatpush1.bf16.msra.mxu0 %v7133_v41 }
  0xe2   :  { %5642 = vmatprep.subr.bf16.mxu0 %v7138_v42 }
  0xe4   :  { %5616 = vmatpush1.bf16.msra.mxu1 %v7337_v59 }
  0xe5   :  { %5650 = vmatprep.subr.bf16.mxu1 %v7190_v2  ;;  %5644 = vmatpush1.bf16.msra.mxu0 %v7157_v49 }
  0xe6   :  { %5646 = vmatprep.subr.bf16.mxu0 %v7169_v55 }
  0xe7   :  { %1169 = vmatmul.mubr.f32.vlgmr.msra.gmra.mrb[8].mxu1 %v6459_v9 }
  0xe8   :  { %5652 = vmatpush1.bf16.msra.mxu1 %v7195_v4  ;;  %1346 = vmatprep.mubr.f32.mxu1 %v6459_v9 }
  0xe9   :  { %5654 = vmatprep.subr.bf16.mxu1 %v7198_v5  ;;  %5648 = vmatpush1.bf16.msra.mxu0 %v7193_v3 }
  0xea   :  { %5682 = vmatprep.subr.bf16.mxu0 %v6939_v32 }
  0xec   :  { %5656 = vmatpush1.bf16.msra.mxu1 %v7218_v12 }
  0xed   :  { %5658 = vmatprep.subr.bf16.mxu1 %v7222_v14 }
  0xf0   :  { %5660 = vmatpush1.bf16.msra.mxu1 %v7241_v19 }
  0xf1   :  { %5662 = vmatprep.subr.bf16.mxu1 %v7245_v20 }
  0xf4   :  { %5664 = vmatpush1.bf16.msra.mxu1 %v7263_v25 }
  0xf5   :  { %5666 = vmatprep.subr.bf16.mxu1 %v7266_v26 }
  0xf8   :  { %5668 = vmatpush1.bf16.msra.mxu1 %v7283_v35 }
  0xf9   :  { %5670 = vmatprep.subr.bf16.mxu1 %v7286_v36 }
  0xfc   :  { %5672 = vmatpush1.bf16.msra.mxu1 %v7303_v43 }
  0xfd   :  { %5674 = vmatprep.subr.bf16.mxu1 %v7306_v44 }
 0x100   :  { %5676 = vmatpush1.bf16.msra.mxu1 %v7323_v50 }
 0x101   :  { %5678 = vmatprep.subr.bf16.mxu1 %v7326_v52 }
 0x104   :  { %5680 = vmatpush1.bf16.msra.mxu1 %v7337_v59 }
 0x105   :  { %5714 = vmatprep.subr.bf16.mxu1 %v7190_v2 }
 0x160   :  { %v233_v62 = vpop.f32.mrb[0].mxu1 }
 0x161   :  { %v235_v63 = vpop.f32.mrb[1].mxu1 }
 0x164   :  { %v239_v58 = vpop.f32.mrb[2].mxu1 }
 0x165   :  { %v241_v30 = vpop.f32.mrb[3].mxu1 }
 0x17e   :  { %v843_v7 = vpop.f32.mrb[0].mxu0 }
 0x17f   :  { %v6188_v8 = vadd.f32 %v843_v7, %v233_v62  ;;  %v845_v16 = vpop.f32.mrb[1].mxu0 }
 0x180   :  { %v6189_v17 = vadd.f32 %v845_v16, %v235_v63 }
 0x182   :  { %v849_v22 = vpop.f32.mrb[2].mxu0  ;;  %v7386_v62 = vadd.f32 %v6189_v17, %v948_v56 }
 0x183   :  { %v6190_v23 = vadd.f32 %v849_v22, %v239_v58  ;;  %v851_v24 = vpop.f32.mrb[3].mxu0  ;;  %v7390_v58 = vadd.f32 %v6188_v8, %v944_v60 }
 0x184   :  { %v6191_v28 = vadd.f32 %v851_v24, %v241_v30 }
 0x185   :  { %v7378_v29 = vadd.f32 %v6190_v23, %v944_v60 }
 0x186   :  { %v7380_v33 = vadd.f32 %v6191_v28, %v948_v56 }
 0x19a   :  { %v920_v61 = vpop.f32.mrb[4].mxu1 }
 0x19b   :  { %v922_v39 = vpop.f32.mrb[5].mxu1  ;;  %v7394_v34 = vadd.f32 %v952_v40, %v920_v61 }
 0x19c   :  { %v7396_v17 = vadd.f32 %v956_v46, %v922_v39 }
 0x19e   :  { %v926_v13 = vpop.f32.mrb[6].mxu1  ;;  %v1099_v47 = vpop.f32.mrb[4].mxu0 }
 0x19f   :  { %v7384_v48 = vadd.f32 %v952_v40, %v926_v13  ;;  %v928_v53 = vpop.f32.mrb[7].mxu1  ;;  %v1101_v57 = vpop.f32.mrb[5].mxu0  ;;  %v1175_v7 = vadd.f32 %v1099_v47, %v7390_v58 }
 0x1a0   :  { %v7388_v63 = vadd.f32 %v956_v46, %v928_v53  ;;  %v1176_v30 = vadd.f32 %v1101_v57, %v7386_v62 }
 0x1a1   :  { %v5214_v22 = vmul.f32 -1.442695, %v1175_v7 }
 0x1a2   :  { %v5215_v16 = vmul.f32 -1.442695, %v1176_v30 }
 0x1a4   :  { %6234 = vpow2.f32 %v5215_v16 }
 0x1a5   :  { %6236 = vpow2.f32 %v5214_v22 }
 0x1ae   :  { %v6235_v45 = vpop.eup %6234 }
 0x1af   :  { %v6237_v23 = vpop.eup %6236  ;;  %v1188_v24 = vadd.f32 1.0, %v6235_v45 }
 0x1b0   :  { %v1182_v28 = vadd.f32 1.0, %v6237_v23 }
 0x1b1   :  { %6238 = vrcp.f32 %v1188_v24 }
 0x1b2   :  { %6240 = vrcp.f32 %v1182_v28 }
 0x1ba   :  { %v1170_v56 = vpop.f32.mrb[8].mxu1 }
 0x1bb   :  { %v1177_v8 = vadd.f32 %v1170_v56, %v7394_v34  ;;  %v1172_v60 = vpop.f32.mrb[9].mxu1  ;;  %v6239_v47 = vpop.eup %6238 }
 0x1bc   :  { %v1178_v37 = vadd.f32 %v1172_v60, %v7396_v17  ;;  %v6241_v53 = vpop.eup %6240  ;;  %v1198_v30 = vmul.f32 0.0, %v6239_v47 }
 0x1bd   :  { %6242 = vtanh.f32 %v1177_v8 }
 0x1be   :  { %v5216_v13 = vmul.f32 -1.442695, %v1178_v37 }
 0x1c0   :  { %6244 = vpow2.f32 %v5216_v13 }
 0x1c7   :  { %v6243_v57 = vpop.eup %6242 }
 0x1c8   :  { %v1199_v7 = vmul.f32 %v6243_v57, %v6241_v53 }
 0x1ca   :  { %v6245_v61 = vpop.eup %6244  ;;  %v7400_v40 = vadd.f32 %v1199_v7, %v1198_v30 }
 0x1cb   :  { %v1195_v39 = vadd.f32 1.0, %v6245_v61 }
 0x1cc   :  { %6246 = vtanh.f32 %v7400_v40 }
 0x1cd   :  { %6248 = vrcp.f32 %v1195_v39 }
 0x1d6   :  { %v6247_v46 = vpop.eup %6246 }
 0x1d7   :  { %v6249_v16 = vpop.eup %6248 }
 0x1d8   :  { %v1202_v22 = vmul.f32 %v6249_v16, %v6247_v46 }
 0x1da   :  { %1206 = vrot.lane.b32.xlu0 %v1202_v22, %s6460_s3  ;;  %1276 = vmatmul.mubr.f32.vlgmr.msra.gmra.mrb[6].mxu0 %v1202_v22  ;;  %1204 = vst.msk [vmem:[#allocation2] sm:$0x3] %vm1203_vm10, %v1202_v22 }
 0x1db   :  { %1347 = vmatmul.mubr.f32.vlgmr.msra.gmra.mrb[10].mxu1 %v1202_v22  ;;  %5684 = vmatpush1.bf16.msra.mxu0 %v6950_v38 }
 0x1dc   :  { %5716 = vmatpush1.bf16.msra.mxu1 %v7195_v4  ;;  %5686 = vmatprep.subr.bf16.mxu0 %v6992_v15 }
 0x1dd   :  { %5718 = vmatprep.subr.bf16.mxu1 %v7198_v5  ;;  %1471 = vmatprep.mubr.f32.mxu0 %v6459_v9 }
 0x1de   :  { %1542 = vmatprep.mubr.f32.mxu1 %v6459_v9 }
 0x1df   :  { %5688 = vmatpush1.bf16.msra.mxu0 %v6995_v51 }
 0x1e0   :  { %5720 = vmatpush1.bf16.msra.mxu1 %v7218_v12  ;;  %5690 = vmatprep.subr.bf16.mxu0 %v7002_v54 }
 0x1e1   :  { %5722 = vmatprep.subr.bf16.mxu1 %v7222_v14 }
 0x1e3   :  { %5692 = vmatpush1.bf16.msra.mxu0 %v7030_v0 }
 0x1e4   :  { %5724 = vmatpush1.bf16.msra.mxu1 %v7241_v19  ;;  %5694 = vmatprep.subr.bf16.mxu0 %v7036_v1 }
 0x1e5   :  { %5726 = vmatprep.subr.bf16.mxu1 %v7245_v20 }
 0x1e7   :  { %5696 = vmatpush1.bf16.msra.mxu0 %v7065_v11 }
 0x1e8   :  { %5728 = vmatpush1.bf16.msra.mxu1 %v7263_v25  ;;  %5698 = vmatprep.subr.bf16.mxu0 %v7084_v21 }
 0x1e9   :  { %5730 = vmatprep.subr.bf16.mxu1 %v7266_v26 }
 0x1eb   :  { %5700 = vmatpush1.bf16.msra.mxu0 %v7100_v27 }
 0x1ec   :  { %5732 = vmatpush1.bf16.msra.mxu1 %v7283_v35  ;;  %5702 = vmatprep.subr.bf16.mxu0 %v7110_v31 }
 0x1ed   :  { %5734 = vmatprep.subr.bf16.mxu1 %v7286_v36 }
 0x1ef   :  { %5704 = vmatpush1.bf16.msra.mxu0 %v7133_v41 }
 0x1f0   :  { %5736 = vmatpush1.bf16.msra.mxu1 %v7303_v43  ;;  %5706 = vmatprep.subr.bf16.mxu0 %v7138_v42 }
 0x1f1   :  { %5738 = vmatprep.subr.bf16.mxu1 %v7306_v44 }
 0x1f3   :  { %5708 = vmatpush1.bf16.msra.mxu0 %v7157_v49 }
 0x1f4   :  { %5740 = vmatpush1.bf16.msra.mxu1 %v7323_v50  ;;  %5710 = vmatprep.subr.bf16.mxu0 %v7169_v55 }
 0x1f5   :  { %5742 = vmatprep.subr.bf16.mxu1 %v7326_v52 }
 0x1f7   :  { %5712 = vmatpush1.bf16.msra.mxu0 %v7193_v3 }
 0x1f8   :  { %5744 = vmatpush1.bf16.msra.mxu1 %v7337_v59  ;;  %5746 = vmatprep.subr.bf16.mxu0 %v6939_v32 }
 0x1f9   :  { %5778 = vmatprep.subr.bf16.mxu1 %v7190_v2 }
 0x24c   :  { %v1207_v45 = vpop.permute.xlu0 %1206 }
 0x24d   :  { %1210 = vst.msk [vmem:[#allocation3 + $0xe] sm:$0x3] %vm1203_vm10, %v1207_v45 }
 0x2ad   :  { %v1277_v23 = vpop.f32.mrb[6].mxu0 }
 0x2ae   :  { %v1357_v24 = vrot.slane %v1277_v23, 6  ;;  %v1348_v28 = vpop.f32.mrb[10].mxu1  ;;  %v1279_v56 = vpop.f32.mrb[7].mxu0 }
 0x2af   :  { %v1358_v8 = vrot.slane %v1279_v56, 6  ;;  %v1350_v60 = vpop.f32.mrb[11].mxu1  ;;  %v1359_v7 = vrot.slane %v1348_v28, 6 }
 0x2b0   :  { %v1365_v37 = vadd.f32 %v1357_v24, %v7390_v58  ;;  %v1360_v57 = vrot.slane %v1350_v60, 6 }
 0x2b1   :  { %v1366_v13 = vadd.f32 %v1358_v8, %v7386_v62  ;;  %v1367_v39 = vadd.f32 %v1359_v7, %v7394_v34  ;;  %v1389_v8 = vrot.slane %v7400_v40, 6 }
 0x2b2   :  { %v5217_v47 = vmul.f32 -1.442695, %v1365_v37  ;;  %v1368_v30 = vadd.f32 %v1360_v57, %v7396_v17 }
 0x2b3   :  { %v5218_v53 = vmul.f32 -1.442695, %v1366_v13 }
 0x2b4   :  { %6250 = vpow2.f32 %v5217_v47  ;;  %v5219_v61 = vmul.f32 -1.442695, %v1368_v30 }
 0x2b5   :  { %6252 = vpow2.f32 %v5218_v53 }
 0x2b6   :  { %6254 = vpow2.f32 %v5219_v61 }
 0x2b7   :  { %6256 = vtanh.f32 %v1367_v39 }
 0x2be   :  { %v6251_v46 = vpop.eup %6250 }
 0x2bf   :  { %v6253_v16 = vpop.eup %6252  ;;  %v1372_v22 = vadd.f32 1.0, %v6251_v46 }
 0x2c0   :  { %v1378_v45 = vadd.f32 1.0, %v6253_v16  ;;  %v6255_v23 = vpop.eup %6254 }
 0x2c1   :  { %6258 = vrcp.f32 %v1372_v22  ;;  %v6257_v24 = vpop.eup %6256  ;;  %v1385_v13 = vadd.f32 1.0, %v6255_v23 }
 0x2c2   :  { %6260 = vrcp.f32 %v1378_v45 }
 0x2c3   :  { %6262 = vrcp.f32 %v1385_v13 }
 0x2cb   :  { %v6259_v56 = vpop.eup %6258 }
 0x2cc   :  { %v6261_v60 = vpop.eup %6260  ;;  %v1392_v37 = vmul.f32 %v6259_v56, %v6257_v24 }
 0x2cd   :  { %v1391_v28 = vmul.f32 %v6261_v60, %v1389_v8  ;;  %v6263_v53 = vpop.eup %6262 }
 0x2cf   :  { %v7445_v47 = vadd.f32 %v1392_v37, %v1391_v28 }
 0x2d1   :  { %6264 = vtanh.f32 %v7445_v47 }
 0x2db   :  { %v6265_v57 = vpop.eup %6264 }
 0x2dc   :  { %v1395_v30 = vmul.f32 %v6265_v57, %v6263_v53 }
 0x2de   :  { %1400 = vrot.lane.b32.xlu1 %v1395_v30, %s6460_s3  ;;  %v1405_v7 = vrot.slane %v1395_v30, 2  ;;  %1398 = vst.msk [vmem:[#allocation2] sm:$0xc] %vm1397_vm11, %v1395_v30 }
 0x2e0   :  { %1472 = vmatmul.mubr.f32.vlgmr.msra.gmra.mrb[8].mxu0 %v1405_v7  ;;  %1543 = vmatmul.mubr.f32.vlgmr.msra.gmra.mrb[12].mxu1 %v1405_v7 }
 0x2e1   :  { %5748 = vmatpush1.bf16.msra.mxu0 %v6950_v38  ;;  %5780 = vmatpush1.bf16.msra.mxu1 %v7195_v4 }
 0x2e2   :  { %5750 = vmatprep.subr.bf16.mxu0 %v6992_v15  ;;  %5782 = vmatprep.subr.bf16.mxu1 %v7198_v5 }
 0x2e3   :  { %1667 = vmatprep.mubr.f32.mxu0 %v6459_v9  ;;  %1738 = vmatprep.mubr.f32.mxu1 %v6459_v9 }
 0x2e5   :  { %5752 = vmatpush1.bf16.msra.mxu0 %v6995_v51  ;;  %5784 = vmatpush1.bf16.msra.mxu1 %v7218_v12 }
 0x2e6   :  { %5754 = vmatprep.subr.bf16.mxu0 %v7002_v54  ;;  %5786 = vmatprep.subr.bf16.mxu1 %v7222_v14 }
 0x2e9   :  { %5756 = vmatpush1.bf16.msra.mxu0 %v7030_v0  ;;  %5788 = vmatpush1.bf16.msra.mxu1 %v7241_v19 }
 0x2ea   :  { %5758 = vmatprep.subr.bf16.mxu0 %v7036_v1  ;;  %5790 = vmatprep.subr.bf16.mxu1 %v7245_v20 }
 0x2ed   :  { %5760 = vmatpush1.bf16.msra.mxu0 %v7065_v11  ;;  %5792 = vmatpush1.bf16.msra.mxu1 %v7263_v25 }
 0x2ee   :  { %5762 = vmatprep.subr.bf16.mxu0 %v7084_v21  ;;  %5794 = vmatprep.subr.bf16.mxu1 %v7266_v26 }
 0x2f1   :  { %5764 = vmatpush1.bf16.msra.mxu0 %v7100_v27  ;;  %5796 = vmatpush1.bf16.msra.mxu1 %v7283_v35 }
 0x2f2   :  { %5766 = vmatprep.subr.bf16.mxu0 %v7110_v31  ;;  %5798 = vmatprep.subr.bf16.mxu1 %v7286_v36 }
 0x2f5   :  { %5768 = vmatpush1.bf16.msra.mxu0 %v7133_v41  ;;  %5800 = vmatpush1.bf16.msra.mxu1 %v7303_v43 }
 0x2f6   :  { %5770 = vmatprep.subr.bf16.mxu0 %v7138_v42  ;;  %5802 = vmatprep.subr.bf16.mxu1 %v7306_v44 }
 0x2f9   :  { %5772 = vmatpush1.bf16.msra.mxu0 %v7157_v49  ;;  %5804 = vmatpush1.bf16.msra.mxu1 %v7323_v50 }
 0x2fa   :  { %5774 = vmatprep.subr.bf16.mxu0 %v7169_v55  ;;  %5806 = vmatprep.subr.bf16.mxu1 %v7326_v52 }
 0x2fd   :  { %5776 = vmatpush1.bf16.msra.mxu0 %v7193_v3  ;;  %5808 = vmatpush1.bf16.msra.mxu1 %v7337_v59 }
 0x2fe   :  { %5810 = vmatprep.subr.bf16.mxu0 %v6939_v32  ;;  %5842 = vmatprep.subr.bf16.mxu1 %v7190_v2 }
 0x350   :  { %v1401_v40 = vpop.permute.xlu1 %1400 }
 0x351   :  { %1404 = vst.msk [vmem:[#allocation3 + $0xa] sm:$0xc] %vm1397_vm11, %v1401_v40 }
 0x3b3   :  { %v1473_v61 = vpop.f32.mrb[8].mxu0  ;;  %v1544_v39 = vpop.f32.mrb[12].mxu1 }
 0x3b4   :  { %v1553_v46 = vrot.slane %v1473_v61, 4  ;;  %v1475_v16 = vpop.f32.mrb[9].mxu0  ;;  %v1546_v22 = vpop.f32.mrb[13].mxu1  ;;  %v1555_v13 = vrot.slane %v1544_v39, 4 }
 0x3b5   :  { %v1554_v45 = vrot.slane %v1475_v16, 4  ;;  %v1556_v60 = vrot.slane %v1546_v22, 4  ;;  %v1585_v22 = vrot.slane %v7445_v47, 6 }
 0x3b6   :  { %v1561_v23 = vadd.f32 %v1553_v46, %v7390_v58  ;;  %v1563_v53 = vadd.f32 %v1555_v13, %v7394_v34 }
 0x3b7   :  { %v1562_v24 = vadd.f32 %v1554_v45, %v7386_v62  ;;  %v1564_v37 = vadd.f32 %v1556_v60, %v7396_v17 }
 0x3b8   :  { %v5220_v56 = vmul.f32 -1.442695, %v1561_v23 }
 0x3b9   :  { %v5221_v8 = vmul.f32 -1.442695, %v1562_v24  ;;  %v5222_v28 = vmul.f32 -1.442695, %v1564_v37 }
 0x3ba   :  { %6266 = vpow2.f32 %v5220_v56 }
 0x3bb   :  { %6268 = vpow2.f32 %v5221_v8 }
 0x3bc   :  { %6270 = vpow2.f32 %v5222_v28 }
 0x3bd   :  { %6272 = vtanh.f32 %v1563_v53 }
 0x3c4   :  { %v6267_v57 = vpop.eup %6266 }
 0x3c5   :  { %v6269_v30 = vpop.eup %6268  ;;  %v1568_v7 = vadd.f32 1.0, %v6267_v57 }
 0x3c6   :  { %v1574_v40 = vadd.f32 1.0, %v6269_v30  ;;  %v6271_v61 = vpop.eup %6270 }
 0x3c7   :  { %6274 = vrcp.f32 %v1568_v7  ;;  %v6273_v46 = vpop.eup %6272  ;;  %v1581_v24 = vadd.f32 1.0, %v6271_v61 }
 0x3c8   :  { %6276 = vrcp.f32 %v1574_v40 }
 0x3c9   :  { %6278 = vrcp.f32 %v1581_v24 }
 0x3d1   :  { %v6275_v16 = vpop.eup %6274 }
 0x3d2   :  { %v6277_v45 = vpop.eup %6276  ;;  %v1588_v23 = vmul.f32 %v6275_v16, %v6273_v46 }
 0x3d3   :  { %v1587_v39 = vmul.f32 %v6277_v45, %v1585_v22  ;;  %v6279_v8 = vpop.eup %6278 }
 0x3d5   :  { %v7490_v56 = vadd.f32 %v1588_v23, %v1587_v39 }
 0x3d7   :  { %6280 = vtanh.f32 %v7490_v56 }
 0x3e1   :  { %v6281_v60 = vpop.eup %6280 }
 0x3e2   :  { %v7493_v37 = vmul.f32 %v6281_v60, %v6279_v8 }
 0x3e4   :  { %v1601_v13 = vrot.slane %v7493_v37, 4  ;;  %1594 = vst.msk [vmem:[#allocation2] sm:$0x30] %vm1593_vm12, %v7493_v37 }
 0x3e6   :  { %1668 = vmatmul.mubr.f32.vlgmr.msra.gmra.mrb[10].mxu0 %v1601_v13  ;;  %1739 = vmatmul.mubr.f32.vlgmr.msra.gmra.mrb[14].mxu1 %v1601_v13 }
 0x3e7   :  { %5812 = vmatpush1.bf16.msra.mxu0 %v6950_v38  ;;  %5844 = vmatpush1.bf16.msra.mxu1 %v7195_v4 }
 0x3e8   :  { %5814 = vmatprep.subr.bf16.mxu0 %v6992_v15  ;;  %5846 = vmatprep.subr.bf16.mxu1 %v7198_v5 }
 0x3e9   :  { %1863 = vmatprep.mubr.f32.mxu0 %v6459_v9  ;;  %1934 = vmatprep.mubr.f32.mxu1 %v6459_v9 }
 0x3eb   :  { %5816 = vmatpush1.bf16.msra.mxu0 %v6995_v51  ;;  %5848 = vmatpush1.bf16.msra.mxu1 %v7218_v12 }
 0x3ec   :  { %5818 = vmatprep.subr.bf16.mxu0 %v7002_v54  ;;  %5850 = vmatprep.subr.bf16.mxu1 %v7222_v14 }
 0x3ef   :  { %5820 = vmatpush1.bf16.msra.mxu0 %v7030_v0  ;;  %5852 = vmatpush1.bf16.msra.mxu1 %v7241_v19 }
 0x3f0   :  { %5822 = vmatprep.subr.bf16.mxu0 %v7036_v1  ;;  %5854 = vmatprep.subr.bf16.mxu1 %v7245_v20 }
 0x3f3   :  { %5824 = vmatpush1.bf16.msra.mxu0 %v7065_v11  ;;  %5856 = vmatpush1.bf16.msra.mxu1 %v7263_v25 }
 0x3f4   :  { %5826 = vmatprep.subr.bf16.mxu0 %v7084_v21  ;;  %5858 = vmatprep.subr.bf16.mxu1 %v7266_v26 }
 0x3f7   :  { %5828 = vmatpush1.bf16.msra.mxu0 %v7100_v27  ;;  %5860 = vmatpush1.bf16.msra.mxu1 %v7283_v35 }
 0x3f8   :  { %5830 = vmatprep.subr.bf16.mxu0 %v7110_v31  ;;  %5862 = vmatprep.subr.bf16.mxu1 %v7286_v36 }
 0x3fb   :  { %5832 = vmatpush1.bf16.msra.mxu0 %v7133_v41  ;;  %5864 = vmatpush1.bf16.msra.mxu1 %v7303_v43 }
 0x3fc   :  { %5834 = vmatprep.subr.bf16.mxu0 %v7138_v42  ;;  %5866 = vmatprep.subr.bf16.mxu1 %v7306_v44 }
 0x3ff   :  { %5836 = vmatpush1.bf16.msra.mxu0 %v7157_v49  ;;  %5868 = vmatpush1.bf16.msra.mxu1 %v7323_v50 }
 0x400   :  { %5838 = vmatprep.subr.bf16.mxu0 %v7169_v55  ;;  %5870 = vmatprep.subr.bf16.mxu1 %v7326_v52 }
 0x403   :  { %5840 = vmatpush1.bf16.msra.mxu0 %v7193_v3  ;;  %5872 = vmatpush1.bf16.msra.mxu1 %v7337_v59 }
 0x404   :  { %5874 = vmatprep.subr.bf16.mxu0 %v6939_v32  ;;  %5906 = vmatprep.subr.bf16.mxu1 %v7190_v2 }
 0x4b9   :  { %v1669_v47 = vpop.f32.mrb[10].mxu0  ;;  %v1740_v28 = vpop.f32.mrb[14].mxu1 }
 0x4ba   :  { %v1749_v53 = vrot.slane %v1669_v47, 2  ;;  %v1671_v57 = vpop.f32.mrb[11].mxu0  ;;  %v1742_v30 = vpop.f32.mrb[15].mxu1  ;;  %v1751_v23 = vrot.slane %v1740_v28, 2 }
 0x4bb   :  { %v1750_v7 = vrot.slane %v1671_v57, 2  ;;  %v1752_v22 = vrot.slane %v1742_v30, 2  ;;  %v1781_v57 = vrot.slane %v7490_v56, 6 }
 0x4bc   :  { %v1757_v40 = vadd.f32 %v1749_v53, %v7390_v58  ;;  %v1759_v39 = vadd.f32 %v1751_v23, %v7394_v34 }
 0x4bd   :  { %v1758_v61 = vadd.f32 %v1750_v7, %v7386_v62  ;;  %v1760_v45 = vadd.f32 %v1752_v22, %v7396_v17 }
 0x4be   :  { %v5223_v46 = vmul.f32 -1.442695, %v1757_v40 }
 0x4bf   :  { %v5224_v16 = vmul.f32 -1.442695, %v1758_v61  ;;  %v5225_v24 = vmul.f32 -1.442695, %v1760_v45 }
 0x4c0   :  { %6282 = vpow2.f32 %v5223_v46 }
 0x4c1   :  { %6284 = vpow2.f32 %v5224_v16 }
 0x4c2   :  { %6286 = vpow2.f32 %v5225_v24 }
 0x4c3   :  { %6288 = vtanh.f32 %v1759_v39 }
 0x4ca   :  { %v6283_v8 = vpop.eup %6282 }
 0x4cb   :  { %v6285_v60 = vpop.eup %6284  ;;  %v1764_v13 = vadd.f32 1.0, %v6283_v8 }
 0x4cc   :  { %v1770_v47 = vadd.f32 1.0, %v6285_v60  ;;  %v6287_v62 = vpop.eup %6286 }
 0x4cd   :  { %6290 = vrcp.f32 %v1764_v13  ;;  %v6289_v58 = vpop.eup %6288  ;;  %v1777_v17 = vadd.f32 1.0, %v6287_v62 }
 0x4ce   :  { %6292 = vrcp.f32 %v1770_v47 }
 0x4cf   :  { %6294 = vrcp.f32 %v1777_v17 }
 0x4d7   :  { %v6291_v53 = vpop.eup %6290 }
 0x4d8   :  { %v6293_v30 = vpop.eup %6292  ;;  %v1784_v7 = vmul.f32 %v6291_v53, %v6289_v58 }
 0x4d9   :  { %v1783_v28 = vmul.f32 %v6293_v30, %v1781_v57  ;;  %v6295_v34 = vpop.eup %6294 }
 0x4db   :  { %v7537_v40 = vadd.f32 %v1784_v7, %v1783_v28 }
 0x4dd   :  { %6296 = vtanh.f32 %v7537_v40 }
 0x4e7   :  { %v6297_v61 = vpop.eup %6296 }
 0x4e8   :  { %v7540_v46 = vmul.f32 %v6297_v61, %v6295_v34  ;;  %v1965_v34 = vrot.slane %v7537_v40, 6 }
 0x4ea   :  { %v1797_v16 = vrot.slane %v7540_v46, 6  ;;  %1790 = vst.msk [vmem:[#allocation2] sm:$0xc0] %vm1789_vm13, %v7540_v46 }
 0x4ec   :  { %1864 = vmatmul.mubr.f32.vlgmr.msra.gmra.mrb[12].mxu0 %v1797_v16  ;;  %1935 = vmatmul.mubr.f32.vlgmr.msra.gmra.mrb[16].mxu1 %v1797_v16 }
 0x4ed   :  { %5876 = vmatpush1.bf16.msra.mxu0 %v6950_v38  ;;  %5908 = vmatpush1.bf16.msra.mxu1 %v7195_v4 }
 0x4ee   :  { %5878 = vmatprep.subr.bf16.mxu0 %v6992_v15  ;;  %5910 = vmatprep.subr.bf16.mxu1 %v7198_v5 }
 0x4ef   :  { %2044 = vmatprep.mubr.f32.mxu0 %v6459_v9  ;;  %2115 = vmatprep.mubr.f32.mxu1 %v6459_v9 }
 0x4f1   :  { %5880 = vmatpush1.bf16.msra.mxu0 %v6995_v51  ;;  %5912 = vmatpush1.bf16.msra.mxu1 %v7218_v12 }
 0x4f2   :  { %5882 = vmatprep.subr.bf16.mxu0 %v7002_v54  ;;  %5914 = vmatprep.subr.bf16.mxu1 %v7222_v14 }
 0x4f5   :  { %5884 = vmatpush1.bf16.msra.mxu0 %v7030_v0  ;;  %5916 = vmatpush1.bf16.msra.mxu1 %v7241_v19 }
 0x4f6   :  { %5886 = vmatprep.subr.bf16.mxu0 %v7036_v1  ;;  %5918 = vmatprep.subr.bf16.mxu1 %v7245_v20 }
 0x4f9   :  { %5888 = vmatpush1.bf16.msra.mxu0 %v7065_v11  ;;  %5920 = vmatpush1.bf16.msra.mxu1 %v7263_v25 }
 0x4fa   :  { %5890 = vmatprep.subr.bf16.mxu0 %v7084_v21  ;;  %5922 = vmatprep.subr.bf16.mxu1 %v7266_v26 }
 0x4fd   :  { %5892 = vmatpush1.bf16.msra.mxu0 %v7100_v27  ;;  %5924 = vmatpush1.bf16.msra.mxu1 %v7283_v35 }
 0x4fe   :  { %5894 = vmatprep.subr.bf16.mxu0 %v7110_v31  ;;  %5926 = vmatprep.subr.bf16.mxu1 %v7286_v36 }
 0x501   :  { %5896 = vmatpush1.bf16.msra.mxu0 %v7133_v41  ;;  %5928 = vmatpush1.bf16.msra.mxu1 %v7303_v43 }
 0x502   :  { %5898 = vmatprep.subr.bf16.mxu0 %v7138_v42  ;;  %5930 = vmatprep.subr.bf16.mxu1 %v7306_v44 }
 0x505   :  { %5900 = vmatpush1.bf16.msra.mxu0 %v7157_v49  ;;  %5932 = vmatpush1.bf16.msra.mxu1 %v7323_v50 }
 0x506   :  { %5902 = vmatprep.subr.bf16.mxu0 %v7169_v55  ;;  %5934 = vmatprep.subr.bf16.mxu1 %v7326_v52 }
 0x509   :  { %5904 = vmatpush1.bf16.msra.mxu0 %v7193_v3  ;;  %5936 = vmatpush1.bf16.msra.mxu1 %v7337_v59 }
 0x50a   :  { %5938 = vmatprep.subr.bf16.mxu0 %v6939_v32  ;;  %5970 = vmatprep.subr.bf16.mxu1 %v7190_v2 }
 0x5bf   :  { %v1865_v56 = vpop.f32.mrb[12].mxu0  ;;  %v1936_v22 = vpop.f32.mrb[16].mxu1 }
 0x5c0   :  { %v1941_v45 = vadd.f32 %v1865_v56, %v7378_v29  ;;  %v1867_v23 = vpop.f32.mrb[13].mxu0  ;;  %v1938_v24 = vpop.f32.mrb[17].mxu1  ;;  %v1943_v62 = vadd.f32 %v1936_v22, %v7384_v48 }
 0x5c1   :  { %v1942_v39 = vadd.f32 %v1867_v23, %v7380_v33  ;;  %v1944_v13 = vadd.f32 %v1938_v24, %v7388_v63 }
 0x5c2   :  { %v5226_v8 = vmul.f32 -1.442695, %v1941_v45 }
 0x5c3   :  { %v5227_v60 = vmul.f32 -1.442695, %v1942_v39  ;;  %v5228_v47 = vmul.f32 -1.442695, %v1944_v13 }
 0x5c4   :  { %6298 = vpow2.f32 %v5226_v8 }
 0x5c5   :  { %6300 = vpow2.f32 %v5227_v60 }
 0x5c6   :  { %6302 = vpow2.f32 %v5228_v47 }
 0x5c7   :  { %6304 = vtanh.f32 %v1943_v62 }
 0x5ce   :  { %v6299_v58 = vpop.eup %6298 }
 0x5cf   :  { %v6301_v53 = vpop.eup %6300  ;;  %v1948_v57 = vadd.f32 1.0, %v6299_v58 }
 0x5d0   :  { %v1954_v30 = vadd.f32 1.0, %v6301_v53  ;;  %v6303_v7 = vpop.eup %6302 }
 0x5d1   :  { %6306 = vrcp.f32 %v1948_v57  ;;  %v6305_v17 = vpop.eup %6304  ;;  %v1961_v56 = vadd.f32 1.0, %v6303_v7 }
 0x5d2   :  { %6308 = vrcp.f32 %v1954_v30 }
 0x5d3   :  { %6310 = vrcp.f32 %v1961_v56 }
 0x5db   :  { %v6307_v28 = vpop.eup %6306 }
 0x5dc   :  { %v6309_v61 = vpop.eup %6308  ;;  %v1968_v16 = vmul.f32 %v6307_v28, %v6305_v17 }
 0x5dd   :  { %v1967_v45 = vmul.f32 %v6309_v61, %v1965_v34  ;;  %v6311_v22 = vpop.eup %6310 }
 0x5df   :  { %v7584_v23 = vadd.f32 %v1968_v16, %v1967_v45 }
 0x5e1   :  { %6312 = vtanh.f32 %v7584_v23 }
 0x5eb   :  { %v6313_v24 = vpop.eup %6312 }
 0x5ec   :  { %v1971_v39 = vmul.f32 %v6313_v24, %v6311_v22 }
 0x5ee   :  { %1975 = vrot.lane.b32.xlu0 %v1971_v39, %s6460_s3  ;;  %1973 = vst.msk [vmem:[#allocation2 + $0x8] sm:$0x3] %vm1203_vm10, %v1971_v39  ;;  %2045 = vmatmul.mubr.f32.vlgmr.msra.gmra.mrb[14].mxu0 %v1971_v39 }
 0x5ef   :  { %2116 = vmatmul.mubr.f32.vlgmr.msra.gmra.mrb[18].mxu1 %v1971_v39  ;;  %5940 = vmatpush1.bf16.msra.mxu0 %v6950_v38 }
 0x5f0   :  { %5972 = vmatpush1.bf16.msra.mxu1 %v7195_v4  ;;  %5942 = vmatprep.subr.bf16.mxu0 %v6992_v15 }
 0x5f1   :  { %5974 = vmatprep.subr.bf16.mxu1 %v7198_v5  ;;  %2239 = vmatprep.mubr.f32.mxu0 %v6459_v9 }
 0x5f2   :  { %2310 = vmatprep.mubr.f32.mxu1 %v6459_v9 }
 0x5f3   :  { %5944 = vmatpush1.bf16.msra.mxu0 %v6995_v51 }
 0x5f4   :  { %5976 = vmatpush1.bf16.msra.mxu1 %v7218_v12  ;;  %5946 = vmatprep.subr.bf16.mxu0 %v7002_v54 }
 0x5f5   :  { %5978 = vmatprep.subr.bf16.mxu1 %v7222_v14 }
 0x5f7   :  { %5948 = vmatpush1.bf16.msra.mxu0 %v7030_v0 }
 0x5f8   :  { %5980 = vmatpush1.bf16.msra.mxu1 %v7241_v19  ;;  %5950 = vmatprep.subr.bf16.mxu0 %v7036_v1 }
 0x5f9   :  { %5982 = vmatprep.subr.bf16.mxu1 %v7245_v20 }
 0x5fb   :  { %5952 = vmatpush1.bf16.msra.mxu0 %v7065_v11 }
 0x5fc   :  { %5984 = vmatpush1.bf16.msra.mxu1 %v7263_v25  ;;  %5954 = vmatprep.subr.bf16.mxu0 %v7084_v21 }
 0x5fd   :  { %5986 = vmatprep.subr.bf16.mxu1 %v7266_v26 }
 0x5ff   :  { %5956 = vmatpush1.bf16.msra.mxu0 %v7100_v27 }
 0x600   :  { %5988 = vmatpush1.bf16.msra.mxu1 %v7283_v35  ;;  %5958 = vmatprep.subr.bf16.mxu0 %v7110_v31 }
 0x601   :  { %5990 = vmatprep.subr.bf16.mxu1 %v7286_v36 }
 0x603   :  { %5960 = vmatpush1.bf16.msra.mxu0 %v7133_v41 }
 0x604   :  { %5992 = vmatpush1.bf16.msra.mxu1 %v7303_v43  ;;  %5962 = vmatprep.subr.bf16.mxu0 %v7138_v42 }
 0x605   :  { %5994 = vmatprep.subr.bf16.mxu1 %v7306_v44 }
 0x607   :  { %5964 = vmatpush1.bf16.msra.mxu0 %v7157_v49 }
 0x608   :  { %5996 = vmatpush1.bf16.msra.mxu1 %v7323_v50  ;;  %5966 = vmatprep.subr.bf16.mxu0 %v7169_v55 }
 0x609   :  { %5998 = vmatprep.subr.bf16.mxu1 %v7326_v52 }
 0x60b   :  { %5968 = vmatpush1.bf16.msra.mxu0 %v7193_v3 }
 0x60c   :  { %6000 = vmatpush1.bf16.msra.mxu1 %v7337_v59  ;;  %6002 = vmatprep.subr.bf16.mxu0 %v6939_v32 }
 0x60d   :  { %6034 = vmatprep.subr.bf16.mxu1 %v7190_v2 }
 0x660   :  { %v1976_v40 = vpop.permute.xlu0 %1975 }
 0x661   :  { %1979 = vst.msk [vmem:[#allocation3 + $0x6] sm:$0x3] %vm1203_vm10, %v1976_v40  ;;  %v2158_v40 = vrot.slane %v7584_v23, 6 }
 0x6c1   :  { %v2046_v8 = vpop.f32.mrb[14].mxu0 }
 0x6c2   :  { %v2126_v60 = vrot.slane %v2046_v8, 6  ;;  %v2117_v13 = vpop.f32.mrb[18].mxu1  ;;  %v2048_v47 = vpop.f32.mrb[15].mxu0 }
 0x6c3   :  { %v2127_v62 = vrot.slane %v2048_v47, 6  ;;  %v2119_v58 = vpop.f32.mrb[19].mxu1  ;;  %v2128_v2 = vrot.slane %v2117_v13, 6 }
 0x6c4   :  { %v2134_v53 = vadd.f32 %v2126_v60, %v7378_v29  ;;  %v2129_v17 = vrot.slane %v2119_v58, 6 }
 0x6c5   :  { %v2135_v57 = vadd.f32 %v2127_v62, %v7380_v33  ;;  %v2136_v34 = vadd.f32 %v2128_v2, %v7384_v48 }
 0x6c6   :  { %v5229_v30 = vmul.f32 -1.442695, %v2134_v53  ;;  %v2137_v32 = vadd.f32 %v2129_v17, %v7388_v63 }
 0x6c7   :  { %v5230_v7 = vmul.f32 -1.442695, %v2135_v57 }
 0x6c8   :  { %6314 = vpow2.f32 %v5229_v30  ;;  %v5231_v28 = vmul.f32 -1.442695, %v2137_v32 }
 0x6c9   :  { %6316 = vpow2.f32 %v5230_v7 }
 0x6ca   :  { %6318 = vpow2.f32 %v5231_v28 }
 0x6cb   :  { %6320 = vtanh.f32 %v2136_v34 }
 0x6d2   :  { %v6315_v61 = vpop.eup %6314 }
 0x6d3   :  { %v6317_v16 = vpop.eup %6316  ;;  %v2141_v56 = vadd.f32 1.0, %v6315_v61 }
 0x6d4   :  { %v2147_v45 = vadd.f32 1.0, %v6317_v16  ;;  %v6319_v22 = vpop.eup %6318 }
 0x6d5   :  { %6322 = vrcp.f32 %v2141_v56  ;;  %v6321_v24 = vpop.eup %6320  ;;  %v2154_v47 = vadd.f32 1.0, %v6319_v22 }
 0x6d6   :  { %6324 = vrcp.f32 %v2147_v45 }
 0x6d7   :  { %6326 = vrcp.f32 %v2154_v47 }
 0x6df   :  { %v6323_v39 = vpop.eup %6322 }
 0x6e0   :  { %v6325_v8 = vpop.eup %6324  ;;  %v2161_v60 = vmul.f32 %v6323_v39, %v6321_v24 }
 0x6e1   :  { %v2160_v13 = vmul.f32 %v6325_v8, %v2158_v40  ;;  %v6327_v58 = vpop.eup %6326 }
 0x6e3   :  { %v7629_v62 = vadd.f32 %v2161_v60, %v2160_v13 }
 0x6e5   :  { %6328 = vtanh.f32 %v7629_v62 }
 0x6ef   :  { %v6329_v53 = vpop.eup %6328 }
 0x6f0   :  { %v2164_v57 = vmul.f32 %v6329_v53, %v6327_v58 }
 0x6f2   :  { %2168 = vrot.lane.b32.xlu1 %v2164_v57, %s6460_s3  ;;  %2166 = vst.msk [vmem:[#allocation2 + $0x8] sm:$0xc] %vm1397_vm11, %v2164_v57  ;;  %v2173_v30 = vrot.slane %v2164_v57, 2 }
 0x6f4   :  { %2240 = vmatmul.mubr.f32.vlgmr.msra.gmra.mrb[16].mxu0 %v2173_v30  ;;  %2311 = vmatmul.mubr.f32.vlgmr.msra.gmra.mrb[20].mxu1 %v2173_v30 }
 0x6f5   :  { %6004 = vmatpush1.bf16.msra.mxu0 %v6950_v38  ;;  %6036 = vmatpush1.bf16.msra.mxu1 %v7195_v4 }
 0x6f6   :  { %6006 = vmatprep.subr.bf16.mxu0 %v6992_v15  ;;  %6038 = vmatprep.subr.bf16.mxu1 %v7198_v5 }
 0x6f7   :  { %2434 = vmatprep.mubr.f32.mxu0 %v6459_v9  ;;  %2505 = vmatprep.mubr.f32.mxu1 %v6459_v9 }
 0x6f9   :  { %6008 = vmatpush1.bf16.msra.mxu0 %v6995_v51  ;;  %6040 = vmatpush1.bf16.msra.mxu1 %v7218_v12 }
 0x6fa   :  { %6010 = vmatprep.subr.bf16.mxu0 %v7002_v54  ;;  %6042 = vmatprep.subr.bf16.mxu1 %v7222_v14 }
 0x6fd   :  { %6012 = vmatpush1.bf16.msra.mxu0 %v7030_v0  ;;  %6044 = vmatpush1.bf16.msra.mxu1 %v7241_v19 }
 0x6fe   :  { %6014 = vmatprep.subr.bf16.mxu0 %v7036_v1  ;;  %6046 = vmatprep.subr.bf16.mxu1 %v7245_v20 }
 0x701   :  { %6016 = vmatpush1.bf16.msra.mxu0 %v7065_v11  ;;  %6048 = vmatpush1.bf16.msra.mxu1 %v7263_v25 }
 0x702   :  { %6018 = vmatprep.subr.bf16.mxu0 %v7084_v21  ;;  %6050 = vmatprep.subr.bf16.mxu1 %v7266_v26 }
 0x705   :  { %6020 = vmatpush1.bf16.msra.mxu0 %v7100_v27  ;;  %6052 = vmatpush1.bf16.msra.mxu1 %v7283_v35  ;;  %v2353_v35 = vrot.slane %v7629_v62, 6 }
 0x706   :  { %6022 = vmatprep.subr.bf16.mxu0 %v7110_v31  ;;  %6054 = vmatprep.subr.bf16.mxu1 %v7286_v36 }
 0x709   :  { %6024 = vmatpush1.bf16.msra.mxu0 %v7133_v41  ;;  %6056 = vmatpush1.bf16.msra.mxu1 %v7303_v43 }
 0x70a   :  { %6026 = vmatprep.subr.bf16.mxu0 %v7138_v42  ;;  %6058 = vmatprep.subr.bf16.mxu1 %v7306_v44 }
 0x70d   :  { %6028 = vmatpush1.bf16.msra.mxu0 %v7157_v49  ;;  %6060 = vmatpush1.bf16.msra.mxu1 %v7323_v50 }
 0x70e   :  { %6030 = vmatprep.subr.bf16.mxu0 %v7169_v55  ;;  %6062 = vmatprep.subr.bf16.mxu1 %v7326_v52 }
 0x711   :  { %6032 = vmatpush1.bf16.msra.mxu0 %v7193_v3  ;;  %6064 = vmatpush1.bf16.msra.mxu1 %v7337_v59 }
 0x712   :  { %5357 = vmatprep.subr.mxu1 %v6459_v9 }
 0x764   :  { %v2169_v38 = vpop.permute.xlu1 %2168 }
 0x765   :  { %2172 = vst.msk [vmem:[#allocation3 + $0x2] sm:$0xc] %vm1397_vm11, %v2169_v38 }
 0x76c   :  { %v7677_v32 = vld [vmem:[#allocation3 + $0x4] sm:$0x3] }
 0x7c7   :  { %v2241_v15 = vpop.f32.mrb[16].mxu0  ;;  %v2312_v51 = vpop.f32.mrb[20].mxu1 }
 0x7c8   :  { %v2321_v54 = vrot.slane %v2241_v15, 4  ;;  %v2243_v0 = vpop.f32.mrb[17].mxu0  ;;  %v2314_v1 = vpop.f32.mrb[21].mxu1  ;;  %v2323_v55 = vrot.slane %v2312_v51, 4 }
 0x7c9   :  { %v2322_v11 = vrot.slane %v2243_v0, 4  ;;  %v2324_v42 = vrot.slane %v2314_v1, 4 }
 0x7ca   :  { %v2329_v21 = vadd.f32 %v2321_v54, %v7378_v29  ;;  %v2331_v4 = vadd.f32 %v2323_v55, %v7384_v48  ;;  %v7709_v55 = vld [vmem:[#allocation3 + $0xe] sm:$0x3] }
 0x7cb   :  { %v2330_v27 = vadd.f32 %v2322_v11, %v7380_v33  ;;  %v2332_v49 = vadd.f32 %v2324_v42, %v7388_v63  ;;  %v7701_v42 = vld [vmem:[#allocation3 + $0x6] sm:$0x3] }
 0x7cc   :  { %v5232_v31 = vmul.f32 -1.442695, %v2329_v21 }
 0x7cd   :  { %v5233_v41 = vmul.f32 -1.442695, %v2330_v27  ;;  %v5234_v3 = vmul.f32 -1.442695, %v2332_v49 }
 0x7ce   :  { %6330 = vpow2.f32 %v5232_v31  ;;  %v2659_v31 = vld [vmem:[%s8361_s4] sm:$0xff] }
 0x7cf   :  { %6332 = vpow2.f32 %v5233_v41  ;;  %v2660_v41 = vld [vmem:[%s8361_s4 + $0x8] sm:$0xff] }
 0x7d0   :  { %6334 = vpow2.f32 %v5234_v3  ;;  %v6065_v49 = vpack.c.bf16 %v2660_v41, %v2659_v31 }
 0x7d1   :  { %6336 = vtanh.f32 %v2331_v4  ;;  %v2661_v4 = vld [vmem:[%s8361_s4 + $0x10] sm:$0xff] }
 0x7d2   :  { %6066 = vmatprep.subr.bf16.mxu0 %v6065_v49 }
 0x7d8   :  { %v6331_v5 = vpop.eup %6330 }
 0x7d9   :  { %v6333_v12 = vpop.eup %6332  ;;  %v2336_v14 = vadd.f32 1.0, %v6331_v5  ;;  %v2662_v5 = vld [vmem:[%s8361_s4 + $0x18] sm:$0xff] }
 0x7da   :  { %v2342_v19 = vadd.f32 1.0, %v6333_v12  ;;  %v6335_v20 = vpop.eup %6334  ;;  %v6069_v12 = vpack.c.bf16 %v2662_v5, %v2661_v4 }
 0x7db   :  { %6338 = vrcp.f32 %v2336_v14  ;;  %v6337_v25 = vpop.eup %6336  ;;  %v2349_v44 = vadd.f32 1.0, %v6335_v20  ;;  %v2664_v20 = vld [vmem:[%s8361_s4 + $0x28] sm:$0xff] }
 0x7dc   :  { %6340 = vrcp.f32 %v2342_v19  ;;  %v2663_v19 = vld [vmem:[%s8361_s4 + $0x20] sm:$0xff] }
 0x7dd   :  { %6342 = vrcp.f32 %v2349_v44 }
 0x7e5   :  { %v6339_v26 = vpop.eup %6338 }
 0x7e6   :  { %v6341_v36 = vpop.eup %6340  ;;  %v2356_v43 = vmul.f32 %v6339_v26, %v6337_v25  ;;  %v6073_v25 = vpack.c.bf16 %v2664_v20, %v2663_v19  ;;  %v2665_v26 = vld [vmem:[%s8361_s4 + $0x30] sm:$0xff] }
 0x7e7   :  { %v2355_v50 = vmul.f32 %v6341_v36, %v2353_v35  ;;  %v6343_v59 = vpop.eup %6342  ;;  %v2666_v35 = vld [vmem:[%s8361_s4 + $0x38] sm:$0xff]  ;;  %s6471_s4 = smov 8  }
 0x7e8   :  { %v6077_v36 = vpack.c.bf16 %v2666_v35, %v2665_v26 }
 0x7e9   :  { %v2357_v52 = vadd.f32 %v2356_v43, %v2355_v50  ;;  %v7741_v50 = vld [vmem:[#allocation3 + $0xc] sm:$0x3] }
 0x7eb   :  { %6344 = vtanh.f32 %v2357_v52  ;;  %v2548_v15 = vrot.slane %v2357_v52, 6 }
 0x7f5   :  { %v6345_v23 = vpop.eup %6344 }
 0x7f6   :  { %v2359_v7 = vmul.f32 %v6345_v23, %v6343_v59 }
 0x7f8   :  { %2363 = vrot.lane.b32.xlu0 %v2359_v7, %s6460_s3  ;;  %v2368_v17 = vrot.slane %v2359_v7, 4  ;;  %2361 = vst.msk [vmem:[#allocation2 + $0x8] sm:$0x30] %vm1593_vm12, %v2359_v7  ;;  %v6462_v7 = vmov 1983009808  }
 0x7fa   :  { %2435 = vmatmul.mubr.f32.vlgmr.msra.gmra.mrb[18].mxu0 %v2368_v17  ;;  %2506 = vmatmul.mubr.f32.vlgmr.msra.gmra.mrb[22].mxu1 %v2368_v17  ;;  %v2687_v17 = vunpack.c.l.s4 %v6462_v7 }
 0x7fb   :  { %6068 = vmatpush3.bf16.msra.mxu0 %v6065_v49  ;;  %5359 = vmatprep.mubr.msk.f32.mxu1 %vm6469_vm2, %v6459_v9 }
 0x7fc   :  { %1596 = vrot.lane.b32.xlu0 %v7493_v37, %s6460_s3  ;;  %6070 = vmatprep.subr.bf16.mxu0 %v6069_v12 }
 0x7ff   :  { %6072 = vmatpush3.bf16.msra.mxu0 %v6069_v12  ;;  %v7779_v31 = vld [vmem:[#allocation2 + $0xc] sm:$0x3] }
 0x800   :  { %2590 = vrot.lane.b32.xlu0 %v7677_v32, %s6461_s1  ;;  %6074 = vmatprep.subr.bf16.mxu0 %v6073_v25 }
 0x803   :  { %6076 = vmatpush3.bf16.msra.mxu0 %v6073_v25 }
 0x804   :  { %6078 = vmatprep.subr.bf16.mxu0 %v6077_v36 }
 0x807   :  { %6080 = vmatpush3.bf16.msra.mxu0 %v6077_v36 }
 0x86a   :  { %v2364_v2 = vpop.permute.xlu0 %2363 }
 0x86b   :  { %2367 = vst.msk [vmem:[#allocation3 - $0x2] sm:$0x30] %vm1593_vm12, %v2364_v2 }
 0x86e   :  { %v1597_v28 = vpop.permute.xlu0 %1596 }
 0x86f   :  { %1600 = vst.msk [vmem:[#allocation3 + $0x6] sm:$0x30] %vm1593_vm12, %v1597_v28  ;;  %v2688_v28 = vunpack.c.0.s8 %v2687_v17  ;;  %v2668_v17 = vld [vmem:[%s8363_s6] sm:$0xff] }
 0x872   :  { %v7691_v27 = vld [vmem:[#allocation3 + $0x2] sm:$0x3]  ;;  %v2591_v2 = vpop.permute.xlu0 %2590 }
 0x8cd   :  { %v2436_v34 = vpop.f32.mrb[18].mxu0  ;;  %v2507_v61 = vpop.f32.mrb[22].mxu1 }
 0x8ce   :  { %v2516_v16 = vrot.slane %v2436_v34, 2  ;;  %v2438_v56 = vpop.f32.mrb[19].mxu0  ;;  %v2509_v45 = vpop.f32.mrb[23].mxu1  ;;  %v2518_v47 = vrot.slane %v2507_v61, 2  ;;  %v7745_v34 = vld [vmem:[#allocation2 + $0x6] sm:$0x3] }
 0x8cf   :  { %v2517_v22 = vrot.slane %v2438_v56, 2  ;;  %v2519_v8 = vrot.slane %v2509_v45, 2  ;;  %v7749_v45 = vld [vmem:[#allocation2 + $0x4] sm:$0x3] }
 0x8d0   :  { %v2524_v37 = vadd.f32 %v2516_v16, %v7378_v29  ;;  %v2526_v62 = vadd.f32 %v2518_v47, %v7384_v48 }
 0x8d1   :  { %v2525_v24 = vadd.f32 %v2517_v22, %v7380_v33  ;;  %v2527_v60 = vadd.f32 %v2519_v8, %v7388_v63  ;;  %v6463_v22 = vmov 1934713408   ;;  %v7758_v8 = vld [vmem:[#allocation2 + $0x2] sm:$0x3] }
 0x8d2   :  { %v5235_v39 = vmul.f32 -1.442695, %v2524_v37  ;;  %v2928_v37 = vunpack.c.l.s4 %v6463_v22 }
 0x8d3   :  { %v5236_v40 = vmul.f32 -1.442695, %v2525_v24  ;;  %v5237_v13 = vmul.f32 -1.442695, %v2527_v60  ;;  %v2613_v24 = vsel %vm2610_vm14, %v7749_v45, %v2591_v2  ;;  %v2669_v2 = vld [vmem:[%s8363_s6 + $0x8] sm:$0xff] }
 0x8d4   :  { %6346 = vpow2.f32 %v5235_v39 }
 0x8d5   :  { %6348 = vpow2.f32 %v5236_v40  ;;  %v7756_v40 = vsub.s32 %v2688_v28, %v7367_v6  ;;  %v6081_v28 = vpack.c.bf16 %v2669_v2, %v2668_v17 }
 0x8d6   :  { %6350 = vpow2.f32 %v5237_v13  ;;  %v7762_v13 = vld [vmem:[#allocation2 + $0x8] sm:$0x3] }
 0x8d7   :  { %6352 = vtanh.f32 %v2526_v62  ;;  %v7764_v62 = vld [vmem:[#allocation2] sm:$0x3]  ;;  %6082 = vmatprep.subr.bf16.mxu0 %v6081_v28 }
 0x8de   :  { %v6347_v58 = vpop.eup %6346 }
 0x8df   :  { %v6349_v53 = vpop.eup %6348  ;;  %v2531_v57 = vadd.f32 1.0, %v6347_v58 }
 0x8e0   :  { %v2537_v30 = vadd.f32 1.0, %v6349_v53  ;;  %v6351_v29 = vpop.eup %6350 }
 0x8e1   :  { %6354 = vrcp.f32 %v2531_v57  ;;  %v6353_v33 = vpop.eup %6352  ;;  %v2544_v0 = vadd.f32 1.0, %v6351_v29  ;;  %v7768_v57 = vld [vmem:[#allocation2 + $0xa] sm:$0x3] }
 0x8e2   :  { %6356 = vrcp.f32 %v2537_v30 }
 0x8e3   :  { %6358 = vrcp.f32 %v2544_v0 }
 0x8eb   :  { %v6355_v38 = vpop.eup %6354 }
 0x8ec   :  { %v6357_v51 = vpop.eup %6356  ;;  %v2551_v54 = vmul.f32 %v6355_v38, %v6353_v33 }
 0x8ed   :  { %v2550_v63 = vmul.f32 %v6357_v51, %v2548_v15  ;;  %v6359_v48 = vpop.eup %6358 }
 0x8ef   :  { %v2552_v1 = vadd.f32 %v2551_v54, %v2550_v63  ;;  %v2929_v54 = vunpack.c.0.s8 %v2928_v37 }
 0x8f1   :  { %6360 = vtanh.f32 %v2552_v1  ;;  %v7785_v12 = vsub.s32 %v2929_v54, %v7367_v6 }
 0x8fb   :  { %v6361_v11 = vpop.eup %6360 }
 0x8fc   :  { %v2554_v21 = vmul.f32 %v6361_v11, %v6359_v48 }
 0x8fe   :  { %2558 = vrot.lane.b32.xlu1 %v2554_v21, %s6460_s3  ;;  %2556 = vst.msk [vmem:[#allocation2 + $0x8] sm:$0xc0] %vm1789_vm13, %v2554_v21 }
 0x902   :  { %1792 = vrot.lane.b32.xlu1 %v7540_v46, %s6460_s3  ;;  %v7705_v46 = vld [vmem:[#allocation3 + $0xa] sm:$0x3]  ;;  %s6477_s3 = smov [#allocation4]  }
 0x903   :  { %s5082_s20 = sshll.u32 %s6477_s3, 4  ;;  %s5083_s20 = int_to_ptr.vmem [resolvable:$true] %s5082_s20 }
 0x904   :  { %p6439_p1 = scmp.lt.s32.totalorder %s5083_s20, %s5083_s20 }
 0x905   :  { %v7753_v39 = vld [vmem:[#allocation2 + $0xe] sm:$0x3] }
 0x906   :  { %2588 = vrot.lane.b32.xlu1 %v7691_v27, %s6461_s1 }
 0x90a   :  { %2592 = vrot.lane.b32.xlu1 %v7701_v42, %s6461_s1 }
 0x90e   :  { %2596 = vrot.lane.b32.xlu1 %v7705_v46, %s6461_s1 }
 0x912   :  { %2600 = vrot.lane.b32.xlu1 %v7709_v55, %s6461_s1 }
 0x970   :  { %v2559_v3 = vpop.permute.xlu1 %2558 }
 0x971   :  { %2561 = vst.msk [vmem:[#allocation3 - $0x6] sm:$0xc0] %vm1789_vm13, %v2559_v3 }
 0x974   :  { %v1793_v14 = vpop.permute.xlu1 %1792 }
 0x975   :  { %1796 = vst.msk [vmem:[#allocation3 + $0x2] sm:$0xc0] %vm1789_vm13, %v1793_v14 }
 0x978   :  { %v7737_v44 = vld [vmem:[#allocation3] sm:$0x3]  ;;  %v2589_v52 = vpop.permute.xlu1 %2588 }
 0x979   :  { %v2612_v53 = vsel %vm2610_vm14, %v7758_v8, %v2589_v52 }
 0x97c   :  { %v7733_v43 = vld [vmem:[#allocation3 + $0x8] sm:$0x3]  ;;  %v2593_v59 = vpop.permute.xlu1 %2592 }
 0x97d   :  { %2594 = vrot.lane.b32.xlu0 %v7733_v43, %s6461_s1  ;;  %v2614_v16 = vsel %vm2610_vm14, %v7745_v34, %v2593_v59 }
 0x97e   :  { %v2685_v60 = vcombine.low %v2613_v24, %v2614_v16  ;;  %v3351_v33 = vcombine.low %v2612_v53, %v2614_v16 }
 0x980   :  { %v2597_v23 = vpop.permute.xlu1 %2596  ;;  %v2699_v63 = vrot.slane %v2685_v60, %v7756_v40  ;;  %v3358_v49 = vrot.slane %v3351_v33, %v7756_v40 }
 0x981   :  { %2586 = vrot.lane.b32.xlu0 %v7737_v44, %s6461_s1  ;;  %v2616_v38 = vsel %vm2610_vm14, %v7768_v57, %v2597_v23 }
 0x984   :  { %v2601_v56 = vpop.permute.xlu1 %2600 }
 0x985   :  { %2598 = vrot.lane.b32.xlu0 %v7741_v50, %s6461_s1  ;;  %v2618_v47 = vsel %vm2610_vm14, %v7753_v39, %v2601_v56 }
 0x986   :  { %v3367_v0 = vcombine.low %v2616_v38, %v2618_v47 }
 0x988   :  { %v3374_v14 = vrot.slane %v3367_v0, %v7756_v40 }
 0x9ef   :  { %v2595_v61 = vpop.permute.xlu0 %2594 }
 0x9f0   :  { %v2615_v30 = vsel %vm2610_vm14, %v7762_v13, %v2595_v61  ;;  %v5238_v61 = vld [vmem:[%s8362_s5] ss:$0 sm:$0xff]  ;;  %s6464_s5 = smov 96  }
 0x9f1   :  { %v2701_v1 = vcombine.low %v2615_v30, %v2616_v38 }
 0x9f3   :  { %v2587_v58 = vpop.permute.xlu0 %2586  ;;  %v2709_v19 = vrot.slane %v2701_v1, %v7756_v40 }
 0x9f4   :  { %v2611_v29 = vsel %vm2610_vm14, %v7764_v62, %v2587_v58 }
 0x9f5   :  { %v2684_v15 = vcombine.low %v2611_v29, %v2612_v53  ;;  %v3343_v51 = vcombine.low %v2611_v29, %v2613_v24 }
 0x9f7   :  { %v2692_v48 = vrot.slane %v2684_v15, %v7756_v40  ;;  %v3350_v11 = vrot.slane %v3343_v51, %v7756_v40  ;;  %v2599_v21 = vpop.permute.xlu0 %2598 }
 0x9f8   :  { %v2617_v41 = vsel %vm2610_vm14, %v7779_v31, %v2599_v21 }
 0x9f9   :  { %v2700_v3 = vcombine.low %v2692_v48, %v2699_v63  ;;  %v2702_v4 = vcombine.low %v2617_v41, %v2618_v47  ;;  %v3359_v5 = vcombine.low %v2615_v30, %v2617_v41  ;;  %v3375_v20 = vcombine.low %v3350_v11, %v3358_v49 }
 0x9fb   :  { %v2716_v25 = vrot.slane %v2702_v4, %v7756_v40  ;;  %v3366_v26 = vrot.slane %v3359_v5, %v7756_v40  ;;  %5347 = vmatprep.mubr.msk.f32.mxu0 %vm2718_vm15, %v2700_v3  ;;  %v7793_v52 = vrot.slane %v3375_v20, %v7785_v12 }
 0x9fd   :  { %v2717_v35 = vcombine.low %v2709_v19, %v2716_v25  ;;  %v3383_v36 = vcombine.low %v3366_v26, %v3374_v14 }
 0x9ff   :  { %v7796_v59 = vrot.slane %v3383_v36, %v7785_v12  ;;  %5348 = vmatmul.mubr.msk.f32.vlgmr.msra.gmra.mrb[20].mxu0 %vm2718_vm15, %v2717_v35 }
 0xa00   :  { %6084 = vmatpush3.bf16.msra.mxu0 %v6081_v28 }
 0xa01   :  { %v3391_v23 = vcombine.low %v7793_v52, %v7796_v59  ;;  %v3392_v7 = vcombine.high %v7793_v52, %v7796_v59  ;;  %v3545_v59 = vld [vmem:[%s8364_s7 + $0x30] sm:$0xff] }
 0xa03   :  { %5358 = vmatpush3.msra.mxu1 %v3391_v23 }
 0xa04   :  { %5362 = vmatprep.subr.mxu1 %v6459_v9 }
 0xad2   :  { %v5349_v16 = vpop.f32.mrb[20].mxu0 }
 0xad3   :  { %v2795_v56 = vadd.f32 %v5349_v16, %v5238_v61  ;;  %v2789_v22 = vpop.f32.mrb[21].mxu0 }
 0xad4   :  { %v2790_v37 = vadd.f32 %v5238_v61, %v2789_v22  ;;  %v6465_v61 = vmov 269488144  }
 0xad5   :  { %v3016_v16 = vunpack.c.l.s4 %v6465_v61 }
 0xad6   :  { %6362 = vtanh.f32 %v2790_v37  ;;  %v6467_v37 = vmov 1414812756  }
 0xad7   :  { %6364 = vtanh.f32 %v2795_v56  ;;  %v6466_v56 = vmov 842150450  }
 0xad8   :  { %v3023_v22 = vunpack.c.l.s4 %v6466_v56 }
 0xae0   :  { %v6363_v24 = vpop.eup %6362 }
 0xae1   :  { %v6365_v60 = vpop.eup %6364  ;;  %5354 = vmatprep.mubr.msk.f32.mxu0 %vm2800_vm0, %v6363_v24  ;;  %v3030_v24 = vunpack.c.l.s4 %v6467_v37 }
 0xae2   :  { %5355 = vmatmul.mubr.msk.f32.vlgmr.msra.gmra.mrb[22].mxu0 %vm2800_vm0, %v6365_v60  ;;  %v6468_v60 = vmov 1987475062  }
 0xbb5   :  { %v5356_v47 = vpop.f32.mrb[22].mxu0 }
 0xbb6   :  { %v2901_v58 = vcombine.high %v5356_v47, %v5356_v47  ;;  %v2908_v53 = vrot.slane %v5356_v47, %v7756_v40  ;;  %v2873_v30 = vpop.f32.mrb[23].mxu0  ;;  %v3017_v47 = vunpack.c.0.s8 %v3016_v16 }
 0xbb7   :  { %v2884_v29 = vcombine.high %v2873_v30, %v2873_v30  ;;  %v2891_v33 = vrot.slane %v2873_v30, %v7756_v40 }
 0xbb8   :  { %v2915_v38 = vrot.slane %v2901_v58, %v7756_v40  ;;  %v2916_v15 = vcombine.high %v2908_v53, %v2908_v53  ;;  %v3024_v58 = vunpack.c.0.s8 %v3023_v22 }
 0xbb9   :  { %v2898_v51 = vrot.slane %v2884_v29, %v7756_v40  ;;  %v2899_v54 = vcombine.high %v2891_v33, %v2891_v33 }
 0xbba   :  { %v2917_v0 = vcombine.high %v2915_v38, %v2915_v38  ;;  %v2944_v63 = vcombine.low %v2908_v53, %v2916_v15 }
 0xbbb   :  { %v2900_v1 = vcombine.high %v2898_v51, %v2898_v51  ;;  %v2926_v48 = vcombine.low %v2891_v33, %v2899_v54 }
 0xbbc   :  { %v2953_v11 = vcombine.low %v2915_v38, %v2917_v0  ;;  %v7820_v41 = vrot.slane %v2944_v63, %v7785_v12 }
 0xbbd   :  { %v2935_v21 = vcombine.low %v2898_v51, %v2900_v1  ;;  %v2933_v3 = vrot.slane %v2926_v48, %v7785_v12 }
 0xbbe   :  { %v7823_v49 = vrot.slane %v2953_v11, %v7785_v12  ;;  %v2952_v33 = vcombine.high %v7820_v41, %v6459_v9 }
 0xbbf   :  { %v2942_v4 = vrot.slane %v2935_v21, %v7785_v12  ;;  %v2934_v29 = vcombine.high %v2933_v3, %v6459_v9 }
 0xbc0   :  { %v5244_v5 = vcombine.high %v7820_v41, %v7823_v49  ;;  %v2971_v14 = vcombine.low %v7820_v41, %v7823_v49  ;;  %v2961_v38 = vcombine.high %v7823_v49, %v6459_v9 }
 0xbc1   :  { %v5243_v19 = vcombine.high %v2933_v3, %v2942_v4  ;;  %v2970_v20 = vcombine.low %v2933_v3, %v2942_v4  ;;  %v2943_v51 = vcombine.high %v2942_v4, %v6459_v9 }
 0xbc2   :  { %v3002_v25 = vrot.slane %v5244_v5, %v7756_v40  ;;  %v2985_v26 = vrot.slane %v2971_v14, %v7756_v40 }
 0xbc3   :  { %v2995_v35 = vrot.slane %v5243_v19, %v7756_v40  ;;  %v2978_v36 = vrot.slane %v2970_v20, %v7756_v40 }
 0xbc5   :  { %v3003_v23 = vcombine.low %v2995_v35, %v3002_v25  ;;  %v2986_v17 = vcombine.low %v2978_v36, %v2985_v26 }
 0xbc7   :  { %v3010_v2 = vsel %vm3006_vm1, %v3003_v23, -inf  ;;  %v3007_v28 = vsel %vm3006_vm1, %v2986_v17, -inf }
 0xbc8   :  { %3011 = vmax.xlane.f32.xlu1 %v3010_v2  ;;  %3008 = vmax.xlane.f32.xlu0 %v3007_v28 }
 0xbd9   :  { %2627 = vrot.lane.b32.xlu1 %v7764_v62, %s6464_s5  ;;  %v3037_v62 = vunpack.c.l.s4 %v6468_v60 }
 0xbdb   :  { %v3038_v53 = vunpack.c.0.s8 %v3037_v62 }
 0xbdd   :  { %2631 = vrot.lane.b32.xlu1 %v7749_v45, %s6464_s5  ;;  %v3031_v45 = vunpack.c.0.s8 %v3030_v24  ;;  %v7857_v30 = vsub.s32 %v3038_v53, %v7367_v6 }
 0xbe1   :  { %2633 = vrot.lane.b32.xlu1 %v7745_v34, %s6464_s5  ;;  %v7848_v34 = vsub.s32 %v3017_v47, %v7367_v6 }
 0xbe5   :  { %2637 = vrot.lane.b32.xlu1 %v7768_v57, %s6464_s5  ;;  %v7851_v57 = vsub.s32 %v3024_v58, %v7367_v6 }
 0xbe9   :  { %2641 = vrot.lane.b32.xlu1 %v7753_v39, %s6464_s5  ;;  %v7854_v39 = vsub.s32 %v3031_v45, %v7367_v6  ;;  %v4988_v6 = vld [vmem:[%s8373_s16 + $0x50] sm:$0xf] }
 0xc55   :  { %v3012_v15 = vpop.xlane.xlu1 %3011  ;;  %v3009_v54 = vpop.xlane.xlu0 %3008 }
 0xc56   :  { %v3049_v0 = vrot.slane %v3012_v15, %v7848_v34  ;;  %v3056_v63 = vrot.slane %v3012_v15, %v7851_v57  ;;  %v3063_v1 = vrot.slane %v3012_v15, %v7854_v39  ;;  %v3070_v48 = vrot.slane %v3012_v15, %v7857_v30 }
 0xc57   :  { %v3021_v11 = vrot.slane %v3009_v54, %v7848_v34  ;;  %v3028_v21 = vrot.slane %v3009_v54, %v7851_v57  ;;  %v3035_v5 = vrot.slane %v3009_v54, %v7854_v39  ;;  %v3042_v14 = vrot.slane %v3009_v54, %v7857_v30 }
 0xc58   :  { %v3083_v19 = vsub.f32 %v2934_v29, %v3049_v0  ;;  %v3084_v20 = vsub.f32 %v2943_v51, %v3056_v63  ;;  %v3085_v25 = vsub.f32 %v2952_v33, %v3063_v1  ;;  %v3086_v26 = vsub.f32 %v2961_v38, %v3070_v48 }
 0xc59   :  { %v3079_v35 = vsub.f32 %v2933_v3, %v3021_v11  ;;  %v3080_v36 = vsub.f32 %v2942_v4, %v3028_v21  ;;  %v3081_v28 = vsub.f32 %v7820_v41, %v3035_v5  ;;  %v3082_v16 = vsub.f32 %v7823_v49, %v3042_v14  ;;  %v2628_v11 = vpop.permute.xlu1 %2627 }
 0xc5a   :  { %v3095_v23 = vmul.f32 1.442695, %v3083_v19  ;;  %v3097_v17 = vmul.f32 1.442695, %v3084_v20  ;;  %v3099_v2 = vmul.f32 1.442695, %v3085_v25 }
 0xc5b   :  { %v3101_v61 = vmul.f32 1.442695, %v3086_v26  ;;  %v3087_v56 = vmul.f32 1.442695, %v3079_v35  ;;  %v3089_v22 = vmul.f32 1.442695, %v3080_v36 }
 0xc5c   :  { %6366 = vpow2.f32 %v3095_v23  ;;  %v3091_v37 = vmul.f32 1.442695, %v3081_v28  ;;  %v3093_v24 = vmul.f32 1.442695, %v3082_v16 }
 0xc5d   :  { %6368 = vpow2.f32 %v3097_v17  ;;  %v2632_v21 = vpop.permute.xlu1 %2631 }
 0xc5e   :  { %6370 = vpow2.f32 %v3099_v2  ;;  %v7924_v2 = vsel %vm2610_vm14, %v2628_v11, %v7737_v44 }
 0xc5f   :  { %6372 = vpow2.f32 %v3101_v61 }
 0xc60   :  { %6374 = vpow2.f32 %v3087_v56 }
 0xc61   :  { %6376 = vpow2.f32 %v3089_v22  ;;  %v2634_v5 = vpop.permute.xlu1 %2633 }
 0xc62   :  { %6378 = vpow2.f32 %v3091_v37  ;;  %v7930_v61 = vsel %vm2610_vm14, %v2634_v5, %v7701_v42 }
 0xc63   :  { %6380 = vpow2.f32 %v3093_v24 }
 0xc66   :  { %v7875_v3 = vpop.eup %6366 }
 0xc67   :  { %v7877_v4 = vpop.eup %6368 }
 0xc68   :  { %v7879_v41 = vpop.eup %6370  ;;  %v3128_v45 = vcombine.low %v7875_v3, %v7877_v4 }
 0xc69   :  { %v7881_v60 = vpop.eup %6372 }
 0xc6a   :  { %v6375_v49 = vpop.eup %6374  ;;  %v3129_v53 = vcombine.low %v7879_v41, %v7881_v60  ;;  %v3136_v51 = vrot.slane %v3128_v45, %v7756_v40 }
 0xc6b   :  { %v7883_v62 = vpop.eup %6376 }
 0xc6c   :  { %v7885_v47 = vpop.eup %6378  ;;  %v3111_v58 = vcombine.low %v6375_v49, %v7883_v62  ;;  %v3143_v54 = vrot.slane %v3129_v53, %v7756_v40 }
 0xc6d   :  { %v7892_v29 = vpop.eup %6380 }
 0xc6e   :  { %v3112_v33 = vcombine.low %v7885_v47, %v7892_v29  ;;  %v3119_v38 = vrot.slane %v3111_v58, %v7756_v40  ;;  %v3144_v1 = vcombine.low %v3136_v51, %v3143_v54 }
 0xc70   :  { %v3126_v15 = vrot.slane %v3112_v33, %v7756_v40  ;;  %v3150_v48 = vsel %vm3006_vm1, %v3144_v1, 0.0 }
 0xc72   :  { %v3127_v0 = vcombine.low %v3119_v38, %v3126_v15 }
 0xc74   :  { %v3147_v63 = vsel %vm3006_vm1, %v3127_v0, 0.0 }
 0xc75   :  { %3148 = vadd.xlane.f32.xlu0 %v3147_v63 }
 0xc79   :  { %3151 = vadd.xlane.f32.xlu0 %v3150_v48 }
 0xc8f   :  { %2629 = vrot.lane.b32.xlu0 %v7758_v8, %s6464_s5 }
 0xc93   :  { %2635 = vrot.lane.b32.xlu0 %v7762_v13, %s6464_s5  ;;  %v7916_v13 = vsel %vm2610_vm14, %v2632_v21, %v7677_v32 }
 0xc94   :  { %v4220_v32 = vcombine.low %v7924_v2, %v7916_v13 }
 0xc96   :  { %v4227_v44 = vrot.slane %v4220_v32, %v7756_v40 }
 0xc97   :  { %2639 = vrot.lane.b32.xlu0 %v7779_v31, %s6464_s5  ;;  %v2638_v31 = vpop.permute.xlu1 %2637 }
 0xc9b   :  { %v2642_v56 = vpop.permute.xlu1 %2641 }
 0xc9c   :  { %v7939_v45 = vsel %vm2610_vm14, %v2642_v56, %v7709_v55  ;;  %v3539_v56 = vld [vmem:[%s8364_s7] sm:$0xff] }
 0xd02   :  { %v3149_v14 = vpop.xlane.xlu0 %3148 }
 0xd03   :  { %v3161_v19 = vrot.slane %v3149_v14, %v7848_v34  ;;  %v3168_v20 = vrot.slane %v3149_v14, %v7851_v57  ;;  %v3175_v8 = vrot.slane %v3149_v14, %v7854_v39  ;;  %v3182_v25 = vrot.slane %v3149_v14, %v7857_v30 }
 0xd05   :  { %6382 = vrcp.f32 %v3161_v19 }
 0xd06   :  { %6384 = vrcp.f32 %v3168_v20  ;;  %v3152_v26 = vpop.xlane.xlu0 %3151 }
 0xd07   :  { %6386 = vrcp.f32 %v3175_v8  ;;  %v3189_v35 = vrot.slane %v3152_v26, %v7848_v34  ;;  %v3196_v36 = vrot.slane %v3152_v26, %v7851_v57  ;;  %v3203_v23 = vrot.slane %v3152_v26, %v7854_v39 }
 0xd08   :  { %6388 = vrcp.f32 %v3182_v25  ;;  %v3210_v17 = vrot.slane %v3152_v26, %v7857_v30 }
 0xd09   :  { %6390 = vrcp.f32 %v3189_v35 }
 0xd0a   :  { %6392 = vrcp.f32 %v3196_v36  ;;  %v2630_v28 = vpop.permute.xlu0 %2629 }
 0xd0b   :  { %6394 = vrcp.f32 %v3203_v23  ;;  %v2652_v16 = vsel %vm2610_vm14, %v2630_v28, %v7691_v27  ;;  %v7943_v27 = vsel %vm2610_vm14, %v2638_v31, %v7705_v46 }
 0xd0c   :  { %6396 = vrcp.f32 %v3210_v17  ;;  %v4228_v22 = vcombine.low %v2652_v16, %v7930_v61  ;;  %v4244_v54 = vcombine.low %v7943_v27, %v7939_v45  ;;  %v3564_v28 = vcombine.low %v7924_v2, %v2652_v16  ;;  %v3542_v2 = vld [vmem:[%s8364_s7 + $0x18] sm:$0xff] }
 0xd0e   :  { %v4235_v37 = vrot.slane %v4228_v22, %v7756_v40  ;;  %v2636_v24 = vpop.permute.xlu0 %2635  ;;  %v3540_v22 = vld [vmem:[%s8364_s7 + $0x8] sm:$0xff] }
 0xd0f   :  { %v6383_v58 = vpop.eup %6382  ;;  %v7951_v55 = vsel %vm2610_vm14, %v2636_v24, %v7733_v43  ;;  %v4251_v43 = vrot.slane %v4244_v54, %v7756_v40  ;;  %v3572_v24 = vrot.slane %v3564_v28, %v7756_v40 }
 0xd10   :  { %v6385_v42 = vpop.eup %6384  ;;  %v4252_v53 = vcombine.low %v4227_v44, %v4235_v37  ;;  %v3220_v33 = vmul.f32 %v6383_v58, %v6375_v49  ;;  %v3565_v44 = vcombine.low %v7916_v13, %v7930_v61  ;;  %v6085_v37 = vpack.c.bf16 %v3540_v22, %v3539_v56 }
 0xd11   :  { %v6387_v38 = vpop.eup %6386  ;;  %v3222_v15 = vmul.f32 %v6385_v42, %v7883_v62  ;;  %v3541_v42 = vld [vmem:[%s8364_s7 + $0x10] sm:$0xff]  ;;  %v3581_v54 = vcombine.low %v7951_v55, %v7943_v27  ;;  %v3549_v27 = vld [vmem:[%s8366_s9 + $0x8] sm:$0xff] }
 0xd12   :  { %v6389_v51 = vpop.eup %6388  ;;  %v2640_v0 = vpop.permute.xlu0 %2639  ;;  %v3224_v63 = vmul.f32 %v6387_v38, %v7885_v47  ;;  %v7967_v23 = vrot.slane %v4252_v53, %v7785_v12  ;;  %v3579_v16 = vrot.slane %v3565_v44, %v7756_v40  ;;  %v6089_v13 = vpack.c.bf16 %v3542_v2, %v3541_v42  ;;  %v3544_v38 = vld [vmem:[%s8364_s7 + $0x28] sm:$0xff] }
 0xd13   :  { %v6391_v1 = vpop.eup %6390  ;;  %v2657_v49 = vsel %vm2610_vm14, %v2640_v0, %v7741_v50  ;;  %v3226_v46 = vmul.f32 %v6389_v51, %v7892_v29  ;;  %v3243_v48 = vcombine.low %v3220_v33, %v3222_v15  ;;  %v3543_v33 = vld [vmem:[%s8364_s7 + $0x20] sm:$0xff] }
 0xd14   :  { %v6393_v11 = vpop.eup %6392  ;;  %v4236_v62 = vcombine.low %v7951_v55, %v2657_v49  ;;  %v3228_v21 = vmul.f32 %v6391_v1, %v7875_v3  ;;  %v3580_v61 = vcombine.low %v3572_v24, %v3579_v16  ;;  %v6093_v52 = vpack.c.bf16 %v3544_v38, %v3543_v33 }
 0xd15   :  { %v6395_v5 = vpop.eup %6394  ;;  %v3244_v14 = vcombine.low %v3224_v63, %v3226_v46  ;;  %v3251_v47 = vrot.slane %v3243_v48, %v7756_v40  ;;  %v3230_v19 = vmul.f32 %v6393_v11, %v7877_v4  ;;  %v3582_v15 = vcombine.low %v2657_v49, %v7939_v45  ;;  %v3548_v45 = vld [vmem:[%s8366_s9] sm:$0xff]  ;;  %s6476_s9 = smov 48  }
 0xd16   :  { %v6397_v20 = vpop.eup %6396  ;;  %v4243_v8 = vrot.slane %v4236_v62, %v7756_v40  ;;  %v3232_v50 = vmul.f32 %v6395_v5, %v7879_v41  ;;  %v3589_v63 = vrot.slane %v3581_v54, %v7756_v40  ;;  %v6101_v55 = vpack.c.bf16 %v3549_v27, %v3548_v45  ;;  %v5247_v62 = vld [vmem:[%s8365_s8] ss:$0 sm:$0xff]  ;;  %s6475_s8 = smov 56  }
 0xd17   :  { %v3258_v29 = vrot.slane %v3244_v14, %v7756_v40  ;;  %v3234_v25 = vmul.f32 %v6397_v20, %v7881_v60  ;;  %v3260_v31 = vcombine.low %v3228_v21, %v3230_v19  ;;  %v3596_v0 = vrot.slane %v3582_v15, %v7756_v40 }
 0xd18   :  { %v4260_v26 = vcombine.low %v4243_v8, %v4251_v43  ;;  %6102 = vmatprep.subr.bf16.mxu0 %v6101_v55 }
 0xd19   :  { %v3259_v3 = vcombine.low %v3251_v47, %v3258_v29  ;;  %v3261_v35 = vcombine.low %v3232_v50, %v3234_v25  ;;  %v3268_v36 = vrot.slane %v3260_v31, %v7756_v40  ;;  %v3597_v1 = vcombine.low %v3589_v63, %v3596_v0  ;;  %6104 = vmatpush3.bf16.msra.mxu0 %v6101_v55 }
 0xd1a   :  { %v7970_v4 = vrot.slane %v4260_v26, %v7785_v12  ;;  %5393 = vmatprep.subr.mxu0 %v6459_v9 }
 0xd1b   :  { %3279 = vxpose.xlu0.b32.start.end [1/1] (short) (narrow) %v3259_v3, 8  ;;  %v3275_v17 = vrot.slane %v3261_v35, %v7756_v40 }
 0xd1c   :  { %v4268_v41 = vcombine.low %v7967_v23, %v7970_v4  ;;  %v4269_v60 = vcombine.high %v7967_v23, %v7970_v4  ;;  %v4422_v4 = vld [vmem:[%s8367_s10 + $0x30] sm:$0xff] }
 0xd1d   :  { %v3276_v32 = vcombine.low %v3268_v36, %v3275_v17 }
 0xd1f   :  { %3311 = vxpose.xlu1.b32.start.end [1/1] (short) (narrow) %v3276_v32, 8 }
 0xd9b   :  { %v3295_v58 = vpop.trf.xlu0 }
 0xd9c   :  { %5360 = vmatmul.mubr.msk.f32.vlgmr.msra.gmra.mrb[24].mxu1 %vm3006_vm1, %v3295_v58 }
 0xd9d   :  { %5363 = vmatpush3.msra.mxu1 %v3392_v7  ;;  %5364 = vmatprep.mubr.msk.f32.mxu1 %vm6469_vm2, %v6459_v9  ;;  %v3546_v7 = vld [vmem:[%s8364_s7 + $0x38] sm:$0xff] }
 0xd9e   :  { %6086 = vmatprep.subr.bf16.mxu1 %v6085_v37  ;;  %v6097_v51 = vpack.c.bf16 %v3546_v7, %v3545_v59 }
 0xd9f   :  { %v3327_v53 = vpop.trf.xlu1 }
 0xda0   :  { %5365 = vmatmul.mubr.msk.f32.vlgmr.msra.gmra.mrb[26].mxu1 %vm3006_vm1, %v3327_v53 }
 0xda1   :  { %6088 = vmatpush3.bf16.msra.mxu1 %v6085_v37  ;;  %5383 = vmatprep.mubr.msk.f32.mxu1 %vm2718_vm15, %v3580_v61 }
 0xda2   :  { %6090 = vmatprep.subr.bf16.mxu1 %v6089_v13 }
 0xda5   :  { %6092 = vmatpush3.bf16.msra.mxu1 %v6089_v13 }
 0xda6   :  { %6094 = vmatprep.subr.bf16.mxu1 %v6093_v52 }
 0xda9   :  { %6096 = vmatpush3.bf16.msra.mxu1 %v6093_v52 }
 0xdaa   :  { %6098 = vmatprep.subr.bf16.mxu1 %v6097_v51 }
 0xdad   :  { %6100 = vmatpush3.bf16.msra.mxu1 %v6097_v51 }
 0xdae   :  { %5422 = vmatprep.subr.mxu1 %v6459_v9 }
 0xdb0   :  { %5384 = vmatmul.mubr.msk.f32.vlgmr.msra.gmra.mrb[28].mxu1 %vm2718_vm15, %v3597_v1 }
 0xdb1   :  { %5424 = vmatprep.mubr.msk.f32.mxu1 %vm6469_vm2, %v6459_v9 }
 0xe6f   :  { %v8030_v49 = vpop.f32.mrb[24].mxu1 }
 0xe70   :  { %v5361_v46 = vpop.f32.mrb[25].mxu1 }
 0xe73   :  { %v8032_v48 = vpop.f32.mrb[26].mxu1 }
 0xe74   :  { %v5366_v11 = vpop.f32.mrb[27].mxu1 }
 0xe83   :  { %v5385_v21 = vpop.f32.mrb[28].mxu1 }
 0xe84   :  { %v3674_v5 = vadd.f32 %v5385_v21, %v5247_v62  ;;  %v3668_v14 = vpop.f32.mrb[29].mxu1 }
 0xe85   :  { %v3669_v47 = vadd.f32 %v5247_v62, %v3668_v14 }
 0xe87   :  { %6398 = vtanh.f32 %v3669_v47 }
 0xe88   :  { %6400 = vtanh.f32 %v3674_v5 }
 0xe91   :  { %v6399_v19 = vpop.eup %6398 }
 0xe92   :  { %v6401_v20 = vpop.eup %6400  ;;  %5390 = vmatprep.mubr.msk.f32.mxu0 %vm2800_vm0, %v6399_v19 }
 0xe93   :  { %5391 = vmatmul.mubr.msk.f32.vlgmr.msra.gmra.mrb[24].mxu0 %vm2800_vm0, %v6401_v20 }
 0xe94   :  { %5394 = vmatpush3.msra.mxu0 %v4268_v41  ;;  %5395 = vmatprep.mubr.msk.f32.mxu0 %vm6469_vm2, %v6459_v9 }
 0xe95   :  { %5398 = vmatprep.subr.mxu0 %v6459_v9 }
 0xf66   :  { %v5392_v43 = vpop.f32.mrb[24].mxu0 }
 0xf67   :  { %v3779_v8 = vcombine.high %v5392_v43, %v5392_v43  ;;  %v3786_v50 = vrot.slane %v5392_v43, %v7756_v40  ;;  %v3751_v29 = vpop.f32.mrb[25].mxu0 }
 0xf68   :  { %v3762_v25 = vcombine.high %v3751_v29, %v3751_v29  ;;  %v3769_v31 = vrot.slane %v3751_v29, %v7756_v40 }
 0xf69   :  { %v3793_v26 = vrot.slane %v3779_v8, %v7756_v40  ;;  %v3794_v3 = vcombine.high %v3786_v50, %v3786_v50 }
 0xf6a   :  { %v3776_v35 = vrot.slane %v3762_v25, %v7756_v40  ;;  %v3777_v36 = vcombine.high %v3769_v31, %v3769_v31 }
 0xf6b   :  { %v3795_v17 = vcombine.high %v3793_v26, %v3793_v26  ;;  %v3822_v41 = vcombine.low %v3786_v50, %v3794_v3 }
 0xf6c   :  { %v3778_v32 = vcombine.high %v3776_v35, %v3776_v35  ;;  %v3804_v28 = vcombine.low %v3769_v31, %v3777_v36 }
 0xf6d   :  { %v3831_v56 = vcombine.low %v3793_v26, %v3795_v17  ;;  %v3829_v44 = vrot.slane %v3822_v41, %v7785_v12 }
 0xf6e   :  { %v3813_v22 = vcombine.low %v3776_v35, %v3778_v32  ;;  %v3811_v24 = vrot.slane %v3804_v28, %v7785_v12 }
 0xf6f   :  { %v3838_v37 = vrot.slane %v3831_v56, %v7785_v12  ;;  %v3830_v54 = vcombine.high %v3829_v44, %v6459_v9 }
 0xf70   :  { %v3820_v58 = vrot.slane %v3813_v22, %v7785_v12  ;;  %v3812_v51 = vcombine.high %v3811_v24, %v6459_v9 }
 0xf71   :  { %v5253_v42 = vcombine.high %v3829_v44, %v3838_v37  ;;  %v3849_v2 = vcombine.low %v3829_v44, %v3838_v37  ;;  %v3839_v0 = vcombine.high %v3838_v37, %v6459_v9 }
 0xf72   :  { %v5252_v16 = vcombine.high %v3811_v24, %v3820_v58  ;;  %v3848_v13 = vcombine.low %v3811_v24, %v3820_v58  ;;  %v3821_v1 = vcombine.high %v3820_v58, %v6459_v9 }
 0xf73   :  { %v3880_v61 = vrot.slane %v5253_v42, %v7756_v40  ;;  %v3863_v53 = vrot.slane %v3849_v2, %v7756_v40 }
 0xf74   :  { %v3873_v33 = vrot.slane %v5252_v16, %v7756_v40  ;;  %v3856_v38 = vrot.slane %v3848_v13, %v7756_v40 }
 0xf76   :  { %v3881_v52 = vcombine.low %v3873_v33, %v3880_v61  ;;  %v3864_v59 = vcombine.low %v3856_v38, %v3863_v53 }
 0xf78   :  { %v3887_v7 = vsel %vm3006_vm1, %v3881_v52, -inf  ;;  %v3884_v15 = vsel %vm3006_vm1, %v3864_v59, -inf }
 0xf79   :  { %3888 = vmax.xlane.f32.xlu1 %v3887_v7  ;;  %3885 = vmax.xlane.f32.xlu0 %v3884_v15 }
0x1006   :  { %v3889_v63 = vpop.xlane.xlu1 %3888  ;;  %v3886_v45 = vpop.xlane.xlu0 %3885 }
0x1007   :  { %v3926_v27 = vrot.slane %v3889_v63, %v7848_v34  ;;  %v3933_v55 = vrot.slane %v3889_v63, %v7851_v57  ;;  %v3940_v46 = vrot.slane %v3889_v63, %v7854_v39  ;;  %v3947_v11 = vrot.slane %v3889_v63, %v7857_v30 }
0x1008   :  { %v3898_v62 = vrot.slane %v3886_v45, %v7848_v34  ;;  %v3905_v21 = vrot.slane %v3886_v45, %v7851_v57  ;;  %v3912_v5 = vrot.slane %v3886_v45, %v7854_v39  ;;  %v3919_v14 = vrot.slane %v3886_v45, %v7857_v30 }
0x1009   :  { %v3960_v47 = vsub.f32 %v3812_v51, %v3926_v27  ;;  %v3961_v19 = vsub.f32 %v3821_v1, %v3933_v55  ;;  %v3962_v20 = vsub.f32 %v3830_v54, %v3940_v46  ;;  %v3963_v43 = vsub.f32 %v3839_v0, %v3947_v11 }
0x100a   :  { %v3956_v8 = vsub.f32 %v3811_v24, %v3898_v62  ;;  %v3957_v50 = vsub.f32 %v3820_v58, %v3905_v21  ;;  %v3958_v26 = vsub.f32 %v3829_v44, %v3912_v5  ;;  %v3959_v35 = vsub.f32 %v3838_v37, %v3919_v14 }
0x100b   :  { %v3972_v29 = vmul.f32 1.442695, %v3960_v47  ;;  %v3974_v25 = vmul.f32 1.442695, %v3961_v19  ;;  %v3976_v31 = vmul.f32 1.442695, %v3962_v20 }
0x100c   :  { %v3978_v3 = vmul.f32 1.442695, %v3963_v43  ;;  %v3964_v36 = vmul.f32 1.442695, %v3956_v8  ;;  %v3966_v17 = vmul.f32 1.442695, %v3957_v50 }
0x100d   :  { %6402 = vpow2.f32 %v3972_v29  ;;  %v3968_v41 = vmul.f32 1.442695, %v3958_v26  ;;  %v3970_v32 = vmul.f32 1.442695, %v3959_v35 }
0x100e   :  { %6404 = vpow2.f32 %v3974_v25 }
0x100f   :  { %6406 = vpow2.f32 %v3976_v31 }
0x1010   :  { %6408 = vpow2.f32 %v3978_v3 }
0x1011   :  { %6410 = vpow2.f32 %v3964_v36 }
0x1012   :  { %6412 = vpow2.f32 %v3966_v17 }
0x1013   :  { %6414 = vpow2.f32 %v3968_v41 }
0x1014   :  { %6416 = vpow2.f32 %v3970_v32 }
0x1017   :  { %v6403_v28 = vpop.eup %6402 }
0x1018   :  { %v6405_v56 = vpop.eup %6404 }
0x1019   :  { %v6407_v22 = vpop.eup %6406  ;;  %v4005_v2 = vcombine.low %v6403_v28, %v6405_v56 }
0x101a   :  { %v6409_v24 = vpop.eup %6408 }
0x101b   :  { %v6411_v58 = vpop.eup %6410  ;;  %v4006_v16 = vcombine.low %v6407_v22, %v6409_v24  ;;  %v4013_v38 = vrot.slane %v4005_v2, %v7756_v40  ;;  %v4419_v2 = vld [vmem:[%s8367_s10 + $0x18] sm:$0xff] }
0x101c   :  { %v6413_v44 = vpop.eup %6412 }
0x101d   :  { %v6415_v42 = vpop.eup %6414  ;;  %v3988_v37 = vcombine.low %v6411_v58, %v6413_v44  ;;  %v4020_v52 = vrot.slane %v4006_v16, %v7756_v40 }
0x101e   :  { %v6417_v13 = vpop.eup %6416 }
0x101f   :  { %v3989_v61 = vcombine.low %v6415_v42, %v6417_v13  ;;  %v3996_v53 = vrot.slane %v3988_v37, %v7756_v40  ;;  %v4021_v15 = vcombine.low %v4013_v38, %v4020_v52  ;;  %v4418_v37 = vld [vmem:[%s8367_s10 + $0x10] sm:$0xff] }
0x1020   :  { %v6109_v16 = vpack.c.bf16 %v4419_v2, %v4418_v37 }
0x1021   :  { %v4003_v33 = vrot.slane %v3989_v61, %v7756_v40  ;;  %v4027_v51 = vsel %vm3006_vm1, %v4021_v15, 0.0  ;;  %v4420_v61 = vld [vmem:[%s8367_s10 + $0x20] sm:$0xff] }
0x1022   :  { %v5256_v15 = vld [vmem:[%s8368_s11] ss:$0 sm:$0xff] }
0x1023   :  { %v4004_v59 = vcombine.low %v3996_v53, %v4003_v33  ;;  %v4421_v53 = vld [vmem:[%s8367_s10 + $0x28] sm:$0xff] }
0x1024   :  { %v6113_v23 = vpack.c.bf16 %v4421_v53, %v4420_v61  ;;  %v4875_v61 = vld [vmem:[%s8371_s14 + $0x10] sm:$0xff] }
0x1025   :  { %v4024_v7 = vsel %vm3006_vm1, %v4004_v59, 0.0 }
0x1026   :  { %4025 = vadd.xlane.f32.xlu0 %v4024_v7 }
0x102a   :  { %4028 = vadd.xlane.f32.xlu0 %v4027_v51 }
0x10b3   :  { %v4026_v54 = vpop.xlane.xlu0 %4025 }
0x10b4   :  { %v4038_v0 = vrot.slane %v4026_v54, %v7848_v34  ;;  %v4045_v63 = vrot.slane %v4026_v54, %v7851_v57  ;;  %v4052_v1 = vrot.slane %v4026_v54, %v7854_v39  ;;  %v4059_v45 = vrot.slane %v4026_v54, %v7857_v30 }
0x10b6   :  { %6418 = vrcp.f32 %v4038_v0 }
0x10b7   :  { %6420 = vrcp.f32 %v4045_v63  ;;  %v4029_v27 = vpop.xlane.xlu0 %4028 }
0x10b8   :  { %6422 = vrcp.f32 %v4052_v1  ;;  %v4066_v55 = vrot.slane %v4029_v27, %v7848_v34  ;;  %v4073_v46 = vrot.slane %v4029_v27, %v7851_v57  ;;  %v4080_v11 = vrot.slane %v4029_v27, %v7854_v39  ;;  %v4770_v1 = vld [vmem:[%s8369_s12 + $0x8] sm:$0xff] }
0x10b9   :  { %6424 = vrcp.f32 %v4059_v45  ;;  %v4087_v62 = vrot.slane %v4029_v27, %v7857_v30  ;;  %v4772_v45 = vld [vmem:[%s8369_s12 + $0x18] sm:$0xff] }
0x10ba   :  { %6426 = vrcp.f32 %v4066_v55  ;;  %v6121_v27 = vpack.c.bf16 %v4772_v45, %v4770_v1  ;;  %v4771_v55 = vld [vmem:[%s8369_s12 + $0x10] sm:$0xff]  ;;  %v4882_v1 = vld [vmem:[%s8371_s14 + $0x48] sm:$0xff] }
0x10bb   :  { %6428 = vrcp.f32 %v4073_v46  ;;  %v4774_v46 = vld [vmem:[%s8369_s12 + $0x28] sm:$0xff] }
0x10bc   :  { %6430 = vrcp.f32 %v4080_v11  ;;  %v4776_v11 = vld [vmem:[%s8369_s12 + $0x38] sm:$0xff] }
0x10bd   :  { %6432 = vrcp.f32 %v4087_v62  ;;  %v6125_v62 = vpack.c.bf16 %v4776_v11, %v4774_v46  ;;  %v4886_v46 = vld [vmem:[%s8371_s14 + $0x68] sm:$0xff] }
0x10c0   :  { %v6419_v21 = vpop.eup %6418 }
0x10c1   :  { %v6421_v5 = vpop.eup %6420  ;;  %v4097_v14 = vmul.f32 %v6419_v21, %v6411_v58  ;;  %v4773_v21 = vld [vmem:[%s8369_s12 + $0x20] sm:$0xff] }
0x10c2   :  { %v6423_v47 = vpop.eup %6422  ;;  %v4099_v19 = vmul.f32 %v6421_v5, %v6413_v44  ;;  %v4775_v5 = vld [vmem:[%s8369_s12 + $0x30] sm:$0xff] }
0x10c3   :  { %v6425_v20 = vpop.eup %6424  ;;  %v4101_v43 = vmul.f32 %v6423_v47, %v6415_v42  ;;  %v6127_v47 = vpack.c.bf16 %v4775_v5, %v4773_v21  ;;  %v4888_v21 = vld [vmem:[%s8371_s14 + $0x78] sm:$0xff] }
0x10c4   :  { %v6427_v8 = vpop.eup %6426  ;;  %v4103_v34 = vmul.f32 %v6425_v20, %v6417_v13  ;;  %v4120_v50 = vcombine.low %v4097_v14, %v4099_v19 }
0x10c5   :  { %v6429_v57 = vpop.eup %6428  ;;  %v4105_v29 = vmul.f32 %v6427_v8, %v6403_v28  ;;  %v4416_v28 = vld [vmem:[%s8367_s10] sm:$0xff]  ;;  %v4780_v8 = vld [vmem:[%s8369_s12 + $0x58] sm:$0xff] }
0x10c6   :  { %v6431_v39 = vpop.eup %6430  ;;  %v4121_v25 = vcombine.low %v4101_v43, %v4103_v34  ;;  %v4128_v30 = vrot.slane %v4120_v50, %v7756_v40  ;;  %v4107_v31 = vmul.f32 %v6429_v57, %v6405_v56  ;;  %v4417_v56 = vld [vmem:[%s8367_s10 + $0x8] sm:$0xff]  ;;  %v4777_v50 = vld [vmem:[%s8369_s12 + $0x40] sm:$0xff]  ;;  %v4779_v57 = vld [vmem:[%s8369_s12 + $0x50] sm:$0xff] }
0x10c7   :  { %v6433_v26 = vpop.eup %6432  ;;  %v4109_v3 = vmul.f32 %v6431_v39, %v6407_v22  ;;  %v6105_v22 = vpack.c.bf16 %v4417_v56, %v4416_v28  ;;  %v4778_v43 = vld [vmem:[%s8369_s12 + $0x48] sm:$0xff]  ;;  %v6131_v39 = vpack.c.bf16 %v4779_v57, %v4777_v50 }
0x10c8   :  { %v4135_v35 = vrot.slane %v4121_v25, %v7756_v40  ;;  %v4111_v36 = vmul.f32 %v6433_v26, %v6409_v24  ;;  %v4137_v17 = vcombine.low %v4105_v29, %v4107_v31  ;;  %v6129_v34 = vpack.c.bf16 %v4780_v8, %v4778_v43  ;;  %v4892_v43 = vld [vmem:[%s8371_s14 + $0x98] sm:$0xff] }
0x10ca   :  { %v4136_v41 = vcombine.low %v4128_v30, %v4135_v35  ;;  %v4138_v32 = vcombine.low %v4109_v3, %v4111_v36  ;;  %v4145_v58 = vrot.slane %v4137_v17, %v7756_v40  ;;  %v4782_v35 = vld [vmem:[%s8369_s12 + $0x68] sm:$0xff]  ;;  %v4784_v36 = vld [vmem:[%s8369_s12 + $0x78] sm:$0xff] }
0x10cc   :  { %4156 = vxpose.xlu1.b32.start.end [1/1] (short) (narrow) %v4136_v41, 8  ;;  %v4152_v44 = vrot.slane %v4138_v32, %v7756_v40 }
0x10ce   :  { %v4153_v42 = vcombine.low %v4145_v58, %v4152_v44  ;;  %v6133_v58 = vpack.c.bf16 %v4784_v36, %v4782_v35  ;;  %v4781_v44 = vld [vmem:[%s8369_s12 + $0x60] sm:$0xff] }
0x10d0   :  { %4188 = vxpose.xlu0.b32.start.end [1/1] (short) (narrow) %v4153_v42, 8  ;;  %v4783_v42 = vld [vmem:[%s8369_s12 + $0x70] sm:$0xff] }
0x10d1   :  { %v6135_v28 = vpack.c.bf16 %v4783_v42, %v4781_v44  ;;  %v4895_v42 = vld [vmem:[%s8371_s14 + $0xb0] sm:$0xff] }
0x114c   :  { %v4172_v24 = vpop.trf.xlu1 }
0x114d   :  { %5396 = vmatmul.mubr.msk.f32.vlgmr.msra.gmra.mrb[26].mxu0 %vm3006_vm1, %v4172_v24 }
0x114e   :  { %5399 = vmatpush3.msra.mxu0 %v4269_v60  ;;  %5400 = vmatprep.mubr.msk.f32.mxu0 %vm6469_vm2, %v6459_v9  ;;  %v4423_v60 = vld [vmem:[%s8367_s10 + $0x38] sm:$0xff]  ;;  %s6474_s10 = smov 40  }
0x114f   :  { %6106 = vmatprep.subr.bf16.mxu0 %v6105_v22  ;;  %v6117_v33 = vpack.c.bf16 %v4423_v60, %v4422_v4  ;;  %v4876_v60 = vld [vmem:[%s8371_s14 + $0x18] sm:$0xff] }
0x1150   :  { %v4204_v13 = vpop.trf.xlu0 }
0x1151   :  { %5401 = vmatmul.mubr.msk.f32.vlgmr.msra.gmra.mrb[28].mxu0 %vm3006_vm1, %v4204_v13  ;;  %v4874_v13 = vld [vmem:[%s8371_s14 + $0x8] sm:$0xff] }
0x1152   :  { %6108 = vmatpush3.bf16.msra.mxu0 %v6105_v22 }
0x1153   :  { %6110 = vmatprep.subr.bf16.mxu0 %v6109_v16 }
0x1156   :  { %6112 = vmatpush3.bf16.msra.mxu0 %v6109_v16  ;;  %v4873_v16 = vld [vmem:[%s8371_s14] sm:$0xff] }
0x1157   :  { %6114 = vmatprep.subr.bf16.mxu0 %v6113_v23  ;;  %v6138_v4 = vpack.c.bf16 %v4874_v13, %v4873_v16  ;;  %v4982_v13 = vld [vmem:[%s8373_s16 + $0x20] sm:$0xff] }
0x115a   :  { %6116 = vmatpush3.bf16.msra.mxu0 %v6113_v23  ;;  %v6472_v23 = vmov 0.0|0.0  }
0x115b   :  { %6118 = vmatprep.subr.bf16.mxu0 %v6117_v33 }
0x115e   :  { %6120 = vmatpush3.bf16.msra.mxu0 %v6117_v33 }
0x115f   :  { %6137 = vmatprep.subr.bf16.mxu0 %v6472_v23 }
0x1220   :  { %v4339_v38 = vpop.f32.mrb[26].mxu0 }
0x1221   :  { %v5397_v52 = vpop.f32.mrb[27].mxu0  ;;  %5419 = vmatprep.mubr.msk.f32.mxu0 %vm2718_vm15, %v4339_v38 }
0x1222   :  { %v6141_v52 = vpack.c.bf16 %v4876_v60, %v4875_v61  ;;  %v4983_v61 = vld [vmem:[%s8373_s16 + $0x28] sm:$0xff]  ;;  %v4985_v60 = vld [vmem:[%s8373_s16 + $0x38] sm:$0xff] }
0x1224   :  { %v4412_v59 = vpop.f32.mrb[28].mxu0 }
0x1225   :  { %v5402_v7 = vpop.f32.mrb[29].mxu0  ;;  %5420 = vmatmul.mubr.msk.f32.vlgmr.msra.gmra.mrb[30].mxu0 %vm2718_vm15, %v4412_v59  ;;  %v4877_v59 = vld [vmem:[%s8371_s14 + $0x20] sm:$0xff] }
0x1226   :  { %6139 = vmatpush1.bf16.msra.mxu0 %v6138_v4  ;;  %v4878_v7 = vld [vmem:[%s8371_s14 + $0x28] sm:$0xff]  ;;  %v4984_v4 = vld [vmem:[%s8373_s16 + $0x30] sm:$0xff] }
0x1227   :  { %6140 = vmatprep.subr.bf16.mxu0 %v6472_v23 }
0x122a   :  { %6142 = vmatpush1.bf16.msra.mxu0 %v6141_v52 }
0x122b   :  { %6143 = vmatprep.subr.bf16.mxu0 %v6472_v23 }
0x12f8   :  { %v5421_v51 = vpop.f32.mrb[30].mxu0 }
0x12f9   :  { %v4503_v54 = vpop.f32.mrb[31].mxu0  ;;  %v4509_v63 = vadd.f32 %v5421_v51, %v5256_v15  ;;  %v4879_v51 = vld [vmem:[%s8371_s14 + $0x30] sm:$0xff] }
0x12fa   :  { %v4504_v0 = vadd.f32 %v5256_v15, %v4503_v54  ;;  %v4880_v54 = vld [vmem:[%s8371_s14 + $0x38] sm:$0xff] }
0x12fc   :  { %5423 = vmatpush3.xpose.msk.msra.mxu1 %vm2718_vm15, %v4504_v0  ;;  %v6147_v0 = vpack.c.bf16 %v4880_v54, %v4879_v51 }
0x12fd   :  { %5427 = vmatprep.subr.mxu1 %v6459_v9 }
0x12ff   :  { %5425 = vmatmul.mubr.msk.f32.vlgmr.msra.gmra.mrb[30].mxu1 %vm2718_vm15, %v8030_v49  ;;  %v4769_v49 = vld [vmem:[%s8369_s12] sm:$0xff] }
0x1300   :  { %5428 = vmatpush3.xpose.msk.msra.mxu1 %vm2718_vm15, %v4509_v63  ;;  %5429 = vmatprep.mubr.msk.f32.mxu1 %vm6469_vm2, %v6459_v9  ;;  %v4881_v63 = vld [vmem:[%s8371_s14 + $0x40] sm:$0xff] }
0x1301   :  { %6122 = vmatprep.subr.bf16.mxu1 %v6121_v27  ;;  %v6150_v45 = vpack.c.bf16 %v4882_v1, %v4881_v63  ;;  %v4884_v27 = vld [vmem:[%s8371_s14 + $0x58] sm:$0xff] }
0x1303   :  { %5430 = vmatmul.mubr.msk.f32.vlgmr.msra.gmra.mrb[32].mxu1 %vm2718_vm15, %v8032_v48  ;;  %v6123_v48 = vpack.c.bf16 %v4771_v55, %v4769_v49  ;;  %v4883_v49 = vld [vmem:[%s8371_s14 + $0x50] sm:$0xff] }
0x1304   :  { %4864 = vmatprep.mubr.f32.mxu1 %v6459_v9  ;;  %v6153_v55 = vpack.c.bf16 %v4884_v27, %v4883_v49 }
0x1305   :  { %6124 = vmatpush1.bf16.msra.mxu1 %v6123_v48  ;;  %v4885_v48 = vld [vmem:[%s8371_s14 + $0x60] sm:$0xff] }
0x1306   :  { %6126 = vmatprep.subr.bf16.mxu1 %v6125_v62  ;;  %v6156_v11 = vpack.c.bf16 %v4886_v46, %v4885_v48  ;;  %v4887_v62 = vld [vmem:[%s8371_s14 + $0x70] sm:$0xff] }
0x1307   :  { %v6159_v5 = vpack.c.bf16 %v4888_v21, %v4887_v62 }
0x1309   :  { %6128 = vmatpush1.bf16.msra.mxu1 %v6127_v47  ;;  %v4890_v47 = vld [vmem:[%s8371_s14 + $0x88] sm:$0xff] }
0x130a   :  { %6130 = vmatprep.subr.bf16.mxu1 %v6129_v34 }
0x130d   :  { %6132 = vmatpush1.bf16.msra.mxu1 %v6131_v39 }
0x130e   :  { %6134 = vmatprep.subr.bf16.mxu1 %v6133_v58  ;;  %v4894_v58 = vld [vmem:[%s8371_s14 + $0xa8] sm:$0xff] }
0x1311   :  { %6136 = vmatpush1.bf16.msra.mxu1 %v6135_v28  ;;  %v4896_v28 = vld [vmem:[%s8371_s14 + $0xb8] sm:$0xff] }
0x1312   :  { %6173 = vmatprep.subr.bf16.mxu1 %v6472_v23 }
0x13d2   :  { %v4584_v14 = vpop.f32.mrb[30].mxu1 }
0x13d3   :  { %v5426_v19 = vpop.f32.mrb[31].mxu1  ;;  %v4664_v20 = vcombine.high %v4584_v14, %v6459_v9  ;;  %v4671_v25 = vrot.slane %v4584_v14, %v7756_v40  ;;  %v4889_v14 = vld [vmem:[%s8371_s14 + $0x80] sm:$0xff] }
0x13d4   :  { %v6162_v19 = vpack.c.bf16 %v4890_v47, %v4889_v14 }
0x13d5   :  { %v4678_v3 = vrot.slane %v4664_v20, %v7756_v40  ;;  %v4891_v20 = vld [vmem:[%s8371_s14 + $0x90] sm:$0xff] }
0x13d6   :  { %v4660_v29 = vpop.f32.mrb[32].mxu1  ;;  %v6165_v8 = vpack.c.bf16 %v4892_v43, %v4891_v20 }
0x13d7   :  { %v4679_v30 = vcombine.high %v4660_v29, %v6459_v9  ;;  %v4686_v31 = vrot.slane %v4660_v29, %v7756_v40  ;;  %v5431_v26 = vpop.f32.mrb[33].mxu1 }
0x13d9   :  { %v4693_v17 = vrot.slane %v4679_v30, %v7756_v40  ;;  %v4694_v41 = vcombine.low %v4671_v25, %v4686_v31  ;;  %v4695_v32 = vcombine.high %v4671_v25, %v4686_v31 }
0x13db   :  { %v8190_v56 = vrot.slane %v4694_v41, %v7785_v12  ;;  %v4710_v22 = vcombine.low %v4678_v3, %v4693_v17  ;;  %v4711_v24 = vcombine.high %v4678_v3, %v4693_v17  ;;  %v4709_v37 = vrot.slane %v4695_v32, %v7785_v12  ;;  %v4893_v32 = vld [vmem:[%s8371_s14 + $0xa0] sm:$0xff] }
0x13dc   :  { %v6168_v44 = vpack.c.bf16 %v4894_v58, %v4893_v32 }
0x13dd   :  { %4735 = vrot.lane.b32.xlu1 %v4709_v37, %s6470_s0  ;;  %v4726_v40 = vcombine.high %v8190_v56, %v6459_v9  ;;  %v4718_v2 = vrot.slane %v4710_v22, %v7785_v12  ;;  %v4727_v53 = vcombine.high %v4709_v37, %v6459_v9  ;;  %v4725_v38 = vrot.slane %v4711_v24, %v7785_v12  ;;  %v4978_v22 = vld [vmem:[%s8373_s16] sm:$0xff]  ;;  %v4979_v24 = vld [vmem:[%s8373_s16 + $0x8] sm:$0xff]  ;;  %v4980_v37 = vld [vmem:[%s8373_s16 + $0x10] sm:$0xff] }
0x13de   :  { %v6144_v12 = vpack.c.bf16 %v4878_v7, %v4877_v59 }
0x13df   :  { %4731 = vrot.lane.b32.xlu0 %v4726_v40, %s6471_s4  ;;  %v4728_v33 = vcombine.high %v4718_v2, %v6459_v9  ;;  %v4729_v15 = vcombine.high %v4725_v38, %v6459_v9  ;;  %v6174_v40 = vpack.c.bf16 %v4979_v24, %v4978_v22 }
0x13e0   :  { %6145 = vmatpush1.bf16.msra.mxu0 %v6144_v12 }
0x13e1   :  { %4739 = vrot.lane.b32.xlu1 %v4727_v53, %s6473_s24  ;;  %6146 = vmatprep.subr.bf16.mxu0 %v6472_v23  ;;  %v6180_v53 = vpack.c.bf16 %v4983_v61, %v4982_v13 }
0x13e3   :  { %4747 = vrot.lane.b32.xlu0 %v4728_v33, %s6474_s10  ;;  %v6183_v33 = vpack.c.bf16 %v4985_v60, %v4984_v4 }
0x13e4   :  { %6148 = vmatpush1.bf16.msra.mxu0 %v6147_v0 }
0x13e5   :  { %4743 = vrot.lane.b32.xlu1 %v4718_v2, %s6461_s1  ;;  %6149 = vmatprep.subr.bf16.mxu0 %v6472_v23  ;;  %v4981_v2 = vld [vmem:[%s8373_s16 + $0x18] sm:$0xff] }
0x13e6   :  { %v6177_v16 = vpack.c.bf16 %v4981_v2, %v4980_v37 }
0x13e7   :  { %4755 = vrot.lane.b32.xlu0 %v4729_v15, %s6475_s8 }
0x13e8   :  { %6151 = vmatpush1.bf16.msra.mxu0 %v6150_v45 }
0x13e9   :  { %4751 = vrot.lane.b32.xlu1 %v4725_v38, %s6476_s9  ;;  %6152 = vmatprep.subr.bf16.mxu0 %v6472_v23  ;;  %v4785_v38 = vld [vmem:[%s8370_s13] sm:$0x3] }
0x13ea   :  { %v4790_v52 = vrot.slane %v4785_v38, %v943_v10  ;;  %v4794_v59 = vrot.slane %v4785_v38, %v947_v18  ;;  %v4987_v10 = vld [vmem:[%s8373_s16 + $0x48] sm:$0xff]  ;;  %v5264_v18 = vld [vmem:[%s8372_s15] ss:$0 sm:$0xff] }
0x13ec   :  { %6154 = vmatpush1.bf16.msra.mxu0 %v6153_v55 }
0x13ed   :  { %6155 = vmatprep.subr.bf16.mxu0 %v6472_v23 }
0x13f0   :  { %6157 = vmatpush1.bf16.msra.mxu0 %v6156_v11 }
0x13f1   :  { %6158 = vmatprep.subr.bf16.mxu0 %v6472_v23 }
0x13f4   :  { %6160 = vmatpush1.bf16.msra.mxu0 %v6159_v5 }
0x13f5   :  { %6161 = vmatprep.subr.bf16.mxu0 %v6472_v23 }
0x13f8   :  { %6163 = vmatpush1.bf16.msra.mxu0 %v6162_v19 }
0x13f9   :  { %6164 = vmatprep.subr.bf16.mxu0 %v6472_v23 }
0x13fc   :  { %6166 = vmatpush1.bf16.msra.mxu0 %v6165_v8 }
0x13fd   :  { %6167 = vmatprep.subr.bf16.mxu0 %v6472_v23 }
0x1400   :  { %6169 = vmatpush1.bf16.msra.mxu0 %v6168_v44 }
0x1401   :  { %6170 = vmatprep.subr.bf16.mxu0 %v6472_v23 }
0x144f   :  { %v4736_v34 = vpop.permute.xlu1 %4735 }
0x1451   :  { %v4732_v50 = vpop.permute.xlu0 %4731 }
0x1452   :  { %v4758_v57 = vsel %vm3006_vm1, %v8190_v56, %v4732_v50  ;;  %v6171_v56 = vpack.c.bf16 %v4896_v28, %v4895_v42 }
0x1453   :  { %v4740_v29 = vpop.permute.xlu1 %4739  ;;  %v4759_v39 = vsel %vm2800_vm0, %v4758_v57, %v4736_v34 }
0x1454   :  { %v4761_v30 = vsel %vm4760_vm3, %v4759_v39, %v4740_v29  ;;  %6172 = vmatpush1.bf16.msra.mxu0 %v6171_v56 }
0x1455   :  { %v4748_v25 = vpop.permute.xlu0 %4747 }
0x1457   :  { %v4744_v31 = vpop.permute.xlu1 %4743 }
0x1458   :  { %v4762_v26 = vsel %vm2610_vm14, %v4761_v30, %v4744_v31 }
0x1459   :  { %v4764_v35 = vsel %vm4763_vm4, %v4762_v26, %v4748_v25  ;;  %v4756_v36 = vpop.permute.xlu0 %4755 }
0x145b   :  { %v4752_v3 = vpop.permute.xlu1 %4751 }
0x145c   :  { %v4766_v17 = vsel %vm4765_vm5, %v4764_v35, %v4752_v3 }
0x145d   :  { %v4768_v41 = vsel %vm4767_vm6, %v4766_v17, %v4756_v36 }
0x145e   :  { %5263 = vmatmul.mubr.msk.f32.vlgmr.msra.gmra.mrb[34].mxu1 %vm2718_vm15, %v4768_v41 }
0x145f   :  { %5454 = vmatprep.mubr.msk.f32.mxu1 %vm6469_vm2, %v6459_v9  ;;  %6175 = vmatpush3.bf16.msra.mxu1 %v6174_v40 }
0x1460   :  { %6176 = vmatprep.subr.bf16.mxu1 %v6472_v23 }
0x1463   :  { %6178 = vmatpush3.bf16.msra.mxu1 %v6177_v16 }
0x1464   :  { %6179 = vmatprep.subr.bf16.mxu1 %v6472_v23 }
0x1467   :  { %6181 = vmatpush3.bf16.msra.mxu1 %v6180_v53 }
0x1468   :  { %6182 = vmatprep.subr.bf16.mxu1 %v6472_v23 }
0x146b   :  { %6184 = vmatpush3.bf16.msra.mxu1 %v6183_v33 }
0x146c   :  { %6185 = vmatprep.subr.bf16.mxu1 %v6472_v23  ;;  %v4986_v23 = vld [vmem:[%s8373_s16 + $0x40] sm:$0xff]  ;;  %s6434_s16 = scalar_lea.vmem %s5083_s20, 32 }
0x146d   :  { %v6186_v63 = vpack.c.bf16 %v4987_v10, %v4986_v23  ;;  %p6435_p0 = scmp.ne.s32.totalorder %s5083_s20, %s6434_s16  ;;  %p6440_p2 = scmp.lt.s32.totalorder %s6434_s16, %s6434_s16 }
0x146f   :  { %6187 = vmatpush3.bf16.msra.mxu1 %v6186_v63  ;;  %p6441_p3 = por %p6440_p2, %p6439_p1 }
0x1470   :  { %5452 = vmatprep.subr.mxu1 %v6459_v9  ;;  %v5266_v9 = vld [vmem:[%s8374_s17] ss:$0 sm:$0xff] }
0x1471   :  { %p6442_p4 = pnand %p6441_p3, %p6435_p0 }
0x1473   :  { %5453 = vmatpush3.msk.msra.mxu1 %vm5000_vm7, %v4988_v6 }
0x1531   :  { %v4866_v7 = vpop.f32.mrb[34].mxu1 }
0x1532   :  { %v4867_v15 = vadd.f32 %v4866_v7, %v4790_v52  ;;  %v4868_v12 = vpop.f32.mrb[35].mxu1 }
0x1533   :  { %v4869_v51 = vadd.f32 %v4868_v12, %v4794_v59 }
0x1534   :  { %v4871_v0 = vmax.f32 %v4867_v15, 0.0 }
0x1535   :  { %v4872_v54 = vmax.f32 %v4869_v51, 0.0 }
0x1537   :  { %5265 = vmatprep.mubr.msk.f32.mxu0 %vm2718_vm15, %v4872_v54 }
0x1538   :  { %4972 = vmatmul.mubr.f32.vlgmr.msra.gmra.mrb[32].mxu0 %v4871_v0 }
0x160b   :  { %v4973_v1 = vpop.f32.mrb[32].mxu0 }
0x160c   :  { %v4974_v45 = vadd.f32 %v5264_v18, %v4973_v1  ;;  %v4975_v49 = vpop.f32.mrb[33].mxu0 }
0x160e   :  { %v4977_v27 = vmax.f32 %v4974_v45, 0.0 }
0x1610   :  { %5455 = vmatmul.mubr.msk.f32.vlgmr.msra.gmra.mrb[36].mxu1 %vm4996_vm8, %v4977_v27 }
0x16e3   :  { %v5070_v55 = vpop.f32.mrb[36].mxu1 }
0x16e4   :  { %v5071_v48 = vadd.f32 %v5266_v9, %v5070_v55  ;;  %v5456_v46 = vpop.f32.mrb[37].mxu1 }
0x16e6   :  { %5075 = vst.msk [vmem:[#allocation4] sm:$0x3] %vm5074_vm9, %v5071_v48 }
0x16e7   :  { %6445 = shalt.err (!%p6442_p4)
}
0x16e8   :  { %s6446_s21 = scalar_lea.hbm %s8375_s18, 32 }
0x16e9   :  { %p6447_p5 = scmp.ne.s32.totalorder %s8375_s18, %s6446_s21  ;;  %p6450_p6 = scmp.lt.u32.totalorder %s6446_s21, %s8375_s18 }
0x16eb   :  { %p6452_p7 = pnand %p6450_p6, %p6447_p5 }
0x16ed   :  { %6455 = shalt.err (!%p6452_p7)
}
0x16ee   :  { %5085 = dma.vmem_to_hbm [thread:$0]  %s5083_s20, 32, %s8375_s18, [#allocation5]  }
0x16ef   :  { %6456 = dma.done.wait [#allocation5], 32  }
0x16f0   :  { %6457 = vsyncadd [#allocation5], 4294967264 }
0x16f1   :  { %5089 = vsyncpa [#allocation5], 1 }

</bundles_post_ra>
